<compile_context>
chip_gen: v7x
topology: tpu7x:2x2x1
jax: 0.10.0
libtpu: 0.0.40
codegen_flags: <defaults>
</compile_context>

<pallas_src>
import functools

import jax
import jax.numpy as jnp
from jax import lax
from jax.experimental import pallas as pl
from jax.experimental.pallas import tpu as pltpu


def _digit_caps_kernel(u_ref, w_ref, v_ref, *, cin: int, cout: int,
                       routing_iterations: int, approx_recip: bool):
    """One grid step: dynamic routing for a block of `jt` output capsules.

    u_ref : (B, Cin, P)        f32          -- resident across the whole grid
    w_ref : (jt, Cin*Cout, P)  bf16 or f32  -- row (c*Cout + o) holds W[j, :, c, o]
    v_ref : (jt, B, Cout)      f32          -- squashed output vectors
    """
    B = u_ref.shape[0]
    P = u_ref.shape[2]
    jt = w_ref.shape[0]

    u = u_ref[...]                                                  # (B, Cin, P) f32
    # Hoist the per-input-channel slices of u once; reused by every capsule.
    u_slices = [u[:, c, :][:, None, :] for c in range(cin)]          # each (B, 1, P)

    # Static fully-unrolled loop over the jt capsules of this block
    # (jt is small; same trace as lax.fori_loop(..., unroll=True)).
    for jj in range(jt):
        w_j = w_ref[jj]                                             # (Cin*Cout, P)

        # u_hat[b, o, p] = sum_c u[b, c, p] * W[j, p, c, o]
        u_hat = jnp.zeros((B, cout, P), jnp.float32)
        for c in range(cin):
            w_c = w_j[c * cout:(c + 1) * cout, :].astype(jnp.float32)   # (Cout, P)
            u_hat = u_hat + u_slices[c] * w_c[None, :, :]               # (B, Cout, P)

        # Dynamic routing.  b_ij kept as (B, P): the reference's
        # (J, B, P, 1, Cout) logits are constant along Cout, so this is exact.
        b_ij = jnp.zeros((B, P), jnp.float32)
        v_j = None
        for it in range(routing_iterations):
            # softmax over the node axis P (lane reduction)
            m = jnp.max(b_ij, axis=-1, keepdims=True)                   # (B, 1)
            e = jnp.exp(b_ij - m)                                       # (B, P)
            denom = jnp.sum(e, axis=-1, keepdims=True)                  # (B, 1)
            if approx_recip:
                c_ij = e * pl.reciprocal(denom, approx=True)            # (B, P)
            else:
                c_ij = e / denom                                        # (B, P)

            # s_j[b, o] = sum_p c_ij[b, p] * u_hat[b, o, p]  (lane reduction)
            s_j = jnp.sum(u_hat * c_ij[:, None, :], axis=-1)            # (B, Cout)

            # squash (same formula as the PyTorch module; no epsilon, to match)
            sqn = jnp.sum(s_j * s_j, axis=-1, keepdims=True)            # (B, 1)
            v_j = s_j * (sqn / (1.0 + sqn)) * lax.rsqrt(sqn)            # (B, Cout)

            if it < routing_iterations - 1:
                # a_ij[b, p] = sum_o u_hat[b, o, p] * v_j[b, o]  (sublane reduce)
                a_ij = jnp.sum(u_hat * v_j[:, :, None], axis=1)         # (B, P)
                b_ij = b_ij + a_ij

        v_ref[jj] = v_j.astype(v_ref.dtype)                             # (B, Cout)


def _pick_capsule_block(J, P, cin, cout, w_bytes_per_elem,
                        w_buffer_budget_bytes=6 * 1024 * 1024):
    """Largest divisor of J whose W block fits a per-buffer VMEM budget that is
    safe on v7x (64 MiB physical) as well as v5e/v6e, preferring >= 2 grid
    steps so the capsule axis can shard across the two v7x TensorCores."""
    per_capsule = P * cin * cout * w_bytes_per_elem
    max_jt = max(1, int(w_buffer_budget_bytes // per_capsule))
    divisors = [d for d in range(1, J + 1) if J % d == 0 and d <= max_jt]
    multi_step = [d for d in divisors if J // d >= 2]
    return max(multi_step) if multi_step else max(divisors)


def digit_caps_forward(u, W, *, routing_iterations: int = 3,
                       weight_dtype=jnp.bfloat16, approx_recip: bool = True,
                       capsules_per_step=None):
    """u: (B, P, Cin) f32; W: (J, P, Cin, Cout) f32 -> (J, B, 1, 1, Cout) f32."""
    B, P, Cin = u.shape
    J, P2, Cin2, Cout = W.shape
    assert (P2, Cin2) == (P, Cin)

    # Layout transposes happen once in XLA (outside the kernel):
    #   u -> (B, Cin, P); W -> (J, Cin*Cout, P) with row (c*Cout + o) = W[j,:,c,o].
    u_t = jnp.transpose(u, (0, 2, 1)).astype(jnp.float32)
    w_t = jnp.transpose(W, (0, 2, 3, 1)).reshape(J, Cin * Cout, P)
    w_t = w_t.astype(weight_dtype)      # stream the HBM-bound weight read in bf16

    jt = capsules_per_step or _pick_capsule_block(
        J, P, Cin, Cout, jnp.dtype(weight_dtype).itemsize)
    assert J % jt == 0

    kernel = functools.partial(_digit_caps_kernel, cin=Cin, cout=Cout,
                               routing_iterations=routing_iterations,
                               approx_recip=approx_recip)

    out = pl.pallas_call(
        kernel,
        out_shape=jax.ShapeDtypeStruct((J, B, Cout), jnp.float32),
        grid_spec=pltpu.PrefetchScalarGridSpec(
            num_scalar_prefetch=0,
            grid=(J // jt,),                                          # capsule blocks
            in_specs=[
                pl.BlockSpec((B, Cin, P), lambda g: (0, 0, 0)),        # u (resident)
                pl.BlockSpec((jt, Cin * Cout, P), lambda g: (g, 0, 0)),  # W block
            ],
            out_specs=pl.BlockSpec((jt, B, Cout), lambda g: (g, 0, 0)),
        ),
        compiler_params=pltpu.CompilerParams(
            dimension_semantics=("parallel",),     # shards capsule blocks on v7x
            vmem_limit_bytes=32 * 1024 * 1024,     # safe on v5e/v6e/v7x
        ),
    )(u_t, w_t)

    # TODO(synk): for large batch sizes add B as a second ("parallel") grid axis.
    # Match the PyTorch output shape (num_capsules, B, 1, 1, Cout).
    return out[:, :, None, None, :]


def digit_caps_reference(u, W, routing_iterations: int = 3):
    """Pure-JAX transcription of the PyTorch forward, for validation."""
    u5 = u[None, :, :, None, :]          # (1, B, P, 1, Cin)
    W5 = W[:, None, :, :, :]             # (J, 1, P, Cin, Cout)
    u_hat = jnp.matmul(u5, W5)           # (J, B, P, 1, Cout)
    b_ij = jnp.zeros_like(u_hat)

    def squash(x):
        sqn = jnp.sum(x * x, axis=-1, keepdims=True)
        return (sqn / (1.0 + sqn)) * x / jnp.sqrt(sqn)

    v_j = None
    for it in range(routing_iterations):
        c_ij = jax.nn.softmax(b_ij, axis=2)
        s_j = jnp.sum(c_ij * u_hat, axis=2, keepdims=True)
        v_j = squash(s_j)
        if it < routing_iterations - 1:
            a_ij = jnp.sum(u_hat * v_j, axis=-1, keepdims=True)
            b_ij = b_ij + a_ij
    return v_j  # (J, B, 1, 1, Cout)


if __name__ == "__main__":
    # Small shapes consistent with the module (scaled down from 40 / 6272 / 8 / 16)
    num_capsules = 8            # num_capsules
    P = 256                     # previous_layer_nodes
    Cin = 8                     # in_channels
    Cout = 16                   # out_channels
    B = 2                       # batch

    key = jax.random.PRNGKey(0)
    k_w, k_u = jax.random.split(key)
    W = jax.random.normal(k_w, (num_capsules, P, Cin, Cout), dtype=jnp.float32)
    u = jax.random.normal(k_u, (B, P, Cin), dtype=jnp.float32)

    fwd = jax.jit(functools.partial(digit_caps_forward))

    # Production-oriented path: bf16 weight streaming + approx EUP reciprocal.
    v = jax.block_until_ready(fwd(u, W))
    assert v.shape == (num_capsules, B, 1, 1, Cout), v.shape
    W_rounded = W.astype(jnp.bfloat16).astype(jnp.float32)
    v_ref_bf16 = digit_caps_reference(u, W_rounded)
    # Loose tolerance: only the approximate EUP reciprocal + reduction order differ.
    assert jnp.allclose(v, v_ref_bf16, atol=2e-2, rtol=2e-2), \
        float(jnp.max(jnp.abs(v - v_ref_bf16)))

    # Exactness path: f32 weights, exact divide -> tight check of the math/layout.
    fwd_exact = jax.jit(functools.partial(
        digit_caps_forward, weight_dtype=jnp.float32, approx_recip=False))
    v_exact = jax.block_until_ready(fwd_exact(u, W))
    v_ref = digit_caps_reference(u, W)
    assert jnp.allclose(v_exact, v_ref, atol=1e-4, rtol=1e-4), \
        float(jnp.max(jnp.abs(v_exact - v_ref)))

    print("KERNEL_OK")
</pallas_src>

<mosaic_0001>
module attributes {stable_mosaic.version = 11 : i64} {
  func.func @_digit_caps_kernel(%arg0: i32, %arg1: memref<2x8x256xf32, #tpu.memory_space<vmem>>, %arg2: memref<4x128x256xbf16, #tpu.memory_space<vmem>>, %arg3: memref<4x2x16xf32, #tpu.memory_space<vmem>>) attributes {dimension_semantics = [#tpu.dimension_semantics<parallel>], iteration_bounds = array<i64: 2>, scalar_prefetch = 0 : i64, scratch_operands = 0 : i64, tpu.core_type = #tpu.core_type<tc>, window_params = [{pipeline_mode = #tpu.pipeline_mode<synchronous>, transform_indices = @transform_0, window_bounds = array<i64: 2, 8, 256>}, {transform_indices = @transform_1, window_bounds = array<i64: 4, 128, 256>}, {transform_indices = @transform_2, window_bounds = array<i64: 4, 2, 16>}]} {
    %c0 = arith.constant 0 : index
    %c0_0 = arith.constant 0 : index
    %c0_1 = arith.constant 0 : index
    %0 = vector.load %arg1[%c0, %c0_0, %c0_1] : memref<2x8x256xf32, #tpu.memory_space<vmem>>, vector<2x8x256xf32>
    %1 = vector.extract_strided_slice %0 {offsets = [0, 0, 0], sizes = [2, 1, 256], strides = [1, 1, 1]} : vector<2x8x256xf32> to vector<2x1x256xf32>
    %2 = vector.shape_cast %1 : vector<2x1x256xf32> to vector<2x256xf32>
    %3 = vector.shape_cast %2 : vector<2x256xf32> to vector<2x1x256xf32>
    %4 = vector.extract_strided_slice %0 {offsets = [0, 1, 0], sizes = [2, 1, 256], strides = [1, 1, 1]} : vector<2x8x256xf32> to vector<2x1x256xf32>
    %5 = vector.shape_cast %4 : vector<2x1x256xf32> to vector<2x256xf32>
    %6 = vector.shape_cast %5 : vector<2x256xf32> to vector<2x1x256xf32>
    %7 = vector.extract_strided_slice %0 {offsets = [0, 2, 0], sizes = [2, 1, 256], strides = [1, 1, 1]} : vector<2x8x256xf32> to vector<2x1x256xf32>
    %8 = vector.shape_cast %7 : vector<2x1x256xf32> to vector<2x256xf32>
    %9 = vector.shape_cast %8 : vector<2x256xf32> to vector<2x1x256xf32>
    %10 = vector.extract_strided_slice %0 {offsets = [0, 3, 0], sizes = [2, 1, 256], strides = [1, 1, 1]} : vector<2x8x256xf32> to vector<2x1x256xf32>
    %11 = vector.shape_cast %10 : vector<2x1x256xf32> to vector<2x256xf32>
    %12 = vector.shape_cast %11 : vector<2x256xf32> to vector<2x1x256xf32>
    %13 = vector.extract_strided_slice %0 {offsets = [0, 4, 0], sizes = [2, 1, 256], strides = [1, 1, 1]} : vector<2x8x256xf32> to vector<2x1x256xf32>
    %14 = vector.shape_cast %13 : vector<2x1x256xf32> to vector<2x256xf32>
    %15 = vector.shape_cast %14 : vector<2x256xf32> to vector<2x1x256xf32>
    %16 = vector.extract_strided_slice %0 {offsets = [0, 5, 0], sizes = [2, 1, 256], strides = [1, 1, 1]} : vector<2x8x256xf32> to vector<2x1x256xf32>
    %17 = vector.shape_cast %16 : vector<2x1x256xf32> to vector<2x256xf32>
    %18 = vector.shape_cast %17 : vector<2x256xf32> to vector<2x1x256xf32>
    %19 = vector.extract_strided_slice %0 {offsets = [0, 6, 0], sizes = [2, 1, 256], strides = [1, 1, 1]} : vector<2x8x256xf32> to vector<2x1x256xf32>
    %20 = vector.shape_cast %19 : vector<2x1x256xf32> to vector<2x256xf32>
    %21 = vector.shape_cast %20 : vector<2x256xf32> to vector<2x1x256xf32>
    %22 = vector.extract_strided_slice %0 {offsets = [0, 7, 0], sizes = [2, 1, 256], strides = [1, 1, 1]} : vector<2x8x256xf32> to vector<2x1x256xf32>
    %23 = vector.shape_cast %22 : vector<2x1x256xf32> to vector<2x256xf32>
    %24 = vector.shape_cast %23 : vector<2x256xf32> to vector<2x1x256xf32>
    %c0_2 = arith.constant 0 : index
    %c0_3 = arith.constant 0 : index
    %c0_4 = arith.constant 0 : index
    %25 = vector.load %arg2[%c0_2, %c0_3, %c0_4] : memref<4x128x256xbf16, #tpu.memory_space<vmem>>, vector<1x128x256xbf16>
    %26 = vector.shape_cast %25 : vector<1x128x256xbf16> to vector<128x256xbf16>
    %cst = arith.constant 0.000000e+00 : f32
    %27 = vector.broadcast %cst : f32 to vector<2x16x256xf32>
    %28 = vector.extract_strided_slice %26 {offsets = [0, 0], sizes = [16, 256], strides = [1, 1]} : vector<128x256xbf16> to vector<16x256xbf16>
    %29 = arith.extf %28 : vector<16x256xbf16> to vector<16x256xf32>
    %30 = vector.shape_cast %29 : vector<16x256xf32> to vector<1x16x256xf32>
    %31 = vector.broadcast %3 : vector<2x1x256xf32> to vector<2x16x256xf32>
    %32 = vector.broadcast %30 : vector<1x16x256xf32> to vector<2x16x256xf32>
    %33 = arith.mulf %31, %32 : vector<2x16x256xf32>
    %34 = arith.addf %27, %33 : vector<2x16x256xf32>
    %35 = vector.extract_strided_slice %26 {offsets = [16, 0], sizes = [16, 256], strides = [1, 1]} : vector<128x256xbf16> to vector<16x256xbf16>
    %36 = arith.extf %35 : vector<16x256xbf16> to vector<16x256xf32>
    %37 = vector.shape_cast %36 : vector<16x256xf32> to vector<1x16x256xf32>
    %38 = vector.broadcast %6 : vector<2x1x256xf32> to vector<2x16x256xf32>
    %39 = vector.broadcast %37 : vector<1x16x256xf32> to vector<2x16x256xf32>
    %40 = arith.mulf %38, %39 : vector<2x16x256xf32>
    %41 = arith.addf %34, %40 : vector<2x16x256xf32>
    %42 = vector.extract_strided_slice %26 {offsets = [32, 0], sizes = [16, 256], strides = [1, 1]} : vector<128x256xbf16> to vector<16x256xbf16>
    %43 = arith.extf %42 : vector<16x256xbf16> to vector<16x256xf32>
    %44 = vector.shape_cast %43 : vector<16x256xf32> to vector<1x16x256xf32>
    %45 = vector.broadcast %9 : vector<2x1x256xf32> to vector<2x16x256xf32>
    %46 = vector.broadcast %44 : vector<1x16x256xf32> to vector<2x16x256xf32>
    %47 = arith.mulf %45, %46 : vector<2x16x256xf32>
    %48 = arith.addf %41, %47 : vector<2x16x256xf32>
    %49 = vector.extract_strided_slice %26 {offsets = [48, 0], sizes = [16, 256], strides = [1, 1]} : vector<128x256xbf16> to vector<16x256xbf16>
    %50 = arith.extf %49 : vector<16x256xbf16> to vector<16x256xf32>
    %51 = vector.shape_cast %50 : vector<16x256xf32> to vector<1x16x256xf32>
    %52 = vector.broadcast %12 : vector<2x1x256xf32> to vector<2x16x256xf32>
    %53 = vector.broadcast %51 : vector<1x16x256xf32> to vector<2x16x256xf32>
    %54 = arith.mulf %52, %53 : vector<2x16x256xf32>
    %55 = arith.addf %48, %54 : vector<2x16x256xf32>
    %56 = vector.extract_strided_slice %26 {offsets = [64, 0], sizes = [16, 256], strides = [1, 1]} : vector<128x256xbf16> to vector<16x256xbf16>
    %57 = arith.extf %56 : vector<16x256xbf16> to vector<16x256xf32>
    %58 = vector.shape_cast %57 : vector<16x256xf32> to vector<1x16x256xf32>
    %59 = vector.broadcast %15 : vector<2x1x256xf32> to vector<2x16x256xf32>
    %60 = vector.broadcast %58 : vector<1x16x256xf32> to vector<2x16x256xf32>
    %61 = arith.mulf %59, %60 : vector<2x16x256xf32>
    %62 = arith.addf %55, %61 : vector<2x16x256xf32>
    %63 = vector.extract_strided_slice %26 {offsets = [80, 0], sizes = [16, 256], strides = [1, 1]} : vector<128x256xbf16> to vector<16x256xbf16>
    %64 = arith.extf %63 : vector<16x256xbf16> to vector<16x256xf32>
    %65 = vector.shape_cast %64 : vector<16x256xf32> to vector<1x16x256xf32>
    %66 = vector.broadcast %18 : vector<2x1x256xf32> to vector<2x16x256xf32>
    %67 = vector.broadcast %65 : vector<1x16x256xf32> to vector<2x16x256xf32>
    %68 = arith.mulf %66, %67 : vector<2x16x256xf32>
    %69 = arith.addf %62, %68 : vector<2x16x256xf32>
    %70 = vector.extract_strided_slice %26 {offsets = [96, 0], sizes = [16, 256], strides = [1, 1]} : vector<128x256xbf16> to vector<16x256xbf16>
    %71 = arith.extf %70 : vector<16x256xbf16> to vector<16x256xf32>
    %72 = vector.shape_cast %71 : vector<16x256xf32> to vector<1x16x256xf32>
    %73 = vector.broadcast %21 : vector<2x1x256xf32> to vector<2x16x256xf32>
    %74 = vector.broadcast %72 : vector<1x16x256xf32> to vector<2x16x256xf32>
    %75 = arith.mulf %73, %74 : vector<2x16x256xf32>
    %76 = arith.addf %69, %75 : vector<2x16x256xf32>
    %77 = vector.extract_strided_slice %26 {offsets = [112, 0], sizes = [16, 256], strides = [1, 1]} : vector<128x256xbf16> to vector<16x256xbf16>
    %78 = arith.extf %77 : vector<16x256xbf16> to vector<16x256xf32>
    %79 = vector.shape_cast %78 : vector<16x256xf32> to vector<1x16x256xf32>
    %80 = vector.broadcast %24 : vector<2x1x256xf32> to vector<2x16x256xf32>
    %81 = vector.broadcast %79 : vector<1x16x256xf32> to vector<2x16x256xf32>
    %82 = arith.mulf %80, %81 : vector<2x16x256xf32>
    %83 = arith.addf %76, %82 : vector<2x16x256xf32>
    %cst_5 = arith.constant 0.000000e+00 : f32
    %84 = vector.broadcast %cst_5 : f32 to vector<2x256xf32>
    %cst_6 = arith.constant dense<0xFF800000> : vector<2xf32>
    %85 = vector.multi_reduction <maximumf>, %84, %cst_6 [1] : vector<2x256xf32> to vector<2xf32>
    %86 = vector.shape_cast %85 : vector<2xf32> to vector<2x1xf32>
    %87 = vector.broadcast %86 : vector<2x1xf32> to vector<2x256xf32>
    %88 = arith.subf %84, %87 : vector<2x256xf32>
    %89 = math.exp %88 : vector<2x256xf32>
    %cst_7 = arith.constant dense<0.000000e+00> : vector<2xf32>
    %90 = vector.multi_reduction <add>, %89, %cst_7 [1] : vector<2x256xf32> to vector<2xf32>
    %91 = vector.shape_cast %90 : vector<2xf32> to vector<2x1xf32>
    %92 = tpu.reciprocal %91 {approx = true} : vector<2x1xf32> -> vector<2x1xf32>
    %93 = vector.broadcast %92 : vector<2x1xf32> to vector<2x256xf32>
    %94 = arith.mulf %89, %93 : vector<2x256xf32>
    %95 = vector.shape_cast %94 : vector<2x256xf32> to vector<2x1x256xf32>
    %96 = vector.broadcast %95 : vector<2x1x256xf32> to vector<2x16x256xf32>
    %97 = arith.mulf %83, %96 : vector<2x16x256xf32>
    %cst_8 = arith.constant dense<0.000000e+00> : vector<2x16xf32>
    %98 = vector.multi_reduction <add>, %97, %cst_8 [2] : vector<2x16x256xf32> to vector<2x16xf32>
    %99 = arith.mulf %98, %98 : vector<2x16xf32>
    %cst_9 = arith.constant dense<0.000000e+00> : vector<2xf32>
    %100 = vector.multi_reduction <add>, %99, %cst_9 [1] : vector<2x16xf32> to vector<2xf32>
    %101 = vector.shape_cast %100 : vector<2xf32> to vector<2x1xf32>
    %cst_10 = arith.constant 1.000000e+00 : f32
    %102 = vector.broadcast %cst_10 : f32 to vector<2x1xf32>
    %103 = arith.addf %102, %101 : vector<2x1xf32>
    %104 = arith.divf %101, %103 : vector<2x1xf32>
    %105 = vector.broadcast %104 : vector<2x1xf32> to vector<2x16xf32>
    %106 = arith.mulf %98, %105 : vector<2x16xf32>
    %107 = math.rsqrt %101 : vector<2x1xf32>
    %108 = vector.broadcast %107 : vector<2x1xf32> to vector<2x16xf32>
    %109 = arith.mulf %106, %108 : vector<2x16xf32>
    %110 = vector.shape_cast %109 : vector<2x16xf32> to vector<2x16x1xf32>
    %111 = vector.broadcast %110 : vector<2x16x1xf32> to vector<2x16x256xf32>
    %112 = arith.mulf %83, %111 : vector<2x16x256xf32>
    %cst_11 = arith.constant dense<0.000000e+00> : vector<2x256xf32>
    %113 = vector.multi_reduction <add>, %112, %cst_11 [1] : vector<2x16x256xf32> to vector<2x256xf32>
    %114 = arith.addf %84, %113 : vector<2x256xf32>
    %cst_12 = arith.constant dense<0xFF800000> : vector<2xf32>
    %115 = vector.multi_reduction <maximumf>, %114, %cst_12 [1] : vector<2x256xf32> to vector<2xf32>
    %116 = vector.shape_cast %115 : vector<2xf32> to vector<2x1xf32>
    %117 = vector.broadcast %116 : vector<2x1xf32> to vector<2x256xf32>
    %118 = arith.subf %114, %117 : vector<2x256xf32>
    %119 = math.exp %118 : vector<2x256xf32>
    %cst_13 = arith.constant dense<0.000000e+00> : vector<2xf32>
    %120 = vector.multi_reduction <add>, %119, %cst_13 [1] : vector<2x256xf32> to vector<2xf32>
    %121 = vector.shape_cast %120 : vector<2xf32> to vector<2x1xf32>
    %122 = tpu.reciprocal %121 {approx = true} : vector<2x1xf32> -> vector<2x1xf32>
    %123 = vector.broadcast %122 : vector<2x1xf32> to vector<2x256xf32>
    %124 = arith.mulf %119, %123 : vector<2x256xf32>
    %125 = vector.shape_cast %124 : vector<2x256xf32> to vector<2x1x256xf32>
    %126 = vector.broadcast %125 : vector<2x1x256xf32> to vector<2x16x256xf32>
    %127 = arith.mulf %83, %126 : vector<2x16x256xf32>
    %cst_14 = arith.constant dense<0.000000e+00> : vector<2x16xf32>
    %128 = vector.multi_reduction <add>, %127, %cst_14 [2] : vector<2x16x256xf32> to vector<2x16xf32>
    %129 = arith.mulf %128, %128 : vector<2x16xf32>
    %cst_15 = arith.constant dense<0.000000e+00> : vector<2xf32>
    %130 = vector.multi_reduction <add>, %129, %cst_15 [1] : vector<2x16xf32> to vector<2xf32>
    %131 = vector.shape_cast %130 : vector<2xf32> to vector<2x1xf32>
    %cst_16 = arith.constant 1.000000e+00 : f32
    %132 = vector.broadcast %cst_16 : f32 to vector<2x1xf32>
    %133 = arith.addf %132, %131 : vector<2x1xf32>
    %134 = arith.divf %131, %133 : vector<2x1xf32>
    %135 = vector.broadcast %134 : vector<2x1xf32> to vector<2x16xf32>
    %136 = arith.mulf %128, %135 : vector<2x16xf32>
    %137 = math.rsqrt %131 : vector<2x1xf32>
    %138 = vector.broadcast %137 : vector<2x1xf32> to vector<2x16xf32>
    %139 = arith.mulf %136, %138 : vector<2x16xf32>
    %140 = vector.shape_cast %139 : vector<2x16xf32> to vector<2x16x1xf32>
    %141 = vector.broadcast %140 : vector<2x16x1xf32> to vector<2x16x256xf32>
    %142 = arith.mulf %83, %141 : vector<2x16x256xf32>
    %cst_17 = arith.constant dense<0.000000e+00> : vector<2x256xf32>
    %143 = vector.multi_reduction <add>, %142, %cst_17 [1] : vector<2x16x256xf32> to vector<2x256xf32>
    %144 = arith.addf %114, %143 : vector<2x256xf32>
    %cst_18 = arith.constant dense<0xFF800000> : vector<2xf32>
    %145 = vector.multi_reduction <maximumf>, %144, %cst_18 [1] : vector<2x256xf32> to vector<2xf32>
    %146 = vector.shape_cast %145 : vector<2xf32> to vector<2x1xf32>
    %147 = vector.broadcast %146 : vector<2x1xf32> to vector<2x256xf32>
    %148 = arith.subf %144, %147 : vector<2x256xf32>
    %149 = math.exp %148 : vector<2x256xf32>
    %cst_19 = arith.constant dense<0.000000e+00> : vector<2xf32>
    %150 = vector.multi_reduction <add>, %149, %cst_19 [1] : vector<2x256xf32> to vector<2xf32>
    %151 = vector.shape_cast %150 : vector<2xf32> to vector<2x1xf32>
    %152 = tpu.reciprocal %151 {approx = true} : vector<2x1xf32> -> vector<2x1xf32>
    %153 = vector.broadcast %152 : vector<2x1xf32> to vector<2x256xf32>
    %154 = arith.mulf %149, %153 : vector<2x256xf32>
    %155 = vector.shape_cast %154 : vector<2x256xf32> to vector<2x1x256xf32>
    %156 = vector.broadcast %155 : vector<2x1x256xf32> to vector<2x16x256xf32>
    %157 = arith.mulf %83, %156 : vector<2x16x256xf32>
    %cst_20 = arith.constant dense<0.000000e+00> : vector<2x16xf32>
    %158 = vector.multi_reduction <add>, %157, %cst_20 [2] : vector<2x16x256xf32> to vector<2x16xf32>
    %159 = arith.mulf %158, %158 : vector<2x16xf32>
    %cst_21 = arith.constant dense<0.000000e+00> : vector<2xf32>
    %160 = vector.multi_reduction <add>, %159, %cst_21 [1] : vector<2x16xf32> to vector<2xf32>
    %161 = vector.shape_cast %160 : vector<2xf32> to vector<2x1xf32>
    %cst_22 = arith.constant 1.000000e+00 : f32
    %162 = vector.broadcast %cst_22 : f32 to vector<2x1xf32>
    %163 = arith.addf %162, %161 : vector<2x1xf32>
    %164 = arith.divf %161, %163 : vector<2x1xf32>
    %165 = vector.broadcast %164 : vector<2x1xf32> to vector<2x16xf32>
    %166 = arith.mulf %158, %165 : vector<2x16xf32>
    %167 = math.rsqrt %161 : vector<2x1xf32>
    %168 = vector.broadcast %167 : vector<2x1xf32> to vector<2x16xf32>
    %169 = arith.mulf %166, %168 : vector<2x16xf32>
    %c0_23 = arith.constant 0 : index
    %c0_24 = arith.constant 0 : index
    %c0_25 = arith.constant 0 : index
    %170 = vector.load %arg3[%c0_23, %c0_24, %c0_25] : memref<4x2x16xf32, #tpu.memory_space<vmem>>, vector<1x2x16xf32>
    %171 = vector.shape_cast %170 : vector<1x2x16xf32> to vector<2x16xf32>
    %172 = vector.shape_cast %169 : vector<2x16xf32> to vector<1x2x16xf32>
    tpu.vector_store %arg3[%c0_23, %c0_24, %c0_25], %172 {strides = array<i32>} : memref<4x2x16xf32, #tpu.memory_space<vmem>>, vector<1x2x16xf32>,
    %c1 = arith.constant 1 : index
    %c0_26 = arith.constant 0 : index
    %c0_27 = arith.constant 0 : index
    %173 = vector.load %arg2[%c1, %c0_26, %c0_27] : memref<4x128x256xbf16, #tpu.memory_space<vmem>>, vector<1x128x256xbf16>
    %174 = vector.shape_cast %173 : vector<1x128x256xbf16> to vector<128x256xbf16>
    %cst_28 = arith.constant 0.000000e+00 : f32
    %175 = vector.broadcast %cst_28 : f32 to vector<2x16x256xf32>
    %176 = vector.extract_strided_slice %174 {offsets = [0, 0], sizes = [16, 256], strides = [1, 1]} : vector<128x256xbf16> to vector<16x256xbf16>
    %177 = arith.extf %176 : vector<16x256xbf16> to vector<16x256xf32>
    %178 = vector.shape_cast %177 : vector<16x256xf32> to vector<1x16x256xf32>
    %179 = vector.broadcast %3 : vector<2x1x256xf32> to vector<2x16x256xf32>
    %180 = vector.broadcast %178 : vector<1x16x256xf32> to vector<2x16x256xf32>
    %181 = arith.mulf %179, %180 : vector<2x16x256xf32>
    %182 = arith.addf %175, %181 : vector<2x16x256xf32>
    %183 = vector.extract_strided_slice %174 {offsets = [16, 0], sizes = [16, 256], strides = [1, 1]} : vector<128x256xbf16> to vector<16x256xbf16>
    %184 = arith.extf %183 : vector<16x256xbf16> to vector<16x256xf32>
    %185 = vector.shape_cast %184 : vector<16x256xf32> to vector<1x16x256xf32>
    %186 = vector.broadcast %6 : vector<2x1x256xf32> to vector<2x16x256xf32>
    %187 = vector.broadcast %185 : vector<1x16x256xf32> to vector<2x16x256xf32>
    %188 = arith.mulf %186, %187 : vector<2x16x256xf32>
    %189 = arith.addf %182, %188 : vector<2x16x256xf32>
    %190 = vector.extract_strided_slice %174 {offsets = [32, 0], sizes = [16, 256], strides = [1, 1]} : vector<128x256xbf16> to vector<16x256xbf16>
    %191 = arith.extf %190 : vector<16x256xbf16> to vector<16x256xf32>
    %192 = vector.shape_cast %191 : vector<16x256xf32> to vector<1x16x256xf32>
    %193 = vector.broadcast %9 : vector<2x1x256xf32> to vector<2x16x256xf32>
    %194 = vector.broadcast %192 : vector<1x16x256xf32> to vector<2x16x256xf32>
    %195 = arith.mulf %193, %194 : vector<2x16x256xf32>
    %196 = arith.addf %189, %195 : vector<2x16x256xf32>
    %197 = vector.extract_strided_slice %174 {offsets = [48, 0], sizes = [16, 256], strides = [1, 1]} : vector<128x256xbf16> to vector<16x256xbf16>
    %198 = arith.extf %197 : vector<16x256xbf16> to vector<16x256xf32>
    %199 = vector.shape_cast %198 : vector<16x256xf32> to vector<1x16x256xf32>
    %200 = vector.broadcast %12 : vector<2x1x256xf32> to vector<2x16x256xf32>
    %201 = vector.broadcast %199 : vector<1x16x256xf32> to vector<2x16x256xf32>
    %202 = arith.mulf %200, %201 : vector<2x16x256xf32>
    %203 = arith.addf %196, %202 : vector<2x16x256xf32>
    %204 = vector.extract_strided_slice %174 {offsets = [64, 0], sizes = [16, 256], strides = [1, 1]} : vector<128x256xbf16> to vector<16x256xbf16>
    %205 = arith.extf %204 : vector<16x256xbf16> to vector<16x256xf32>
    %206 = vector.shape_cast %205 : vector<16x256xf32> to vector<1x16x256xf32>
    %207 = vector.broadcast %15 : vector<2x1x256xf32> to vector<2x16x256xf32>
    %208 = vector.broadcast %206 : vector<1x16x256xf32> to vector<2x16x256xf32>
    %209 = arith.mulf %207, %208 : vector<2x16x256xf32>
    %210 = arith.addf %203, %209 : vector<2x16x256xf32>
    %211 = vector.extract_strided_slice %174 {offsets = [80, 0], sizes = [16, 256], strides = [1, 1]} : vector<128x256xbf16> to vector<16x256xbf16>
    %212 = arith.extf %211 : vector<16x256xbf16> to vector<16x256xf32>
    %213 = vector.shape_cast %212 : vector<16x256xf32> to vector<1x16x256xf32>
    %214 = vector.broadcast %18 : vector<2x1x256xf32> to vector<2x16x256xf32>
    %215 = vector.broadcast %213 : vector<1x16x256xf32> to vector<2x16x256xf32>
    %216 = arith.mulf %214, %215 : vector<2x16x256xf32>
    %217 = arith.addf %210, %216 : vector<2x16x256xf32>
    %218 = vector.extract_strided_slice %174 {offsets = [96, 0], sizes = [16, 256], strides = [1, 1]} : vector<128x256xbf16> to vector<16x256xbf16>
    %219 = arith.extf %218 : vector<16x256xbf16> to vector<16x256xf32>
    %220 = vector.shape_cast %219 : vector<16x256xf32> to vector<1x16x256xf32>
    %221 = vector.broadcast %21 : vector<2x1x256xf32> to vector<2x16x256xf32>
    %222 = vector.broadcast %220 : vector<1x16x256xf32> to vector<2x16x256xf32>
    %223 = arith.mulf %221, %222 : vector<2x16x256xf32>
    %224 = arith.addf %217, %223 : vector<2x16x256xf32>
    %225 = vector.extract_strided_slice %174 {offsets = [112, 0], sizes = [16, 256], strides = [1, 1]} : vector<128x256xbf16> to vector<16x256xbf16>
    %226 = arith.extf %225 : vector<16x256xbf16> to vector<16x256xf32>
    %227 = vector.shape_cast %226 : vector<16x256xf32> to vector<1x16x256xf32>
    %228 = vector.broadcast %24 : vector<2x1x256xf32> to vector<2x16x256xf32>
    %229 = vector.broadcast %227 : vector<1x16x256xf32> to vector<2x16x256xf32>
    %230 = arith.mulf %228, %229 : vector<2x16x256xf32>
    %231 = arith.addf %224, %230 : vector<2x16x256xf32>
    %cst_29 = arith.constant 0.000000e+00 : f32
    %232 = vector.broadcast %cst_29 : f32 to vector<2x256xf32>
    %cst_30 = arith.constant dense<0xFF800000> : vector<2xf32>
    %233 = vector.multi_reduction <maximumf>, %232, %cst_30 [1] : vector<2x256xf32> to vector<2xf32>
    %234 = vector.shape_cast %233 : vector<2xf32> to vector<2x1xf32>
    %235 = vector.broadcast %234 : vector<2x1xf32> to vector<2x256xf32>
    %236 = arith.subf %232, %235 : vector<2x256xf32>
    %237 = math.exp %236 : vector<2x256xf32>
    %cst_31 = arith.constant dense<0.000000e+00> : vector<2xf32>
    %238 = vector.multi_reduction <add>, %237, %cst_31 [1] : vector<2x256xf32> to vector<2xf32>
    %239 = vector.shape_cast %238 : vector<2xf32> to vector<2x1xf32>
    %240 = tpu.reciprocal %239 {approx = true} : vector<2x1xf32> -> vector<2x1xf32>
    %241 = vector.broadcast %240 : vector<2x1xf32> to vector<2x256xf32>
    %242 = arith.mulf %237, %241 : vector<2x256xf32>
    %243 = vector.shape_cast %242 : vector<2x256xf32> to vector<2x1x256xf32>
    %244 = vector.broadcast %243 : vector<2x1x256xf32> to vector<2x16x256xf32>
    %245 = arith.mulf %231, %244 : vector<2x16x256xf32>
    %cst_32 = arith.constant dense<0.000000e+00> : vector<2x16xf32>
    %246 = vector.multi_reduction <add>, %245, %cst_32 [2] : vector<2x16x256xf32> to vector<2x16xf32>
    %247 = arith.mulf %246, %246 : vector<2x16xf32>
    %cst_33 = arith.constant dense<0.000000e+00> : vector<2xf32>
    %248 = vector.multi_reduction <add>, %247, %cst_33 [1] : vector<2x16xf32> to vector<2xf32>
    %249 = vector.shape_cast %248 : vector<2xf32> to vector<2x1xf32>
    %cst_34 = arith.constant 1.000000e+00 : f32
    %250 = vector.broadcast %cst_34 : f32 to vector<2x1xf32>
    %251 = arith.addf %250, %249 : vector<2x1xf32>
    %252 = arith.divf %249, %251 : vector<2x1xf32>
    %253 = vector.broadcast %252 : vector<2x1xf32> to vector<2x16xf32>
    %254 = arith.mulf %246, %253 : vector<2x16xf32>
    %255 = math.rsqrt %249 : vector<2x1xf32>
    %256 = vector.broadcast %255 : vector<2x1xf32> to vector<2x16xf32>
    %257 = arith.mulf %254, %256 : vector<2x16xf32>
    %258 = vector.shape_cast %257 : vector<2x16xf32> to vector<2x16x1xf32>
    %259 = vector.broadcast %258 : vector<2x16x1xf32> to vector<2x16x256xf32>
    %260 = arith.mulf %231, %259 : vector<2x16x256xf32>
    %cst_35 = arith.constant dense<0.000000e+00> : vector<2x256xf32>
    %261 = vector.multi_reduction <add>, %260, %cst_35 [1] : vector<2x16x256xf32> to vector<2x256xf32>
    %262 = arith.addf %232, %261 : vector<2x256xf32>
    %cst_36 = arith.constant dense<0xFF800000> : vector<2xf32>
    %263 = vector.multi_reduction <maximumf>, %262, %cst_36 [1] : vector<2x256xf32> to vector<2xf32>
    %264 = vector.shape_cast %263 : vector<2xf32> to vector<2x1xf32>
    %265 = vector.broadcast %264 : vector<2x1xf32> to vector<2x256xf32>
    %266 = arith.subf %262, %265 : vector<2x256xf32>
    %267 = math.exp %266 : vector<2x256xf32>
    %cst_37 = arith.constant dense<0.000000e+00> : vector<2xf32>
    %268 = vector.multi_reduction <add>, %267, %cst_37 [1] : vector<2x256xf32> to vector<2xf32>
    %269 = vector.shape_cast %268 : vector<2xf32> to vector<2x1xf32>
    %270 = tpu.reciprocal %269 {approx = true} : vector<2x1xf32> -> vector<2x1xf32>
    %271 = vector.broadcast %270 : vector<2x1xf32> to vector<2x256xf32>
    %272 = arith.mulf %267, %271 : vector<2x256xf32>
    %273 = vector.shape_cast %272 : vector<2x256xf32> to vector<2x1x256xf32>
    %274 = vector.broadcast %273 : vector<2x1x256xf32> to vector<2x16x256xf32>
    %275 = arith.mulf %231, %274 : vector<2x16x256xf32>
    %cst_38 = arith.constant dense<0.000000e+00> : vector<2x16xf32>
    %276 = vector.multi_reduction <add>, %275, %cst_38 [2] : vector<2x16x256xf32> to vector<2x16xf32>
    %277 = arith.mulf %276, %276 : vector<2x16xf32>
    %cst_39 = arith.constant dense<0.000000e+00> : vector<2xf32>
    %278 = vector.multi_reduction <add>, %277, %cst_39 [1] : vector<2x16xf32> to vector<2xf32>
    %279 = vector.shape_cast %278 : vector<2xf32> to vector<2x1xf32>
    %cst_40 = arith.constant 1.000000e+00 : f32
    %280 = vector.broadcast %cst_40 : f32 to vector<2x1xf32>
    %281 = arith.addf %280, %279 : vector<2x1xf32>
    %282 = arith.divf %279, %281 : vector<2x1xf32>
    %283 = vector.broadcast %282 : vector<2x1xf32> to vector<2x16xf32>
    %284 = arith.mulf %276, %283 : vector<2x16xf32>
    %285 = math.rsqrt %279 : vector<2x1xf32>
    %286 = vector.broadcast %285 : vector<2x1xf32> to vector<2x16xf32>
    %287 = arith.mulf %284, %286 : vector<2x16xf32>
    %288 = vector.shape_cast %287 : vector<2x16xf32> to vector<2x16x1xf32>
    %289 = vector.broadcast %288 : vector<2x16x1xf32> to vector<2x16x256xf32>
    %290 = arith.mulf %231, %289 : vector<2x16x256xf32>
    %cst_41 = arith.constant dense<0.000000e+00> : vector<2x256xf32>
    %291 = vector.multi_reduction <add>, %290, %cst_41 [1] : vector<2x16x256xf32> to vector<2x256xf32>
    %292 = arith.addf %262, %291 : vector<2x256xf32>
    %cst_42 = arith.constant dense<0xFF800000> : vector<2xf32>
    %293 = vector.multi_reduction <maximumf>, %292, %cst_42 [1] : vector<2x256xf32> to vector<2xf32>
    %294 = vector.shape_cast %293 : vector<2xf32> to vector<2x1xf32>
    %295 = vector.broadcast %294 : vector<2x1xf32> to vector<2x256xf32>
    %296 = arith.subf %292, %295 : vector<2x256xf32>
    %297 = math.exp %296 : vector<2x256xf32>
    %cst_43 = arith.constant dense<0.000000e+00> : vector<2xf32>
    %298 = vector.multi_reduction <add>, %297, %cst_43 [1] : vector<2x256xf32> to vector<2xf32>
    %299 = vector.shape_cast %298 : vector<2xf32> to vector<2x1xf32>
    %300 = tpu.reciprocal %299 {approx = true} : vector<2x1xf32> -> vector<2x1xf32>
    %301 = vector.broadcast %300 : vector<2x1xf32> to vector<2x256xf32>
    %302 = arith.mulf %297, %301 : vector<2x256xf32>
    %303 = vector.shape_cast %302 : vector<2x256xf32> to vector<2x1x256xf32>
    %304 = vector.broadcast %303 : vector<2x1x256xf32> to vector<2x16x256xf32>
    %305 = arith.mulf %231, %304 : vector<2x16x256xf32>
    %cst_44 = arith.constant dense<0.000000e+00> : vector<2x16xf32>
    %306 = vector.multi_reduction <add>, %305, %cst_44 [2] : vector<2x16x256xf32> to vector<2x16xf32>
    %307 = arith.mulf %306, %306 : vector<2x16xf32>
    %cst_45 = arith.constant dense<0.000000e+00> : vector<2xf32>
    %308 = vector.multi_reduction <add>, %307, %cst_45 [1] : vector<2x16xf32> to vector<2xf32>
    %309 = vector.shape_cast %308 : vector<2xf32> to vector<2x1xf32>
    %cst_46 = arith.constant 1.000000e+00 : f32
    %310 = vector.broadcast %cst_46 : f32 to vector<2x1xf32>
    %311 = arith.addf %310, %309 : vector<2x1xf32>
    %312 = arith.divf %309, %311 : vector<2x1xf32>
    %313 = vector.broadcast %312 : vector<2x1xf32> to vector<2x16xf32>
    %314 = arith.mulf %306, %313 : vector<2x16xf32>
    %315 = math.rsqrt %309 : vector<2x1xf32>
    %316 = vector.broadcast %315 : vector<2x1xf32> to vector<2x16xf32>
    %317 = arith.mulf %314, %316 : vector<2x16xf32>
    %c1_47 = arith.constant 1 : index
    %c0_48 = arith.constant 0 : index
    %c0_49 = arith.constant 0 : index
    %318 = vector.load %arg3[%c1_47, %c0_48, %c0_49] : memref<4x2x16xf32, #tpu.memory_space<vmem>>, vector<1x2x16xf32>
    %319 = vector.shape_cast %318 : vector<1x2x16xf32> to vector<2x16xf32>
    %320 = vector.shape_cast %317 : vector<2x16xf32> to vector<1x2x16xf32>
    tpu.vector_store %arg3[%c1_47, %c0_48, %c0_49], %320 {strides = array<i32>} : memref<4x2x16xf32, #tpu.memory_space<vmem>>, vector<1x2x16xf32>,
    %c2 = arith.constant 2 : index
    %c0_50 = arith.constant 0 : index
    %c0_51 = arith.constant 0 : index
    %321 = vector.load %arg2[%c2, %c0_50, %c0_51] : memref<4x128x256xbf16, #tpu.memory_space<vmem>>, vector<1x128x256xbf16>
    %322 = vector.shape_cast %321 : vector<1x128x256xbf16> to vector<128x256xbf16>
    %cst_52 = arith.constant 0.000000e+00 : f32
    %323 = vector.broadcast %cst_52 : f32 to vector<2x16x256xf32>
    %324 = vector.extract_strided_slice %322 {offsets = [0, 0], sizes = [16, 256], strides = [1, 1]} : vector<128x256xbf16> to vector<16x256xbf16>
    %325 = arith.extf %324 : vector<16x256xbf16> to vector<16x256xf32>
    %326 = vector.shape_cast %325 : vector<16x256xf32> to vector<1x16x256xf32>
    %327 = vector.broadcast %3 : vector<2x1x256xf32> to vector<2x16x256xf32>
    %328 = vector.broadcast %326 : vector<1x16x256xf32> to vector<2x16x256xf32>
    %329 = arith.mulf %327, %328 : vector<2x16x256xf32>
    %330 = arith.addf %323, %329 : vector<2x16x256xf32>
    %331 = vector.extract_strided_slice %322 {offsets = [16, 0], sizes = [16, 256], strides = [1, 1]} : vector<128x256xbf16> to vector<16x256xbf16>
    %332 = arith.extf %331 : vector<16x256xbf16> to vector<16x256xf32>
    %333 = vector.shape_cast %332 : vector<16x256xf32> to vector<1x16x256xf32>
    %334 = vector.broadcast %6 : vector<2x1x256xf32> to vector<2x16x256xf32>
    %335 = vector.broadcast %333 : vector<1x16x256xf32> to vector<2x16x256xf32>
    %336 = arith.mulf %334, %335 : vector<2x16x256xf32>
    %337 = arith.addf %330, %336 : vector<2x16x256xf32>
    %338 = vector.extract_strided_slice %322 {offsets = [32, 0], sizes = [16, 256], strides = [1, 1]} : vector<128x256xbf16> to vector<16x256xbf16>
    %339 = arith.extf %338 : vector<16x256xbf16> to vector<16x256xf32>
    %340 = vector.shape_cast %339 : vector<16x256xf32> to vector<1x16x256xf32>
    %341 = vector.broadcast %9 : vector<2x1x256xf32> to vector<2x16x256xf32>
    %342 = vector.broadcast %340 : vector<1x16x256xf32> to vector<2x16x256xf32>
    %343 = arith.mulf %341, %342 : vector<2x16x256xf32>
    %344 = arith.addf %337, %343 : vector<2x16x256xf32>
    %345 = vector.extract_strided_slice %322 {offsets = [48, 0], sizes = [16, 256], strides = [1, 1]} : vector<128x256xbf16> to vector<16x256xbf16>
    %346 = arith.extf %345 : vector<16x256xbf16> to vector<16x256xf32>
    %347 = vector.shape_cast %346 : vector<16x256xf32> to vector<1x16x256xf32>
    %348 = vector.broadcast %12 : vector<2x1x256xf32> to vector<2x16x256xf32>
    %349 = vector.broadcast %347 : vector<1x16x256xf32> to vector<2x16x256xf32>
    %350 = arith.mulf %348, %349 : vector<2x16x256xf32>
    %351 = arith.addf %344, %350 : vector<2x16x256xf32>
    %352 = vector.extract_strided_slice %322 {offsets = [64, 0], sizes = [16, 256], strides = [1, 1]} : vector<128x256xbf16> to vector<16x256xbf16>
    %353 = arith.extf %352 : vector<16x256xbf16> to vector<16x256xf32>
    %354 = vector.shape_cast %353 : vector<16x256xf32> to vector<1x16x256xf32>
    %355 = vector.broadcast %15 : vector<2x1x256xf32> to vector<2x16x256xf32>
    %356 = vector.broadcast %354 : vector<1x16x256xf32> to vector<2x16x256xf32>
    %357 = arith.mulf %355, %356 : vector<2x16x256xf32>
    %358 = arith.addf %351, %357 : vector<2x16x256xf32>
    %359 = vector.extract_strided_slice %322 {offsets = [80, 0], sizes = [16, 256], strides = [1, 1]} : vector<128x256xbf16> to vector<16x256xbf16>
    %360 = arith.extf %359 : vector<16x256xbf16> to vector<16x256xf32>
    %361 = vector.shape_cast %360 : vector<16x256xf32> to vector<1x16x256xf32>
    %362 = vector.broadcast %18 : vector<2x1x256xf32> to vector<2x16x256xf32>
    %363 = vector.broadcast %361 : vector<1x16x256xf32> to vector<2x16x256xf32>
    %364 = arith.mulf %362, %363 : vector<2x16x256xf32>
    %365 = arith.addf %358, %364 : vector<2x16x256xf32>
    %366 = vector.extract_strided_slice %322 {offsets = [96, 0], sizes = [16, 256], strides = [1, 1]} : vector<128x256xbf16> to vector<16x256xbf16>
    %367 = arith.extf %366 : vector<16x256xbf16> to vector<16x256xf32>
    %368 = vector.shape_cast %367 : vector<16x256xf32> to vector<1x16x256xf32>
    %369 = vector.broadcast %21 : vector<2x1x256xf32> to vector<2x16x256xf32>
    %370 = vector.broadcast %368 : vector<1x16x256xf32> to vector<2x16x256xf32>
    %371 = arith.mulf %369, %370 : vector<2x16x256xf32>
    %372 = arith.addf %365, %371 : vector<2x16x256xf32>
    %373 = vector.extract_strided_slice %322 {offsets = [112, 0], sizes = [16, 256], strides = [1, 1]} : vector<128x256xbf16> to vector<16x256xbf16>
    %374 = arith.extf %373 : vector<16x256xbf16> to vector<16x256xf32>
    %375 = vector.shape_cast %374 : vector<16x256xf32> to vector<1x16x256xf32>
    %376 = vector.broadcast %24 : vector<2x1x256xf32> to vector<2x16x256xf32>
    %377 = vector.broadcast %375 : vector<1x16x256xf32> to vector<2x16x256xf32>
    %378 = arith.mulf %376, %377 : vector<2x16x256xf32>
    %379 = arith.addf %372, %378 : vector<2x16x256xf32>
    %cst_53 = arith.constant 0.000000e+00 : f32
    %380 = vector.broadcast %cst_53 : f32 to vector<2x256xf32>
    %cst_54 = arith.constant dense<0xFF800000> : vector<2xf32>
    %381 = vector.multi_reduction <maximumf>, %380, %cst_54 [1] : vector<2x256xf32> to vector<2xf32>
    %382 = vector.shape_cast %381 : vector<2xf32> to vector<2x1xf32>
    %383 = vector.broadcast %382 : vector<2x1xf32> to vector<2x256xf32>
    %384 = arith.subf %380, %383 : vector<2x256xf32>
    %385 = math.exp %384 : vector<2x256xf32>
    %cst_55 = arith.constant dense<0.000000e+00> : vector<2xf32>
    %386 = vector.multi_reduction <add>, %385, %cst_55 [1] : vector<2x256xf32> to vector<2xf32>
    %387 = vector.shape_cast %386 : vector<2xf32> to vector<2x1xf32>
    %388 = tpu.reciprocal %387 {approx = true} : vector<2x1xf32> -> vector<2x1xf32>
    %389 = vector.broadcast %388 : vector<2x1xf32> to vector<2x256xf32>
    %390 = arith.mulf %385, %389 : vector<2x256xf32>
    %391 = vector.shape_cast %390 : vector<2x256xf32> to vector<2x1x256xf32>
    %392 = vector.broadcast %391 : vector<2x1x256xf32> to vector<2x16x256xf32>
    %393 = arith.mulf %379, %392 : vector<2x16x256xf32>
    %cst_56 = arith.constant dense<0.000000e+00> : vector<2x16xf32>
    %394 = vector.multi_reduction <add>, %393, %cst_56 [2] : vector<2x16x256xf32> to vector<2x16xf32>
    %395 = arith.mulf %394, %394 : vector<2x16xf32>
    %cst_57 = arith.constant dense<0.000000e+00> : vector<2xf32>
    %396 = vector.multi_reduction <add>, %395, %cst_57 [1] : vector<2x16xf32> to vector<2xf32>
    %397 = vector.shape_cast %396 : vector<2xf32> to vector<2x1xf32>
    %cst_58 = arith.constant 1.000000e+00 : f32
    %398 = vector.broadcast %cst_58 : f32 to vector<2x1xf32>
    %399 = arith.addf %398, %397 : vector<2x1xf32>
    %400 = arith.divf %397, %399 : vector<2x1xf32>
    %401 = vector.broadcast %400 : vector<2x1xf32> to vector<2x16xf32>
    %402 = arith.mulf %394, %401 : vector<2x16xf32>
    %403 = math.rsqrt %397 : vector<2x1xf32>
    %404 = vector.broadcast %403 : vector<2x1xf32> to vector<2x16xf32>
    %405 = arith.mulf %402, %404 : vector<2x16xf32>
    %406 = vector.shape_cast %405 : vector<2x16xf32> to vector<2x16x1xf32>
    %407 = vector.broadcast %406 : vector<2x16x1xf32> to vector<2x16x256xf32>
    %408 = arith.mulf %379, %407 : vector<2x16x256xf32>
    %cst_59 = arith.constant dense<0.000000e+00> : vector<2x256xf32>
    %409 = vector.multi_reduction <add>, %408, %cst_59 [1] : vector<2x16x256xf32> to vector<2x256xf32>
    %410 = arith.addf %380, %409 : vector<2x256xf32>
    %cst_60 = arith.constant dense<0xFF800000> : vector<2xf32>
    %411 = vector.multi_reduction <maximumf>, %410, %cst_60 [1] : vector<2x256xf32> to vector<2xf32>
    %412 = vector.shape_cast %411 : vector<2xf32> to vector<2x1xf32>
    %413 = vector.broadcast %412 : vector<2x1xf32> to vector<2x256xf32>
    %414 = arith.subf %410, %413 : vector<2x256xf32>
    %415 = math.exp %414 : vector<2x256xf32>
    %cst_61 = arith.constant dense<0.000000e+00> : vector<2xf32>
    %416 = vector.multi_reduction <add>, %415, %cst_61 [1] : vector<2x256xf32> to vector<2xf32>
    %417 = vector.shape_cast %416 : vector<2xf32> to vector<2x1xf32>
    %418 = tpu.reciprocal %417 {approx = true} : vector<2x1xf32> -> vector<2x1xf32>
    %419 = vector.broadcast %418 : vector<2x1xf32> to vector<2x256xf32>
    %420 = arith.mulf %415, %419 : vector<2x256xf32>
    %421 = vector.shape_cast %420 : vector<2x256xf32> to vector<2x1x256xf32>
    %422 = vector.broadcast %421 : vector<2x1x256xf32> to vector<2x16x256xf32>
    %423 = arith.mulf %379, %422 : vector<2x16x256xf32>
    %cst_62 = arith.constant dense<0.000000e+00> : vector<2x16xf32>
    %424 = vector.multi_reduction <add>, %423, %cst_62 [2] : vector<2x16x256xf32> to vector<2x16xf32>
    %425 = arith.mulf %424, %424 : vector<2x16xf32>
    %cst_63 = arith.constant dense<0.000000e+00> : vector<2xf32>
    %426 = vector.multi_reduction <add>, %425, %cst_63 [1] : vector<2x16xf32> to vector<2xf32>
    %427 = vector.shape_cast %426 : vector<2xf32> to vector<2x1xf32>
    %cst_64 = arith.constant 1.000000e+00 : f32
    %428 = vector.broadcast %cst_64 : f32 to vector<2x1xf32>
    %429 = arith.addf %428, %427 : vector<2x1xf32>
    %430 = arith.divf %427, %429 : vector<2x1xf32>
    %431 = vector.broadcast %430 : vector<2x1xf32> to vector<2x16xf32>
    %432 = arith.mulf %424, %431 : vector<2x16xf32>
    %433 = math.rsqrt %427 : vector<2x1xf32>
    %434 = vector.broadcast %433 : vector<2x1xf32> to vector<2x16xf32>
    %435 = arith.mulf %432, %434 : vector<2x16xf32>
    %436 = vector.shape_cast %435 : vector<2x16xf32> to vector<2x16x1xf32>
    %437 = vector.broadcast %436 : vector<2x16x1xf32> to vector<2x16x256xf32>
    %438 = arith.mulf %379, %437 : vector<2x16x256xf32>
    %cst_65 = arith.constant dense<0.000000e+00> : vector<2x256xf32>
    %439 = vector.multi_reduction <add>, %438, %cst_65 [1] : vector<2x16x256xf32> to vector<2x256xf32>
    %440 = arith.addf %410, %439 : vector<2x256xf32>
    %cst_66 = arith.constant dense<0xFF800000> : vector<2xf32>
    %441 = vector.multi_reduction <maximumf>, %440, %cst_66 [1] : vector<2x256xf32> to vector<2xf32>
    %442 = vector.shape_cast %441 : vector<2xf32> to vector<2x1xf32>
    %443 = vector.broadcast %442 : vector<2x1xf32> to vector<2x256xf32>
    %444 = arith.subf %440, %443 : vector<2x256xf32>
    %445 = math.exp %444 : vector<2x256xf32>
    %cst_67 = arith.constant dense<0.000000e+00> : vector<2xf32>
    %446 = vector.multi_reduction <add>, %445, %cst_67 [1] : vector<2x256xf32> to vector<2xf32>
    %447 = vector.shape_cast %446 : vector<2xf32> to vector<2x1xf32>
    %448 = tpu.reciprocal %447 {approx = true} : vector<2x1xf32> -> vector<2x1xf32>
    %449 = vector.broadcast %448 : vector<2x1xf32> to vector<2x256xf32>
    %450 = arith.mulf %445, %449 : vector<2x256xf32>
    %451 = vector.shape_cast %450 : vector<2x256xf32> to vector<2x1x256xf32>
    %452 = vector.broadcast %451 : vector<2x1x256xf32> to vector<2x16x256xf32>
    %453 = arith.mulf %379, %452 : vector<2x16x256xf32>
    %cst_68 = arith.constant dense<0.000000e+00> : vector<2x16xf32>
    %454 = vector.multi_reduction <add>, %453, %cst_68 [2] : vector<2x16x256xf32> to vector<2x16xf32>
    %455 = arith.mulf %454, %454 : vector<2x16xf32>
    %cst_69 = arith.constant dense<0.000000e+00> : vector<2xf32>
    %456 = vector.multi_reduction <add>, %455, %cst_69 [1] : vector<2x16xf32> to vector<2xf32>
    %457 = vector.shape_cast %456 : vector<2xf32> to vector<2x1xf32>
    %cst_70 = arith.constant 1.000000e+00 : f32
    %458 = vector.broadcast %cst_70 : f32 to vector<2x1xf32>
    %459 = arith.addf %458, %457 : vector<2x1xf32>
    %460 = arith.divf %457, %459 : vector<2x1xf32>
    %461 = vector.broadcast %460 : vector<2x1xf32> to vector<2x16xf32>
    %462 = arith.mulf %454, %461 : vector<2x16xf32>
    %463 = math.rsqrt %457 : vector<2x1xf32>
    %464 = vector.broadcast %463 : vector<2x1xf32> to vector<2x16xf32>
    %465 = arith.mulf %462, %464 : vector<2x16xf32>
    %c2_71 = arith.constant 2 : index
    %c0_72 = arith.constant 0 : index
    %c0_73 = arith.constant 0 : index
    %466 = vector.load %arg3[%c2_71, %c0_72, %c0_73] : memref<4x2x16xf32, #tpu.memory_space<vmem>>, vector<1x2x16xf32>
    %467 = vector.shape_cast %466 : vector<1x2x16xf32> to vector<2x16xf32>
    %468 = vector.shape_cast %465 : vector<2x16xf32> to vector<1x2x16xf32>
    tpu.vector_store %arg3[%c2_71, %c0_72, %c0_73], %468 {strides = array<i32>} : memref<4x2x16xf32, #tpu.memory_space<vmem>>, vector<1x2x16xf32>,
    %c3 = arith.constant 3 : index
    %c0_74 = arith.constant 0 : index
    %c0_75 = arith.constant 0 : index
    %469 = vector.load %arg2[%c3, %c0_74, %c0_75] : memref<4x128x256xbf16, #tpu.memory_space<vmem>>, vector<1x128x256xbf16>
    %470 = vector.shape_cast %469 : vector<1x128x256xbf16> to vector<128x256xbf16>
    %cst_76 = arith.constant 0.000000e+00 : f32
    %471 = vector.broadcast %cst_76 : f32 to vector<2x16x256xf32>
    %472 = vector.extract_strided_slice %470 {offsets = [0, 0], sizes = [16, 256], strides = [1, 1]} : vector<128x256xbf16> to vector<16x256xbf16>
    %473 = arith.extf %472 : vector<16x256xbf16> to vector<16x256xf32>
    %474 = vector.shape_cast %473 : vector<16x256xf32> to vector<1x16x256xf32>
    %475 = vector.broadcast %3 : vector<2x1x256xf32> to vector<2x16x256xf32>
    %476 = vector.broadcast %474 : vector<1x16x256xf32> to vector<2x16x256xf32>
    %477 = arith.mulf %475, %476 : vector<2x16x256xf32>
    %478 = arith.addf %471, %477 : vector<2x16x256xf32>
    %479 = vector.extract_strided_slice %470 {offsets = [16, 0], sizes = [16, 256], strides = [1, 1]} : vector<128x256xbf16> to vector<16x256xbf16>
    %480 = arith.extf %479 : vector<16x256xbf16> to vector<16x256xf32>
    %481 = vector.shape_cast %480 : vector<16x256xf32> to vector<1x16x256xf32>
    %482 = vector.broadcast %6 : vector<2x1x256xf32> to vector<2x16x256xf32>
    %483 = vector.broadcast %481 : vector<1x16x256xf32> to vector<2x16x256xf32>
    %484 = arith.mulf %482, %483 : vector<2x16x256xf32>
    %485 = arith.addf %478, %484 : vector<2x16x256xf32>
    %486 = vector.extract_strided_slice %470 {offsets = [32, 0], sizes = [16, 256], strides = [1, 1]} : vector<128x256xbf16> to vector<16x256xbf16>
    %487 = arith.extf %486 : vector<16x256xbf16> to vector<16x256xf32>
    %488 = vector.shape_cast %487 : vector<16x256xf32> to vector<1x16x256xf32>
    %489 = vector.broadcast %9 : vector<2x1x256xf32> to vector<2x16x256xf32>
    %490 = vector.broadcast %488 : vector<1x16x256xf32> to vector<2x16x256xf32>
    %491 = arith.mulf %489, %490 : vector<2x16x256xf32>
    %492 = arith.addf %485, %491 : vector<2x16x256xf32>
    %493 = vector.extract_strided_slice %470 {offsets = [48, 0], sizes = [16, 256], strides = [1, 1]} : vector<128x256xbf16> to vector<16x256xbf16>
    %494 = arith.extf %493 : vector<16x256xbf16> to vector<16x256xf32>
    %495 = vector.shape_cast %494 : vector<16x256xf32> to vector<1x16x256xf32>
    %496 = vector.broadcast %12 : vector<2x1x256xf32> to vector<2x16x256xf32>
    %497 = vector.broadcast %495 : vector<1x16x256xf32> to vector<2x16x256xf32>
    %498 = arith.mulf %496, %497 : vector<2x16x256xf32>
    %499 = arith.addf %492, %498 : vector<2x16x256xf32>
    %500 = vector.extract_strided_slice %470 {offsets = [64, 0], sizes = [16, 256], strides = [1, 1]} : vector<128x256xbf16> to vector<16x256xbf16>
    %501 = arith.extf %500 : vector<16x256xbf16> to vector<16x256xf32>
    %502 = vector.shape_cast %501 : vector<16x256xf32> to vector<1x16x256xf32>
    %503 = vector.broadcast %15 : vector<2x1x256xf32> to vector<2x16x256xf32>
    %504 = vector.broadcast %502 : vector<1x16x256xf32> to vector<2x16x256xf32>
    %505 = arith.mulf %503, %504 : vector<2x16x256xf32>
    %506 = arith.addf %499, %505 : vector<2x16x256xf32>
    %507 = vector.extract_strided_slice %470 {offsets = [80, 0], sizes = [16, 256], strides = [1, 1]} : vector<128x256xbf16> to vector<16x256xbf16>
    %508 = arith.extf %507 : vector<16x256xbf16> to vector<16x256xf32>
    %509 = vector.shape_cast %508 : vector<16x256xf32> to vector<1x16x256xf32>
    %510 = vector.broadcast %18 : vector<2x1x256xf32> to vector<2x16x256xf32>
    %511 = vector.broadcast %509 : vector<1x16x256xf32> to vector<2x16x256xf32>
    %512 = arith.mulf %510, %511 : vector<2x16x256xf32>
    %513 = arith.addf %506, %512 : vector<2x16x256xf32>
    %514 = vector.extract_strided_slice %470 {offsets = [96, 0], sizes = [16, 256], strides = [1, 1]} : vector<128x256xbf16> to vector<16x256xbf16>
    %515 = arith.extf %514 : vector<16x256xbf16> to vector<16x256xf32>
    %516 = vector.shape_cast %515 : vector<16x256xf32> to vector<1x16x256xf32>
    %517 = vector.broadcast %21 : vector<2x1x256xf32> to vector<2x16x256xf32>
    %518 = vector.broadcast %516 : vector<1x16x256xf32> to vector<2x16x256xf32>
    %519 = arith.mulf %517, %518 : vector<2x16x256xf32>
    %520 = arith.addf %513, %519 : vector<2x16x256xf32>
    %521 = vector.extract_strided_slice %470 {offsets = [112, 0], sizes = [16, 256], strides = [1, 1]} : vector<128x256xbf16> to vector<16x256xbf16>
    %522 = arith.extf %521 : vector<16x256xbf16> to vector<16x256xf32>
    %523 = vector.shape_cast %522 : vector<16x256xf32> to vector<1x16x256xf32>
    %524 = vector.broadcast %24 : vector<2x1x256xf32> to vector<2x16x256xf32>
    %525 = vector.broadcast %523 : vector<1x16x256xf32> to vector<2x16x256xf32>
    %526 = arith.mulf %524, %525 : vector<2x16x256xf32>
    %527 = arith.addf %520, %526 : vector<2x16x256xf32>
    %cst_77 = arith.constant 0.000000e+00 : f32
    %528 = vector.broadcast %cst_77 : f32 to vector<2x256xf32>
    %cst_78 = arith.constant dense<0xFF800000> : vector<2xf32>
    %529 = vector.multi_reduction <maximumf>, %528, %cst_78 [1] : vector<2x256xf32> to vector<2xf32>
    %530 = vector.shape_cast %529 : vector<2xf32> to vector<2x1xf32>
    %531 = vector.broadcast %530 : vector<2x1xf32> to vector<2x256xf32>
    %532 = arith.subf %528, %531 : vector<2x256xf32>
    %533 = math.exp %532 : vector<2x256xf32>
    %cst_79 = arith.constant dense<0.000000e+00> : vector<2xf32>
    %534 = vector.multi_reduction <add>, %533, %cst_79 [1] : vector<2x256xf32> to vector<2xf32>
    %535 = vector.shape_cast %534 : vector<2xf32> to vector<2x1xf32>
    %536 = tpu.reciprocal %535 {approx = true} : vector<2x1xf32> -> vector<2x1xf32>
    %537 = vector.broadcast %536 : vector<2x1xf32> to vector<2x256xf32>
    %538 = arith.mulf %533, %537 : vector<2x256xf32>
    %539 = vector.shape_cast %538 : vector<2x256xf32> to vector<2x1x256xf32>
    %540 = vector.broadcast %539 : vector<2x1x256xf32> to vector<2x16x256xf32>
    %541 = arith.mulf %527, %540 : vector<2x16x256xf32>
    %cst_80 = arith.constant dense<0.000000e+00> : vector<2x16xf32>
    %542 = vector.multi_reduction <add>, %541, %cst_80 [2] : vector<2x16x256xf32> to vector<2x16xf32>
    %543 = arith.mulf %542, %542 : vector<2x16xf32>
    %cst_81 = arith.constant dense<0.000000e+00> : vector<2xf32>
    %544 = vector.multi_reduction <add>, %543, %cst_81 [1] : vector<2x16xf32> to vector<2xf32>
    %545 = vector.shape_cast %544 : vector<2xf32> to vector<2x1xf32>
    %cst_82 = arith.constant 1.000000e+00 : f32
    %546 = vector.broadcast %cst_82 : f32 to vector<2x1xf32>
    %547 = arith.addf %546, %545 : vector<2x1xf32>
    %548 = arith.divf %545, %547 : vector<2x1xf32>
    %549 = vector.broadcast %548 : vector<2x1xf32> to vector<2x16xf32>
    %550 = arith.mulf %542, %549 : vector<2x16xf32>
    %551 = math.rsqrt %545 : vector<2x1xf32>
    %552 = vector.broadcast %551 : vector<2x1xf32> to vector<2x16xf32>
    %553 = arith.mulf %550, %552 : vector<2x16xf32>
    %554 = vector.shape_cast %553 : vector<2x16xf32> to vector<2x16x1xf32>
    %555 = vector.broadcast %554 : vector<2x16x1xf32> to vector<2x16x256xf32>
    %556 = arith.mulf %527, %555 : vector<2x16x256xf32>
    %cst_83 = arith.constant dense<0.000000e+00> : vector<2x256xf32>
    %557 = vector.multi_reduction <add>, %556, %cst_83 [1] : vector<2x16x256xf32> to vector<2x256xf32>
    %558 = arith.addf %528, %557 : vector<2x256xf32>
    %cst_84 = arith.constant dense<0xFF800000> : vector<2xf32>
    %559 = vector.multi_reduction <maximumf>, %558, %cst_84 [1] : vector<2x256xf32> to vector<2xf32>
    %560 = vector.shape_cast %559 : vector<2xf32> to vector<2x1xf32>
    %561 = vector.broadcast %560 : vector<2x1xf32> to vector<2x256xf32>
    %562 = arith.subf %558, %561 : vector<2x256xf32>
    %563 = math.exp %562 : vector<2x256xf32>
    %cst_85 = arith.constant dense<0.000000e+00> : vector<2xf32>
    %564 = vector.multi_reduction <add>, %563, %cst_85 [1] : vector<2x256xf32> to vector<2xf32>
    %565 = vector.shape_cast %564 : vector<2xf32> to vector<2x1xf32>
    %566 = tpu.reciprocal %565 {approx = true} : vector<2x1xf32> -> vector<2x1xf32>
    %567 = vector.broadcast %566 : vector<2x1xf32> to vector<2x256xf32>
    %568 = arith.mulf %563, %567 : vector<2x256xf32>
    %569 = vector.shape_cast %568 : vector<2x256xf32> to vector<2x1x256xf32>
    %570 = vector.broadcast %569 : vector<2x1x256xf32> to vector<2x16x256xf32>
    %571 = arith.mulf %527, %570 : vector<2x16x256xf32>
    %cst_86 = arith.constant dense<0.000000e+00> : vector<2x16xf32>
    %572 = vector.multi_reduction <add>, %571, %cst_86 [2] : vector<2x16x256xf32> to vector<2x16xf32>
    %573 = arith.mulf %572, %572 : vector<2x16xf32>
    %cst_87 = arith.constant dense<0.000000e+00> : vector<2xf32>
    %574 = vector.multi_reduction <add>, %573, %cst_87 [1] : vector<2x16xf32> to vector<2xf32>
    %575 = vector.shape_cast %574 : vector<2xf32> to vector<2x1xf32>
    %cst_88 = arith.constant 1.000000e+00 : f32
    %576 = vector.broadcast %cst_88 : f32 to vector<2x1xf32>
    %577 = arith.addf %576, %575 : vector<2x1xf32>
    %578 = arith.divf %575, %577 : vector<2x1xf32>
    %579 = vector.broadcast %578 : vector<2x1xf32> to vector<2x16xf32>
    %580 = arith.mulf %572, %579 : vector<2x16xf32>
    %581 = math.rsqrt %575 : vector<2x1xf32>
    %582 = vector.broadcast %581 : vector<2x1xf32> to vector<2x16xf32>
    %583 = arith.mulf %580, %582 : vector<2x16xf32>
    %584 = vector.shape_cast %583 : vector<2x16xf32> to vector<2x16x1xf32>
    %585 = vector.broadcast %584 : vector<2x16x1xf32> to vector<2x16x256xf32>
    %586 = arith.mulf %527, %585 : vector<2x16x256xf32>
    %cst_89 = arith.constant dense<0.000000e+00> : vector<2x256xf32>
    %587 = vector.multi_reduction <add>, %586, %cst_89 [1] : vector<2x16x256xf32> to vector<2x256xf32>
    %588 = arith.addf %558, %587 : vector<2x256xf32>
    %cst_90 = arith.constant dense<0xFF800000> : vector<2xf32>
    %589 = vector.multi_reduction <maximumf>, %588, %cst_90 [1] : vector<2x256xf32> to vector<2xf32>
    %590 = vector.shape_cast %589 : vector<2xf32> to vector<2x1xf32>
    %591 = vector.broadcast %590 : vector<2x1xf32> to vector<2x256xf32>
    %592 = arith.subf %588, %591 : vector<2x256xf32>
    %593 = math.exp %592 : vector<2x256xf32>
    %cst_91 = arith.constant dense<0.000000e+00> : vector<2xf32>
    %594 = vector.multi_reduction <add>, %593, %cst_91 [1] : vector<2x256xf32> to vector<2xf32>
    %595 = vector.shape_cast %594 : vector<2xf32> to vector<2x1xf32>
    %596 = tpu.reciprocal %595 {approx = true} : vector<2x1xf32> -> vector<2x1xf32>
    %597 = vector.broadcast %596 : vector<2x1xf32> to vector<2x256xf32>
    %598 = arith.mulf %593, %597 : vector<2x256xf32>
    %599 = vector.shape_cast %598 : vector<2x256xf32> to vector<2x1x256xf32>
    %600 = vector.broadcast %599 : vector<2x1x256xf32> to vector<2x16x256xf32>
    %601 = arith.mulf %527, %600 : vector<2x16x256xf32>
    %cst_92 = arith.constant dense<0.000000e+00> : vector<2x16xf32>
    %602 = vector.multi_reduction <add>, %601, %cst_92 [2] : vector<2x16x256xf32> to vector<2x16xf32>
    %603 = arith.mulf %602, %602 : vector<2x16xf32>
    %cst_93 = arith.constant dense<0.000000e+00> : vector<2xf32>
    %604 = vector.multi_reduction <add>, %603, %cst_93 [1] : vector<2x16xf32> to vector<2xf32>
    %605 = vector.shape_cast %604 : vector<2xf32> to vector<2x1xf32>
    %cst_94 = arith.constant 1.000000e+00 : f32
    %606 = vector.broadcast %cst_94 : f32 to vector<2x1xf32>
    %607 = arith.addf %606, %605 : vector<2x1xf32>
    %608 = arith.divf %605, %607 : vector<2x1xf32>
    %609 = vector.broadcast %608 : vector<2x1xf32> to vector<2x16xf32>
    %610 = arith.mulf %602, %609 : vector<2x16xf32>
    %611 = math.rsqrt %605 : vector<2x1xf32>
    %612 = vector.broadcast %611 : vector<2x1xf32> to vector<2x16xf32>
    %613 = arith.mulf %610, %612 : vector<2x16xf32>
    %c3_95 = arith.constant 3 : index
    %c0_96 = arith.constant 0 : index
    %c0_97 = arith.constant 0 : index
    %614 = vector.load %arg3[%c3_95, %c0_96, %c0_97] : memref<4x2x16xf32, #tpu.memory_space<vmem>>, vector<1x2x16xf32>
    %615 = vector.shape_cast %614 : vector<1x2x16xf32> to vector<2x16xf32>
    %616 = vector.shape_cast %613 : vector<2x16xf32> to vector<1x2x16xf32>
    tpu.vector_store %arg3[%c3_95, %c0_96, %c0_97], %616 {strides = array<i32>} : memref<4x2x16xf32, #tpu.memory_space<vmem>>, vector<1x2x16xf32>,
    return
  }
  func.func @transform_0(%arg0: i32) -> (i32, i32, i32) {
    %c0_i32 = arith.constant 0 : i32
    %c0_i32_0 = arith.constant 0 : i32
    %c0_i32_1 = arith.constant 0 : i32
    %c0_i32_2 = arith.constant 0 : i32
    return %c0_i32, %c0_i32_0, %c0_i32_1 : i32, i32, i32
  }
  func.func @transform_1(%arg0: i32) -> (i32, i32, i32) {
    %c0_i32 = arith.constant 0 : i32
    %c0_i32_0 = arith.constant 0 : i32
    %c0_i32_1 = arith.constant 0 : i32
    return %arg0, %c0_i32, %c0_i32_0 : i32, i32, i32
  }
  func.func @transform_2(%arg0: i32) -> (i32, i32, i32) {
    %c0_i32 = arith.constant 0 : i32
    %c0_i32_0 = arith.constant 0 : i32
    %c0_i32_1 = arith.constant 0 : i32
    return %arg0, %c0_i32, %c0_i32_0 : i32, i32, i32
  }
}

</mosaic_0001>

<bundles_post_ra>
// kernel: digit_caps_forward.1
= control target key start
LH: loop header
LB: loop body
LE: loop exit
PB: predicated region body
PF: predicated region fallthrough
CT: control target
= control target key end

     0   :  { %7 = vsyncpa [#allocation3], 0  ;;  %s5963_s0 = inlined_call_operand.vmem [shape: f32[2,8,256], index: 0, kind: input, shape index: {}]   ;;  %s5964_s1 = inlined_call_operand.vmem [shape: bf16[8,128,256], index: 1, kind: input, shape index: {}]   ;;  %s5965_s2 = inlined_call_operand.hbm [shape: f32[8,2,16], index: 2, kind: output, shape index: {}]  }
   0x1   :  { %9 = vsyncpa [#allocation3 + $0x1], 0  ;;  %s3601_s9 = smov 0   ;;  %s3603_s10 = smov 0  }
   0x2   :  { %s3605_s11 = smov 0   ;;  %s3607_s12 = smov 0  }
   0x3 LB: > { %s3622_s13 = sadd.s32 4294967295, %s3579_s12   ;;  %s3276_s14 = sadd.s32 4294967294, %s3579_s12   ;;  %s3579_s12 = sphi %s3607_s12, %s6550_s12   ;;  %s3575_s11 = sphi %s3605_s11, %s6549_s11   ;;  %s3571_s10 = sphi %s3603_s10, %s6548_s10   ;;  %s3567_s9 = sphi %s3601_s9, %s6547_s9  }
   0x4   : > { %s3626_s15 = sadd.s32 1, %s3579_s12   ;;  %s69_s16 = sadd.s32 1, %s3575_s11 }
   0x5   : > { %s66_s17 = ssub.s32 %s3579_s12, %s3626_s15  ;;  %p79_p0 = scmp.ne.s32.totalorder %s3575_s11, %s3571_s10 }
   0x6   : > { %p67_p1 = scmp.eq.s32.totalorder %s66_s17, 0  ;;  %p80_p2 = scmp.eq.s32.totalorder %s3622_s13, 1 }
   0x7   : > { %p85_p3 = scmp.ne.s32.totalorder %s3571_s10, %s3567_s9  ;;  %p86_p4 = scmp.eq.s32.totalorder %s3276_s14, 1 }
   0x8   : > { %s3637_s18 = scalar_select %p67_p1, %s3575_s11, %s69_s16  }
   0x9   : > { %p3639_p5 = por %p80_p2, %p79_p0  ;;  %p3643_p6 = por %p86_p4, %p85_p3 }
   0xa   : > { %p3279_p7 = scmp.ge.s32.totalorder %s3579_s12, 1  ;;  %p117_p8 = scmp.lt.s32.totalorder %s3579_s12, 3 }
   0xc   : > { %p118_p9 = pnand %p3279_p7, %p117_p8 }
   0xe   : > { %121 = sbr.rel (%p118_p9) target bundleno = 2553 (0x9f9), region = 28 }
  0x15   : > { %s3281_s21 = sshll.u32 %s3622_s13, 2  ;;  %v3581_v0 = vmov 2.0   ;;  %v172_v1 = vlaneseq  ;;  %v3667_v5 = vld [vmem:[%s5963_s0] sm:$0xff]  ;;  %v3672_v6 = vld [vmem:[%s5963_s0 + $0x8] sm:$0xff]  ;;  %vm498_vm0 = vcmask 130112   ;;  %vm509_vm1 = vcmask 1041409  }
  0x16   : > { %456 = vadd.xlane.f32.xlu0 %v3581_v0  ;;  %p141_p10 = scmp.lt.s32.totalorder %s3281_s21, 7  ;;  %vm512_vm2 = vcmask 123904   ;;  %vm618_vm3 = vcmask 1041408   ;;  %s137_s6 = sand.u32 1, %s3571_s10  }
  0x17   : > { %v3651_v2 = vshrl.u32 %v172_v1, 7  ;;  %s3280_s7 = sshll.u32 %s137_s6, 3  ;;  %s3341_s14 = sshll.u32 %s3622_s13, 7 }
  0x18   : > { %s6552_s21 = smov (!%p141_p10, %s3281_s21), 7  ;;  %s5872_s8 = scalar_lea.vmem [#allocation2], %s3280_s7 }
  0x19   : > { %s3340_s22 = sshll.u32 %s6552_s21, 7  ;;  %v3659_v3 = vsub.s32 0, %v3651_v2  ;;  %v3662_v4 = vsub.s32 1, %v3651_v2  ;;  %v3721_v25 = vsub.s32 2, %v3651_v2  ;;  %v3724_v26 = vsub.s32 3, %v3651_v2  ;;  %s3214_s16 = sshll.u32 %s5872_s8, 4  ;;  %s5913_s16 = int_to_ptr.vmem [resolvable:$true] %s3214_s16 }
  0x1a   : > { %s3656_s25 = scalar_lea.vmem %s5964_s1, %s3340_s22  ;;  %v3729_v29 = vsub.s32 4, %v3651_v2  ;;  %v3794_v56 = vsub.s32 5, %v3651_v2  ;;  %v3798_v58 = vsub.s32 6, %v3651_v2  ;;  %s5911_s22 = scalar_lea.hbm %s5965_s2, %s3341_s14 }
  0x1b   : > { %6205 = vst [vmem:[#allocation5_spill] sm:$0xff] %v3659_v3  ;;  %6206 = vst [vmem:[#allocation6_spill] sm:$0xff] %v3662_v4  ;;  %v3675_v7 = vld [vmem:[%s3656_s25 + $0x8] sm:$0xff]  ;;  %v3678_v8 = vld [vmem:[%s3656_s25 + $0x18] sm:$0xff]  ;;  %v3684_v11 = vrot.slane %v3667_v5, %v3659_v3  ;;  %v3688_v12 = vrot.slane %v3672_v6, %v3659_v3  ;;  %v3697_v16 = vrot.slane %v3667_v5, %v3662_v4  ;;  %s5922_s13 = scalar_lea.sflag [#allocation3], %s137_s6  ;;  %s3517_s23 = scalar_lea.vmem %s5913_s16, 128 }
  0x1c   : > { %v5981_v9 = vunpack.c.l.bf16 %v3675_v7  ;;  %v5980_v10 = vunpack.c.h.bf16 %v3675_v7  ;;  %v3691_v13 = vld [vmem:[%s3656_s25 + $0x28] sm:$0xff]  ;;  %v5979_v14 = vunpack.c.l.bf16 %v3678_v8  ;;  %v5978_v15 = vunpack.c.h.bf16 %v3678_v8  ;;  %v3712_v22 = vld [vmem:[%s3656_s25 + $0x38] sm:$0xff]  ;;  %v3743_v35 = vld [vmem:[%s3656_s25] sm:$0xff]  ;;  %p3518_p11 = scmp.ne.s32.totalorder %s5913_s16, %s3517_s23  ;;  %s3583_s24 = smov [#allocation2]  }
  0x1d   : > { %6207 = vst [vmem:[#allocation7_spill] sm:$0xff] %v3684_v11  ;;  %6208 = vst [vmem:[#allocation8_spill] sm:$0xff] %v3688_v12  ;;  %v3701_v17 = vrot.slane %v3672_v6, %v3662_v4  ;;  %v5976_v20 = vunpack.c.l.bf16 %v3691_v13  ;;  %v5975_v21 = vunpack.c.h.bf16 %v3691_v13  ;;  %v5973_v27 = vunpack.c.l.bf16 %v3712_v22  ;;  %v3732_v30 = vld [vmem:[%s3656_s25 + $0x48] sm:$0xff]  ;;  %v3756_v40 = vld [vmem:[%s3656_s25 + $0x58] sm:$0xff] }
  0x1e   : > { %6209 = vst [vmem:[#allocation9_spill] sm:$0xff] %v3697_v16  ;;  %v190_v18 = vmul.f32 %v3684_v11, %v5981_v9  ;;  %v191_v19 = vmul.f32 %v3688_v12, %v5980_v10  ;;  %v226_v23 = vmul.f32 %v3697_v16, %v5979_v14  ;;  %v5972_v28 = vunpack.c.h.bf16 %v3712_v22  ;;  %v3759_v41 = vld [vmem:[%s3656_s25 + $0x68] sm:$0xff]  ;;  %v3776_v46 = vld [vmem:[%s3656_s25 + $0x78] sm:$0xff]  ;;  %v3883_v14 = vld [vmem:[%s3656_s25 + $0x50] sm:$0xff]  ;;  %p3519_p12 = pnand %p3518_p11, %p3639_p5 }
  0x1f   : > { %6210 = vst [vmem:[#allocation10_spill] sm:$0xff] %v3701_v17  ;;  %v227_v24 = vmul.f32 %v3701_v17, %v5978_v15  ;;  %v3736_v33 = vrot.slane %v3667_v5, %v3721_v25  ;;  %v3740_v34 = vrot.slane %v3672_v6, %v3721_v25  ;;  %v3747_v36 = vrot.slane %v3667_v5, %v3724_v26  ;;  %v3886_v9 = vld [vmem:[%s3656_s25 + $0x60] sm:$0xff] }
  0x20   : > { %v234_v31 = vadd.f32 %v226_v23, %v190_v18  ;;  %v3751_v37 = vrot.slane %v3672_v6, %v3724_v26  ;;  %v5971_v38 = vunpack.c.l.bf16 %v3732_v30  ;;  %v5969_v39 = vunpack.c.h.bf16 %v3732_v30  ;;  %p3520_p13 = pneg %p3519_p12 }
  0x21   : > { %v235_v32 = vadd.f32 %v227_v24, %v191_v19  ;;  %6211 = vst [vmem:[#allocation11_spill] sm:$0xff] %v3736_v33  ;;  %6212 = vst [vmem:[#allocation12_spill] sm:$0xff] %v3740_v34  ;;  %v262_v42 = vmul.f32 %v3736_v33, %v5976_v20  ;;  %v263_v43 = vmul.f32 %v3740_v34, %v5975_v21  ;;  %v5968_v49 = vunpack.c.l.bf16 %v3756_v40 }
  0x22   : > { %v3769_v44 = vrot.slane %v3667_v5, %v3729_v29  ;;  %v3773_v45 = vrot.slane %v3672_v6, %v3729_v29  ;;  %v298_v47 = vmul.f32 %v3747_v36, %v5973_v27  ;;  %v299_v48 = vmul.f32 %v3751_v37, %v5972_v28 }
  0x23   : > { %v5984_v50 = vunpack.c.l.bf16 %v3743_v35  ;;  %v270_v51 = vadd.f32 %v262_v42, %v234_v31  ;;  %v271_v52 = vadd.f32 %v263_v43, %v235_v32  ;;  %v5967_v55 = vunpack.c.h.bf16 %v3756_v40  ;;  %v3822_v32 = vld [vmem:[%s3656_s25 + $0x10] sm:$0xff] }
  0x24   : > { %6213 = vst [vmem:[#allocation13_spill] sm:$0xff] %v3773_v45  ;;  %v334_v53 = vmul.f32 %v3769_v44, %v5971_v38  ;;  %v335_v54 = vmul.f32 %v3773_v45, %v5969_v39  ;;  %v5966_v57 = vunpack.c.l.bf16 %v3759_v41  ;;  %v5970_v61 = vunpack.c.h.bf16 %v3759_v41 }
  0x25   : > { %v306_v59 = vadd.f32 %v298_v47, %v270_v51  ;;  %v307_v60 = vadd.f32 %v299_v48, %v271_v52  ;;  %v5974_v62 = vunpack.c.l.bf16 %v3776_v46  ;;  %v3804_v63 = vrot.slane %v3667_v5, %v3794_v56  ;;  %v3836_v52 = vld [vmem:[%s3656_s25 + $0x20] sm:$0xff] }
  0x26   : > { %v3808_v0 = vrot.slane %v3672_v6, %v3794_v56  ;;  %v3812_v18 = vrot.slane %v3667_v5, %v3798_v58  ;;  %v3816_v19 = vrot.slane %v3672_v6, %v3798_v58  ;;  %v3819_v31 = vsub.s32 7, %v3651_v2 }
  0x27   : > { %6214 = vst [vmem:[#allocation14_spill] sm:$0xff] %v3804_v63  ;;  %v342_v23 = vadd.f32 %v334_v53, %v306_v59  ;;  %v343_v24 = vadd.f32 %v335_v54, %v307_v60  ;;  %v5982_v42 = vunpack.c.h.bf16 %v3743_v35  ;;  %v370_v43 = vmul.f32 %v3804_v63, %v5968_v49  ;;  %v3853_v49 = vld [vmem:[%s3656_s25 + $0x30] sm:$0xff] }
  0x28   : > { %6215 = vst [vmem:[#allocation15_spill] sm:$0xff] %v3808_v0  ;;  %6216 = vst [vmem:[#allocation16_spill] sm:$0xff] %v3812_v18  ;;  %v371_v47 = vmul.f32 %v3808_v0, %v5967_v55  ;;  %v406_v48 = vmul.f32 %v3812_v18, %v5966_v57  ;;  %v5977_v51 = vunpack.c.h.bf16 %v3776_v46  ;;  %v407_v53 = vmul.f32 %v3816_v19, %v5970_v61 }
  0x29   : > { %6217 = vst [vmem:[#allocation17_spill] sm:$0xff] %v3816_v19  ;;  %v3843_v54 = vrot.slane %v3667_v5, %v3819_v31  ;;  %v3847_v59 = vrot.slane %v3672_v6, %v3819_v31  ;;  %v188_v60 = vmul.f32 %v3684_v11, %v5984_v50  ;;  %v378_v57 = vadd.f32 %v370_v43, %v342_v23  ;;  %v3869_v43 = vld [vmem:[%s3656_s25 + $0x40] sm:$0xff] }
  0x2a   : > { %v379_v55 = vadd.f32 %v371_v47, %v343_v24  ;;  %v204_v39 = vunpack.c.l.bf16 %v3822_v32  ;;  %v205_v61 = vunpack.c.h.bf16 %v3822_v32  ;;  %v189_v5 = vmul.f32 %v3688_v12, %v5982_v42 }
  0x2b   : > { %6218 = vst [vmem:[#allocation18_spill] sm:$0xff] %v3843_v54  ;;  %6219 = vst [vmem:[#allocation19_spill] sm:$0xff] %v3847_v59  ;;  %v5983_v6 = vunpack.c.l.bf16 %v3836_v52  ;;  %v5985_v38 = vunpack.c.h.bf16 %v3836_v52  ;;  %v442_v23 = vmul.f32 %v3843_v54, %v5974_v62  ;;  %v443_v24 = vmul.f32 %v3847_v59, %v5977_v51 }
  0x2c   : > { %v224_v32 = vmul.f32 %v3697_v16, %v204_v39  ;;  %v225_v47 = vmul.f32 %v3701_v17, %v205_v61  ;;  %v276_v62 = vunpack.c.l.bf16 %v3853_v49  ;;  %v277_v21 = vunpack.c.h.bf16 %v3853_v49 }
  0x2d   : > { %v260_v28 = vmul.f32 %v3736_v33, %v5983_v6  ;;  %v261_v27 = vmul.f32 %v3740_v34, %v5985_v38  ;;  %v414_v20 = vadd.f32 %v406_v48, %v378_v57  ;;  %v415_v51 = vadd.f32 %v407_v53, %v379_v55 }
  0x2e   : > { %v488_v15 = vand.u32 127, %v172_v1  ;;  %v232_v10 = vadd.f32 %v224_v32, %v188_v60  ;;  %v233_v42 = vadd.f32 %v225_v47, %v189_v5  ;;  %v296_v6 = vmul.f32 %v3747_v36, %v276_v62 }
  0x2f   : > { %v297_v50 = vmul.f32 %v3751_v37, %v277_v21  ;;  %v312_v38 = vunpack.c.l.bf16 %v3869_v43  ;;  %v313_v1 = vunpack.c.h.bf16 %v3869_v43  ;;  %v348_v53 = vunpack.c.l.bf16 %v3883_v14 }
  0x30   : > { %v3892_v34 = vsub.s32 %v488_v15, %v3651_v2  ;;  %v493_v49 = vadd.s32 4294967288, %v488_v15  ;;  %v268_v55 = vadd.f32 %v260_v28, %v232_v10  ;;  %v269_v57 = vadd.f32 %v261_v27, %v233_v42  ;;  %v150_v15 = vld [vmem:[%s5963_s0 + $0x10] sm:$0xff]  ;;  %v151_v10 = vld [vmem:[%s5963_s0 + $0x18] sm:$0xff] }
  0x31   : > { %v332_v48 = vmul.f32 %v3769_v44, %v312_v38  ;;  %v349_v60 = vunpack.c.h.bf16 %v3883_v14  ;;  %v384_v47 = vunpack.c.l.bf16 %v3886_v9  ;;  %v3909_v27 = vld [vmem:[%s3656_s25 + $0x70] sm:$0xff]  ;;  %v333_v42 = vmul.f32 %v3773_v45, %v313_v1 }
  0x32   : > { %6220 = vst [vmem:[#allocation20_spill] sm:$0xff] %v3892_v34  ;;  %v3899_v5 = vsub.s32 %v493_v49, %v3651_v2  ;;  %v304_v32 = vadd.f32 %v296_v6, %v268_v55  ;;  %v305_v28 = vadd.f32 %v297_v50, %v269_v57  ;;  %v3912_v14 = vadd.f32 %v442_v23, %v414_v20 }
  0x33   : > { %v3914_v2 = vadd.f32 %v443_v24, %v415_v51  ;;  %v368_v6 = vmul.f32 %v3804_v63, %v348_v53  ;;  %v385_v43 = vunpack.c.h.bf16 %v3886_v9  ;;  %v369_v55 = vmul.f32 %v3808_v0, %v349_v60 }
  0x34   : > { %6221 = vst [vmem:[#allocation21_spill] sm:$0xff] %v3899_v5  ;;  %6222 = vst [vmem:[#allocation22_spill] sm:$0xff] %v3912_v14  ;;  %v340_v49 = vadd.f32 %v332_v48, %v304_v32  ;;  %v3920_v34 = vrot.slane %v150_v15, %v3659_v3  ;;  %v3923_v5 = vrot.slane %v151_v10, %v3659_v3  ;;  %v6224_v9 = vunpack.c.l.bf16 %v3743_v35 }
  0x35   : > { %6223 = vst [vmem:[#allocation23_spill] sm:$0xff] %v3914_v2  ;;  %v404_v50 = vmul.f32 %v3812_v18, %v384_v47  ;;  %v3929_v23 = vrot.slane %v150_v15, %v3662_v4  ;;  %v341_v24 = vadd.f32 %v333_v42, %v305_v28  ;;  %v6225_v48 = vunpack.c.h.bf16 %v3743_v35 }
  0x36   : > { %v192_v57 = vmul.f32 %v3920_v34, %v6224_v9  ;;  %v3938_v3 = vrot.slane %v151_v10, %v3662_v4  ;;  %v405_v2 = vmul.f32 %v3816_v19, %v385_v43  ;;  %v3943_v51 = vrot.slane %v150_v15, %v3721_v25 }
  0x37   : > { %v193_v32 = vmul.f32 %v3923_v5, %v6225_v48  ;;  %v228_v20 = vmul.f32 %v3929_v23, %v204_v39  ;;  %v3946_v28 = vrot.slane %v151_v10, %v3721_v25  ;;  %v376_v42 = vadd.f32 %v368_v6, %v340_v49 }
  0x38   : > { %v229_v9 = vmul.f32 %v3938_v3, %v205_v61  ;;  %v3950_v35 = vrot.slane %v150_v15, %v3724_v26  ;;  %v3953_v48 = vrot.slane %v151_v10, %v3724_v26  ;;  %v6226_v4 = vunpack.c.l.bf16 %v3909_v27 }
  0x39   : > { %v236_v39 = vadd.f32 %v228_v20, %v192_v57  ;;  %v6227_v19 = vunpack.c.l.bf16 %v3836_v52  ;;  %v6228_v25 = vunpack.c.h.bf16 %v3836_v52  ;;  %v6229_v61 = vunpack.c.h.bf16 %v3909_v27 }
  0x3a   : > { %v440_v14 = vmul.f32 %v3843_v54, %v6226_v4  ;;  %v237_v26 = vadd.f32 %v229_v9, %v193_v32  ;;  %v300_v0 = vmul.f32 %v3950_v35, %v276_v62  ;;  %v301_v63 = vmul.f32 %v3953_v48, %v277_v21 }
  0x3b   : > { %v264_v18 = vmul.f32 %v3943_v51, %v6227_v19  ;;  %v265_v6 = vmul.f32 %v3946_v28, %v6228_v25  ;;  %v3967_v49 = vmul.f32 %v3847_v59, %v6229_v61  ;;  %v3972_v20 = vrot.slane %v150_v15, %v3729_v29 }
  0x3c   : > { %v3975_v19 = vrot.slane %v151_v10, %v3729_v29  ;;  %v3978_v52 = vrot.slane %v150_v15, %v3794_v56  ;;  %v3981_v25 = vrot.slane %v151_v10, %v3794_v56  ;;  %v3984_v32 = vrot.slane %v150_v15, %v3798_v58 }
  0x3d   : > { %v272_v4 = vadd.f32 %v264_v18, %v236_v39  ;;  %6230 = vst [vmem:[#allocation24_spill] sm:$0xff] %v3972_v20  ;;  %v273_v57 = vadd.f32 %v265_v6, %v237_v26  ;;  %v3987_v62 = vrot.slane %v151_v10, %v3798_v58  ;;  %v336_v18 = vmul.f32 %v3972_v20, %v312_v38 }
  0x3e   : > { %6231 = vst [vmem:[#allocation25_spill] sm:$0xff] %v3975_v19  ;;  %6232 = vst [vmem:[#allocation26_spill] sm:$0xff] %v3978_v52  ;;  %v337_v9 = vmul.f32 %v3975_v19, %v313_v1  ;;  %v372_v29 = vmul.f32 %v3978_v52, %v348_v53  ;;  %v377_v39 = vadd.f32 %v369_v55, %v341_v24  ;;  %v6236_v58 = vunpack.c.l.bf16 %v3675_v7 }
  0x3f   : > { %6233 = vst [vmem:[#allocation27_spill] sm:$0xff] %v3981_v25  ;;  %6234 = vst [vmem:[#allocation28_spill] sm:$0xff] %v3984_v32  ;;  %v308_v21 = vadd.f32 %v300_v0, %v272_v4  ;;  %v412_v61 = vadd.f32 %v404_v50, %v376_v42  ;;  %v309_v59 = vadd.f32 %v301_v63, %v273_v57  ;;  %v6237_v38 = vunpack.c.h.bf16 %v3675_v7 }
  0x40   : > { %6235 = vst [vmem:[#allocation29_spill] sm:$0xff] %v3987_v62  ;;  %v373_v6 = vmul.f32 %v3981_v25, %v349_v60  ;;  %v408_v26 = vmul.f32 %v3984_v32, %v384_v47  ;;  %v409_v54 = vmul.f32 %v3987_v62, %v385_v43  ;;  %v194_v0 = vmul.f32 %v3920_v34, %v6236_v58 }
  0x41   : > { %v344_v56 = vadd.f32 %v336_v18, %v308_v21  ;;  %v345_v4 = vadd.f32 %v337_v9, %v309_v59  ;;  %v195_v1 = vmul.f32 %v3923_v5, %v6237_v38  ;;  %v6238_v53 = vunpack.c.l.bf16 %v3678_v8 }
  0x42   : > { %v6239_v60 = vunpack.c.h.bf16 %v3678_v8  ;;  %v4008_v43 = vrot.slane %v150_v15, %v3819_v31  ;;  %v4011_v50 = vrot.slane %v151_v10, %v3819_v31  ;;  %v6242_v7 = vunpack.c.l.bf16 %v3691_v13 }
  0x43   : > { %v230_v63 = vmul.f32 %v3929_v23, %v6238_v53  ;;  %v380_v47 = vadd.f32 %v372_v29, %v344_v56  ;;  %v381_v24 = vadd.f32 %v373_v6, %v345_v4  ;;  %v6243_v8 = vunpack.c.h.bf16 %v3691_v13  ;;  %v4043_v53 = vld [vmem:[%s3656_s25 + $0x90] sm:$0xff] }
  0x44   : > { %v231_v55 = vmul.f32 %v3938_v3, %v6239_v60  ;;  %6240 = vst [vmem:[#allocation30_spill] sm:$0xff] %v4008_v43  ;;  %6241 = vst [vmem:[#allocation31_spill] sm:$0xff] %v4011_v50  ;;  %v266_v59 = vmul.f32 %v3943_v51, %v6242_v7  ;;  %v413_v18 = vadd.f32 %v405_v2, %v377_v39  ;;  %v6245_v15 = vunpack.c.l.bf16 %v3712_v22  ;;  %v4034_v2 = vld [vmem:[%s3656_s25 + $0x80] sm:$0xff] }
  0x45   : > { %v238_v42 = vadd.f32 %v230_v63, %v194_v0  ;;  %v267_v21 = vmul.f32 %v3946_v28, %v6243_v8  ;;  %v4019_v9 = vadd.f32 %v440_v14, %v412_v61  ;;  %v6246_v10 = vunpack.c.h.bf16 %v3712_v22 }
  0x46   : > { %v239_v57 = vadd.f32 %v231_v55, %v195_v1  ;;  %v302_v31 = vmul.f32 %v3950_v35, %v6245_v15  ;;  %v6247_v58 = vunpack.c.l.bf16 %v3732_v30  ;;  %v6248_v0 = vunpack.c.h.bf16 %v3732_v30 }
  0x47   : > { %6244 = vst [vmem:[#allocation32_spill] sm:$0xff] %v4019_v9  ;;  %v303_v29 = vmul.f32 %v3953_v48, %v6246_v10  ;;  %v274_v6 = vadd.f32 %v266_v59, %v238_v42  ;;  %v416_v39 = vadd.f32 %v408_v26, %v380_v47  ;;  %v417_v61 = vadd.f32 %v409_v54, %v381_v24  ;;  %v4052_v47 = vld [vmem:[%s3656_s25 + $0xa0] sm:$0xff] }
  0x48   : > { %v275_v56 = vadd.f32 %v267_v21, %v239_v57  ;;  %v338_v13 = vmul.f32 %v3972_v20, %v6247_v58  ;;  %v339_v14 = vmul.f32 %v3975_v19, %v6248_v0  ;;  %v6249_v22 = vunpack.c.l.bf16 %v3909_v27  ;;  %v4079_v0 = vld [vmem:[%s3656_s25 + $0xc0] sm:$0xff] }
  0x49   : > { %v6250_v38 = vunpack.c.h.bf16 %v3909_v27  ;;  %v310_v63 = vadd.f32 %v302_v31, %v274_v6  ;;  %v6251_v30 = vunpack.c.l.bf16 %v3756_v40  ;;  %v6252_v26 = vunpack.c.h.bf16 %v3756_v40  ;;  %v4063_v40 = vld [vmem:[%s3656_s25 + $0xb0] sm:$0xff] }
  0x4a   : > { %v444_v4 = vmul.f32 %v4008_v43, %v6249_v22  ;;  %v311_v60 = vadd.f32 %v303_v29, %v275_v56  ;;  %v6253_v7 = vunpack.c.l.bf16 %v3759_v41  ;;  %v6254_v59 = vunpack.c.h.bf16 %v3759_v41 }
  0x4b   : > { %v445_v1 = vmul.f32 %v4011_v50, %v6250_v38  ;;  %v374_v55 = vmul.f32 %v3978_v52, %v6251_v30  ;;  %v375_v54 = vmul.f32 %v3981_v25, %v6252_v26  ;;  %v6019_v42 = vunpack.c.l.bf16 %v4034_v2 }
  0x4c   : > { %v410_v27 = vmul.f32 %v3984_v32, %v6253_v7  ;;  %v411_v24 = vmul.f32 %v3987_v62, %v6254_v59  ;;  %v6016_v57 = vunpack.c.h.bf16 %v4034_v2  ;;  %v346_v8 = vadd.f32 %v338_v13, %v310_v63  ;;  %v6256_v63 = vld [vmem:[#allocation12_spill] sm:$0xff]  ;;  %v4096_v59 = vld [vmem:[%s3656_s25 + $0xd0] sm:$0xff] }
  0x4d   : > { %v347_v21 = vadd.f32 %v339_v14, %v311_v60  ;;  %v6011_v15 = vunpack.c.l.bf16 %v4043_v53  ;;  %v6008_v31 = vunpack.c.h.bf16 %v4043_v53  ;;  %v1037_v10 = vmul.f32 %v6019_v42, %v3684_v11 }
  0x4e   : > { %v1038_v41 = vmul.f32 %v6016_v57, %v3688_v12  ;;  %v6009_v29 = vunpack.c.l.bf16 %v4052_v47  ;;  %v6010_v6 = vunpack.c.h.bf16 %v4052_v47  ;;  %v382_v56 = vadd.f32 %v374_v55, %v346_v8 }
  0x4f   : > { %v6255_v58 = vunpack.c.l.bf16 %v3776_v46  ;;  %v1057_v14 = vmul.f32 %v6011_v15, %v3697_v16  ;;  %v1058_v22 = vmul.f32 %v6008_v31, %v3701_v17  ;;  %v6015_v30 = vunpack.c.l.bf16 %v4063_v40  ;;  %v4099_v31 = vld [vmem:[%s3656_s25 + $0xe0] sm:$0xff] }
  0x50   : > { %v1077_v38 = vmul.f32 %v6009_v29, %v3736_v33  ;;  %v1078_v60 = vmul.f32 %v6010_v6, %v6256_v63  ;;  %v6012_v55 = vunpack.c.h.bf16 %v4063_v40  ;;  %v383_v26 = vadd.f32 %v375_v54, %v347_v21 }
  0x51   : > { %v446_v13 = vmul.f32 %v4008_v43, %v6255_v58  ;;  %v418_v7 = vadd.f32 %v410_v27, %v382_v56  ;;  %v1065_v8 = vadd.f32 %v1057_v14, %v1037_v10  ;;  %v1066_v58 = vadd.f32 %v1058_v22, %v1038_v41  ;;  %v4115_v56 = vld [vmem:[%s3656_s25 + $0xf0] sm:$0xff] }
  0x52   : > { %v1097_v29 = vmul.f32 %v6015_v30, %v3747_v36  ;;  %v1098_v6 = vmul.f32 %v6012_v55, %v3751_v37  ;;  %v6013_v15 = vunpack.c.l.bf16 %v4079_v0  ;;  %v6014_v54 = vunpack.c.h.bf16 %v4079_v0  ;;  %v6262_v30 = vld [vmem:[#allocation14_spill] sm:$0xff] }
  0x53   : > { %v4110_v27 = vadd.f32 %v3967_v49, %v413_v18  ;;  %v4112_v21 = vadd.f32 %v444_v4, %v416_v39  ;;  %v1085_v10 = vadd.f32 %v1077_v38, %v1065_v8  ;;  %v1086_v41 = vadd.f32 %v1078_v60, %v1066_v58  ;;  %v4129_v60 = vld [vmem:[%s3656_s25 + $0x88] sm:$0xff] }
  0x54   : > { %v1117_v14 = vmul.f32 %v6013_v15, %v3769_v44  ;;  %v1118_v22 = vmul.f32 %v6014_v54, %v3773_v45  ;;  %v6018_v55 = vunpack.c.l.bf16 %v4096_v59  ;;  %v6017_v49 = vunpack.c.h.bf16 %v4096_v59 }
  0x55   : > { %6257 = vst [vmem:[#allocation33_spill] sm:$0xff] %v4110_v27  ;;  %6258 = vst [vmem:[#allocation34_spill] sm:$0xff] %v4112_v21  ;;  %v4125_v18 = vadd.f32 %v445_v1, %v417_v61  ;;  %v1105_v39 = vadd.f32 %v1097_v29, %v1085_v10  ;;  %v1106_v4 = vadd.f32 %v1098_v6, %v1086_v41  ;;  %v6020_v38 = vunpack.c.l.bf16 %v4099_v31  ;;  %v4140_v61 = vld [vmem:[%s3656_s25 + $0x98] sm:$0xff]  ;;  %v6263_v29 = vld [vmem:[#allocation15_spill] sm:$0xff] }
  0x56   : > { %v419_v8 = vadd.f32 %v411_v24, %v383_v26  ;;  %v6260_v58 = vunpack.c.h.bf16 %v3776_v46  ;;  %v4134_v54 = vadd.f32 %v446_v13, %v418_v7  ;;  %v1137_v57 = vmul.f32 %v6018_v55, %v6262_v30  ;;  %v4148_v26 = vld [vmem:[%s3656_s25 + $0xa8] sm:$0xff]  ;;  %v6266_v55 = vld [vmem:[#allocation18_spill] sm:$0xff] }
  0x57   : > { %6259 = vst [vmem:[#allocation35_spill] sm:$0xff] %v4125_v18  ;;  %v1125_v1 = vadd.f32 %v1117_v14, %v1105_v39  ;;  %v1138_v6 = vmul.f32 %v6017_v49, %v6263_v29  ;;  %v6025_v24 = vunpack.c.h.bf16 %v4099_v31  ;;  %v6027_v46 = vunpack.c.l.bf16 %v4115_v56  ;;  %v6264_v39 = vld [vmem:[#allocation16_spill] sm:$0xff]  ;;  %v4157_v49 = vld [vmem:[%s3656_s25 + $0xb8] sm:$0xff] }
  0x58   : > { %v447_v15 = vmul.f32 %v4011_v50, %v6260_v58  ;;  %6261 = vst [vmem:[#allocation36_spill] sm:$0xff] %v4134_v54  ;;  %v1126_v13 = vadd.f32 %v1118_v22, %v1106_v4  ;;  %v6022_v10 = vunpack.c.l.bf16 %v4129_v60  ;;  %v6024_v41 = vunpack.c.h.bf16 %v4129_v60  ;;  %v4176_v54 = vld [vmem:[%s3656_s25 + $0xc8] sm:$0xff] }
  0x59   : > { %v1145_v14 = vadd.f32 %v1137_v57, %v1125_v1  ;;  %v1157_v58 = vmul.f32 %v6020_v38, %v6264_v39  ;;  %v6265_v38 = vld [vmem:[#allocation17_spill] sm:$0xff]  ;;  %v1177_v42 = vmul.f32 %v6027_v46, %v6266_v55  ;;  %v4185_v1 = vld [vmem:[%s3656_s25 + $0xd8] sm:$0xff]  ;;  %v6270_v46 = vunpack.c.h.bf16 %v4148_v26 }
  0x5a   : > { %v1039_v22 = vmul.f32 %v6022_v10, %v3684_v11  ;;  %v1040_v4 = vmul.f32 %v6024_v41, %v3688_v12  ;;  %v1158_v7 = vmul.f32 %v6025_v24, %v6265_v38  ;;  %v6267_v10 = vunpack.c.l.bf16 %v4140_v61  ;;  %v4196_v11 = vld [vmem:[%s3656_s25 + $0xe8] sm:$0xff] }
  0x5b   : > { %v6268_v41 = vunpack.c.h.bf16 %v4140_v61  ;;  %v6269_v24 = vunpack.c.l.bf16 %v4148_v26  ;;  %v1080_v27 = vmul.f32 %v6270_v46, %v6256_v63  ;;  %v6044_v9 = vunpack.c.l.bf16 %v4157_v49 }
  0x5c   : > { %v1059_v18 = vmul.f32 %v6267_v10, %v3697_v16  ;;  %v6043_v12 = vunpack.c.h.bf16 %v4157_v49  ;;  %v1146_v10 = vadd.f32 %v1138_v6, %v1126_v13  ;;  %v1165_v16 = vadd.f32 %v1157_v58, %v1145_v14  ;;  %v4209_v6 = vld [vmem:[%s3656_s25 + $0xf8] sm:$0xff]  ;;  %v6272_v58 = vld [vmem:[#allocation19_spill] sm:$0xff] }
  0x5d   : > { %v1060_v57 = vmul.f32 %v6268_v41, %v3701_v17  ;;  %v1079_v21 = vmul.f32 %v6269_v24, %v3736_v33  ;;  %v1099_v50 = vmul.f32 %v6044_v9, %v3747_v36  ;;  %v6045_v46 = vunpack.c.l.bf16 %v4176_v54 }
  0x5e   : > { %v1067_v41 = vadd.f32 %v1059_v18, %v1039_v22  ;;  %v1100_v24 = vmul.f32 %v6043_v12, %v3751_v37  ;;  %v6047_v63 = vunpack.c.h.bf16 %v4176_v54  ;;  %v4206_v33 = vadd.f32 %v447_v15, %v419_v8 }
  0x5f   : > { %v1068_v17 = vadd.f32 %v1060_v57, %v1040_v4  ;;  %v6046_v18 = vunpack.c.l.bf16 %v4185_v1  ;;  %v6273_v22 = vunpack.c.h.bf16 %v4115_v56  ;;  %v1119_v57 = vmul.f32 %v6045_v46, %v3769_v44 }
  0x60   : > { %6271 = vst [vmem:[#allocation14_spill] sm:$0xff] %v4206_v33  ;;  %v1087_v13 = vadd.f32 %v1079_v21, %v1067_v41  ;;  %v1166_v21 = vadd.f32 %v1158_v7, %v1146_v10  ;;  %v4226_v41 = vadd.f32 %v1177_v42, %v1165_v16  ;;  %v6277_v7 = vunpack.c.h.bf16 %v4185_v1 }
  0x61   : > { %v1088_v14 = vadd.f32 %v1080_v27, %v1068_v17  ;;  %v1178_v4 = vmul.f32 %v6273_v22, %v6272_v58  ;;  %v1120_v17 = vmul.f32 %v6047_v63, %v3773_v45  ;;  %v1139_v27 = vmul.f32 %v6046_v18, %v6262_v30 }
  0x62   : > { %v1107_v15 = vadd.f32 %v1099_v50, %v1087_v13  ;;  %6274 = vst [vmem:[#allocation15_spill] sm:$0xff] %v4226_v41  ;;  %v6275_v50 = vunpack.c.l.bf16 %v4034_v2  ;;  %v6276_v13 = vunpack.c.h.bf16 %v4034_v2  ;;  %v1140_v16 = vmul.f32 %v6277_v7, %v6263_v29 }
  0x63   : > { %v1108_v8 = vadd.f32 %v1100_v24, %v1088_v14  ;;  %v6278_v42 = vunpack.c.l.bf16 %v4196_v11  ;;  %v6280_v18 = vunpack.c.h.bf16 %v4043_v53  ;;  %v6281_v2 = vunpack.c.l.bf16 %v4052_v47 }
  0x64   : > { %v1127_v12 = vadd.f32 %v1119_v57, %v1107_v15  ;;  %v1041_v24 = vmul.f32 %v6275_v50, %v3920_v34  ;;  %v1042_v14 = vmul.f32 %v6276_v13, %v3923_v5  ;;  %v6279_v57 = vunpack.c.l.bf16 %v4043_v53 }
  0x65   : > { %v1159_v10 = vmul.f32 %v6278_v42, %v6264_v39  ;;  %v1062_v50 = vmul.f32 %v6280_v18, %v3938_v3  ;;  %v1128_v63 = vadd.f32 %v1120_v17, %v1108_v8  ;;  %v1081_v13 = vmul.f32 %v6281_v2, %v3943_v51 }
  0x66   : > { %v1061_v15 = vmul.f32 %v6279_v57, %v3929_v23  ;;  %v1147_v9 = vadd.f32 %v1139_v27, %v1127_v12  ;;  %v6282_v7 = vunpack.c.h.bf16 %v4052_v47  ;;  %v6283_v41 = vunpack.c.l.bf16 %v4063_v40 }
  0x67   : > { %v1070_v42 = vadd.f32 %v1062_v50, %v1042_v14  ;;  %v6284_v53 = vunpack.c.h.bf16 %v4063_v40  ;;  %v4261_v8 = vadd.f32 %v1178_v4, %v1166_v21  ;;  %v6286_v12 = vunpack.c.h.bf16 %v4196_v11 }
  0x68   : > { %v1082_v46 = vmul.f32 %v6282_v7, %v3946_v28  ;;  %v1069_v22 = vadd.f32 %v1061_v15, %v1041_v24  ;;  %v1101_v57 = vmul.f32 %v6283_v41, %v3950_v35  ;;  %v6287_v47 = vunpack.c.l.bf16 %v4209_v6 }
  0x69   : > { %v1102_v18 = vmul.f32 %v6284_v53, %v3953_v48  ;;  %6285 = vst [vmem:[#allocation16_spill] sm:$0xff] %v4261_v8  ;;  %v1160_v17 = vmul.f32 %v6286_v12, %v6265_v38  ;;  %v6288_v24 = vunpack.c.h.bf16 %v4209_v6  ;;  %v6289_v40 = vunpack.c.l.bf16 %v4079_v0 }
  0x6a   : > { %v1179_v27 = vmul.f32 %v6287_v47, %v6266_v55  ;;  %v1089_v41 = vadd.f32 %v1081_v13, %v1069_v22  ;;  %v1090_v15 = vadd.f32 %v1082_v46, %v1070_v42  ;;  %v6290_v21 = vunpack.c.h.bf16 %v4079_v0 }
  0x6b   : > { %v4272_v14 = vmul.f32 %v6288_v24, %v6272_v58  ;;  %v1121_v4 = vmul.f32 %v6289_v40, %v3972_v20  ;;  %v1148_v2 = vadd.f32 %v1140_v16, %v1128_v63  ;;  %v1167_v7 = vadd.f32 %v1159_v10, %v1147_v9 }
  0x6c   : > { %v1122_v50 = vmul.f32 %v6290_v21, %v3975_v19  ;;  %v6291_v53 = vunpack.c.l.bf16 %v4096_v59  ;;  %v6292_v47 = vunpack.c.h.bf16 %v4096_v59  ;;  %v1109_v22 = vadd.f32 %v1101_v57, %v1089_v41 }
  0x6d   : > { %v1110_v46 = vadd.f32 %v1102_v18, %v1090_v15  ;;  %v6293_v13 = vunpack.c.l.bf16 %v4099_v31  ;;  %v6294_v0 = vunpack.c.h.bf16 %v4099_v31  ;;  %v6295_v9 = vunpack.c.l.bf16 %v4129_v60 }
  0x6e   : > { %v1141_v12 = vmul.f32 %v6291_v53, %v3978_v52  ;;  %v1142_v24 = vmul.f32 %v6292_v47, %v3981_v25  ;;  %v6296_v16 = vunpack.c.h.bf16 %v4129_v60  ;;  %v6297_v59 = vunpack.c.l.bf16 %v4140_v61 }
  0x6f   : > { %v1161_v42 = vmul.f32 %v6293_v13, %v3984_v32  ;;  %v1162_v40 = vmul.f32 %v6294_v0, %v3987_v62  ;;  %v1043_v63 = vmul.f32 %v6295_v9, %v3920_v34  ;;  %v6298_v18 = vunpack.c.h.bf16 %v4140_v61 }
  0x70   : > { %v1044_v10 = vmul.f32 %v6296_v16, %v3923_v5  ;;  %v1063_v57 = vmul.f32 %v6297_v59, %v3929_v23  ;;  %v1129_v15 = vadd.f32 %v1121_v4, %v1109_v22  ;;  %v1130_v31 = vadd.f32 %v1122_v50, %v1110_v46 }
  0x71   : > { %v1064_v41 = vmul.f32 %v6298_v18, %v3938_v3  ;;  %v6299_v21 = vunpack.c.l.bf16 %v4148_v26  ;;  %v6300_v47 = vunpack.c.h.bf16 %v4148_v26  ;;  %v6301_v9 = vunpack.c.l.bf16 %v4157_v49 }
  0x72   : > { %v1071_v13 = vadd.f32 %v1063_v57, %v1043_v63  ;;  %v6302_v61 = vunpack.c.h.bf16 %v4157_v49  ;;  %v1168_v50 = vadd.f32 %v1160_v17, %v1148_v2  ;;  %v4316_v22 = vadd.f32 %v1179_v27, %v1167_v7  ;;  %v6307_v27 = vld [vmem:[#allocation31_spill] sm:$0xff] }
  0x73   : > { %v1083_v53 = vmul.f32 %v6299_v21, %v3943_v51  ;;  %v1084_v60 = vmul.f32 %v6300_v47, %v3946_v28  ;;  %v1072_v0 = vadd.f32 %v1064_v41, %v1044_v10  ;;  %v1103_v16 = vmul.f32 %v6301_v9, %v3950_v35  ;;  %v4325_v21 = vld [vmem:[%s3656_s25 + $0x100] sm:$0xff] }
  0x74   : > { %v1104_v4 = vmul.f32 %v6302_v61, %v3953_v48  ;;  %6303 = vst [vmem:[#allocation17_spill] sm:$0xff] %v4316_v22  ;;  %v1149_v46 = vadd.f32 %v1141_v12, %v1129_v15  ;;  %v1150_v59 = vadd.f32 %v1142_v24, %v1130_v31  ;;  %v6304_v63 = vunpack.c.l.bf16 %v4176_v54  ;;  %v4340_v31 = vld [vmem:[%s3656_s25 + $0x110] sm:$0xff] }
  0x75   : > { %v1091_v18 = vadd.f32 %v1083_v53, %v1071_v13  ;;  %v1092_v26 = vadd.f32 %v1084_v60, %v1072_v0  ;;  %v6305_v57 = vunpack.c.h.bf16 %v4176_v54  ;;  %v6306_v49 = vunpack.c.l.bf16 %v4115_v56  ;;  %v4343_v0 = vld [vmem:[%s3656_s25 + $0x120] sm:$0xff] }
  0x76   : > { %v1123_v10 = vmul.f32 %v6304_v63, %v3972_v20  ;;  %v6308_v2 = vunpack.c.h.bf16 %v4115_v56  ;;  %v6309_v12 = vunpack.c.l.bf16 %v4185_v1  ;;  %v6310_v15 = vunpack.c.h.bf16 %v4185_v1 }
  0x77   : > { %v1124_v41 = vmul.f32 %v6305_v57, %v3975_v19  ;;  %v1181_v17 = vmul.f32 %v6306_v49, %v4008_v43  ;;  %v1169_v53 = vadd.f32 %v1161_v42, %v1149_v46  ;;  %v1170_v47 = vadd.f32 %v1162_v40, %v1150_v59  ;;  %v4354_v40 = vld [vmem:[%s3656_s25 + $0x130] sm:$0xff]  ;;  %v6313_v46 = vld [vmem:[#allocation7_spill] sm:$0xff] }
  0x78   : > { %v1182_v7 = vmul.f32 %v6308_v2, %v6307_v27  ;;  %v1143_v24 = vmul.f32 %v6309_v12, %v3978_v52  ;;  %v1144_v54 = vmul.f32 %v6310_v15, %v3981_v25  ;;  %v1111_v60 = vadd.f32 %v1103_v16, %v1091_v18  ;;  %v6314_v18 = vld [vmem:[#allocation8_spill] sm:$0xff]  ;;  %v4370_v15 = vld [vmem:[%s3656_s25 + $0x140] sm:$0xff] }
  0x79   : > { %v1112_v13 = vadd.f32 %v1104_v4, %v1092_v26  ;;  %v6311_v56 = vunpack.c.l.bf16 %v4196_v11  ;;  %v6312_v61 = vunpack.c.h.bf16 %v4196_v11  ;;  %v6050_v1 = vunpack.c.l.bf16 %v4325_v21 }
  0x7a   : > { %v6049_v57 = vunpack.c.h.bf16 %v4325_v21  ;;  %v1131_v49 = vadd.f32 %v1123_v10, %v1111_v60  ;;  %v6054_v16 = vunpack.c.l.bf16 %v4340_v31  ;;  %v6059_v4 = vunpack.c.h.bf16 %v4340_v31  ;;  %v6316_v60 = vld [vmem:[#allocation9_spill] sm:$0xff]  ;;  %v6319_v10 = vld [vmem:[#allocation12_spill] sm:$0xff] }
  0x7b   : > { %v1163_v9 = vmul.f32 %v6311_v56, %v3984_v32  ;;  %v1164_v63 = vmul.f32 %v6312_v61, %v3987_v62  ;;  %v1132_v42 = vadd.f32 %v1124_v41, %v1112_v13  ;;  %v1765_v59 = vmul.f32 %v6050_v1, %v6313_v46  ;;  %v6317_v56 = vld [vmem:[#allocation10_spill] sm:$0xff] }
  0x7c   : > { %v1766_v11 = vmul.f32 %v6049_v57, %v6314_v18  ;;  %v6060_v26 = vunpack.c.l.bf16 %v4343_v0  ;;  %v1151_v41 = vadd.f32 %v1143_v24, %v1131_v49  ;;  %v6315_v2 = vunpack.c.l.bf16 %v4209_v6  ;;  %v6318_v57 = vld [vmem:[#allocation11_spill] sm:$0xff] }
  0x7d   : > { %v1785_v13 = vmul.f32 %v6054_v16, %v6316_v60  ;;  %v1786_v61 = vmul.f32 %v6059_v4, %v6317_v56  ;;  %v6320_v24 = vunpack.c.h.bf16 %v4343_v0  ;;  %v6063_v22 = vunpack.c.h.bf16 %v4354_v40  ;;  %v4387_v16 = vld [vmem:[%s3656_s25 + $0x150] sm:$0xff]  ;;  %v4390_v4 = vld [vmem:[%s3656_s25 + $0x160] sm:$0xff] }
  0x7e   : > { %v1183_v12 = vmul.f32 %v6315_v2, %v4008_v43  ;;  %v1805_v1 = vmul.f32 %v6060_v26, %v6318_v57  ;;  %v6065_v2 = vunpack.c.l.bf16 %v4354_v40  ;;  %v1152_v8 = vadd.f32 %v1144_v54, %v1132_v42 }
  0x7f   : > { %v1806_v49 = vmul.f32 %v6320_v24, %v6319_v10  ;;  %v1171_v33 = vadd.f32 %v1163_v9, %v1151_v41  ;;  %v1793_v43 = vadd.f32 %v1785_v13, %v1765_v59  ;;  %v1794_v62 = vadd.f32 %v1786_v61, %v1766_v11  ;;  %v4409_v13 = vld [vmem:[%s3656_s25 + $0x170] sm:$0xff] }
  0x80   : > { %v1825_v26 = vmul.f32 %v6065_v2, %v3747_v36  ;;  %v1826_v24 = vmul.f32 %v6063_v22, %v3751_v37  ;;  %v6064_v32 = vunpack.c.l.bf16 %v4370_v15  ;;  %v6066_v54 = vunpack.c.h.bf16 %v4370_v15 }
  0x81   : > { %v4401_v9 = vadd.f32 %v4272_v14, %v1168_v50  ;;  %v6322_v42 = vunpack.c.h.bf16 %v4209_v6  ;;  %v1813_v11 = vadd.f32 %v1805_v1, %v1793_v43  ;;  %v1814_v41 = vadd.f32 %v1806_v49, %v1794_v62  ;;  %v4422_v1 = vld [vmem:[%s3656_s25 + $0x108] sm:$0xff]  ;;  %v4433_v14 = vld [vmem:[%s3656_s25 + $0x118] sm:$0xff] }
  0x82   : > { %v1845_v61 = vmul.f32 %v6064_v32, %v3769_v44  ;;  %v1846_v22 = vmul.f32 %v6066_v54, %v3773_v45  ;;  %v6067_v6 = vunpack.c.h.bf16 %v4387_v16  ;;  %v6068_v43 = vunpack.c.l.bf16 %v4390_v4 }
  0x83   : > { %6321 = vst [vmem:[#allocation18_spill] sm:$0xff] %v4401_v9  ;;  %v4406_v59 = vmul.f32 %v6322_v42, %v6307_v27  ;;  %v1833_v50 = vadd.f32 %v1825_v26, %v1813_v11  ;;  %v1834_v42 = vadd.f32 %v1826_v24, %v1814_v41  ;;  %v6069_v62 = vunpack.c.h.bf16 %v4390_v4 }
  0x84   : > { %v4424_v49 = vadd.f32 %v1181_v17, %v1169_v53  ;;  %v4426_v32 = vadd.f32 %v1182_v7, %v1170_v47  ;;  %v4428_v2 = vadd.f32 %v1164_v63, %v1152_v8  ;;  %v4430_v54 = vadd.f32 %v1183_v12, %v1171_v33  ;;  %v4444_v7 = vld [vmem:[%s3656_s25 + $0x128] sm:$0xff] }
  0x85   : > { %v6326_v26 = vunpack.c.l.bf16 %v4387_v16  ;;  %v1866_v11 = vmul.f32 %v6067_v6, %v6263_v29  ;;  %v6073_v17 = vunpack.c.l.bf16 %v4409_v13  ;;  %v6075_v53 = vunpack.c.h.bf16 %v4409_v13  ;;  %v4474_v6 = vld [vmem:[%s3656_s25 + $0x148] sm:$0xff] }
  0x86   : > { %6323 = vst [vmem:[#allocation19_spill] sm:$0xff] %v4424_v49  ;;  %6324 = vst [vmem:[#allocation37_spill] sm:$0xff] %v4426_v32  ;;  %v1853_v8 = vadd.f32 %v1845_v61, %v1833_v50  ;;  %v1854_v33 = vadd.f32 %v1846_v22, %v1834_v42  ;;  %v6070_v47 = vunpack.c.l.bf16 %v4422_v1  ;;  %v6072_v63 = vunpack.c.h.bf16 %v4422_v1 }
  0x87   : > { %6325 = vst [vmem:[#allocation38_spill] sm:$0xff] %v4430_v54  ;;  %v1865_v24 = vmul.f32 %v6326_v26, %v6262_v30  ;;  %v1885_v12 = vmul.f32 %v6068_v43, %v6264_v39  ;;  %v1886_v41 = vmul.f32 %v6069_v62, %v6265_v38  ;;  %v4455_v26 = vld [vmem:[%s3656_s25 + $0x138] sm:$0xff]  ;;  %v1905_v62 = vmul.f32 %v6073_v17, %v6266_v55 }
  0x88   : > { %v1767_v22 = vmul.f32 %v6070_v47, %v6313_v46  ;;  %v1768_v50 = vmul.f32 %v6072_v63, %v6314_v18  ;;  %v1906_v61 = vmul.f32 %v6075_v53, %v6272_v58  ;;  %v6327_v47 = vunpack.c.l.bf16 %v4433_v14  ;;  %v4483_v43 = vld [vmem:[%s3656_s25 + $0x158] sm:$0xff]  ;;  %v4494_v46 = vld [vmem:[%s3656_s25 + $0x168] sm:$0xff] }
  0x89   : > { %v6328_v63 = vunpack.c.h.bf16 %v4433_v14  ;;  %v6329_v17 = vunpack.c.l.bf16 %v4444_v7  ;;  %v6330_v53 = vunpack.c.h.bf16 %v4444_v7  ;;  %v6086_v9 = vunpack.c.l.bf16 %v4455_v26 }
  0x8a   : > { %v1787_v54 = vmul.f32 %v6327_v47, %v6316_v60  ;;  %v6085_v18 = vunpack.c.h.bf16 %v4455_v26  ;;  %v1873_v47 = vadd.f32 %v1865_v24, %v1853_v8  ;;  %v1874_v60 = vadd.f32 %v1866_v11, %v1854_v33 }
  0x8b   : > { %v1788_v42 = vmul.f32 %v6328_v63, %v6317_v56  ;;  %v1807_v32 = vmul.f32 %v6329_v17, %v6318_v57  ;;  %v1808_v49 = vmul.f32 %v6330_v53, %v6319_v10  ;;  %v1827_v56 = vmul.f32 %v6086_v9, %v3747_v36  ;;  %v4505_v57 = vld [vmem:[%s3656_s25 + $0x178] sm:$0xff] }
  0x8c   : > { %v1795_v27 = vadd.f32 %v1787_v54, %v1767_v22  ;;  %v1828_v17 = vmul.f32 %v6085_v18, %v3751_v37  ;;  %v6088_v53 = vunpack.c.l.bf16 %v4474_v6  ;;  %v6087_v10 = vunpack.c.h.bf16 %v4474_v6 }
  0x8d   : > { %v1796_v63 = vadd.f32 %v1788_v42, %v1768_v50  ;;  %v6093_v8 = vunpack.c.l.bf16 %v4483_v43  ;;  %v6092_v54 = vunpack.c.h.bf16 %v4483_v43  ;;  %v6091_v50 = vunpack.c.l.bf16 %v4494_v46 }
  0x8e   : > { %v1815_v24 = vadd.f32 %v1807_v32, %v1795_v27  ;;  %v1847_v33 = vmul.f32 %v6088_v53, %v3769_v44  ;;  %v1848_v22 = vmul.f32 %v6087_v10, %v3773_v45  ;;  %v1903_v53 = vunpack.c.l.bf16 %v4505_v57 }
  0x8f   : > { %v1816_v11 = vadd.f32 %v1808_v49, %v1796_v63  ;;  %v1867_v32 = vmul.f32 %v6093_v8, %v6262_v30  ;;  %v1868_v27 = vmul.f32 %v6092_v54, %v6263_v29  ;;  %v1893_v49 = vadd.f32 %v1885_v12, %v1873_v47 }
  0x90   : > { %v1835_v18 = vadd.f32 %v1827_v56, %v1815_v24  ;;  %v1894_v63 = vadd.f32 %v1886_v41, %v1874_v60  ;;  %v1887_v10 = vmul.f32 %v6091_v50, %v6264_v39  ;;  %v6331_v56 = vunpack.c.l.bf16 %v4325_v21 }
  0x91   : > { %v1836_v9 = vadd.f32 %v1828_v17, %v1816_v11  ;;  %v6332_v24 = vunpack.c.h.bf16 %v4325_v21  ;;  %v6333_v12 = vunpack.c.h.bf16 %v4494_v46  ;;  %v6334_v47 = vunpack.c.l.bf16 %v4340_v31 }
  0x92   : > { %v1855_v45 = vadd.f32 %v1847_v33, %v1835_v18  ;;  %v1769_v17 = vmul.f32 %v6331_v56, %v3920_v34  ;;  %v6335_v18 = vunpack.c.h.bf16 %v4340_v31  ;;  %v6336_v21 = vunpack.c.l.bf16 %v4343_v0 }
  0x93   : > { %v1856_v42 = vadd.f32 %v1848_v22, %v1836_v9  ;;  %v1770_v11 = vmul.f32 %v6332_v24, %v3923_v5  ;;  %v1888_v60 = vmul.f32 %v6333_v12, %v6265_v38  ;;  %v1789_v50 = vmul.f32 %v6334_v47, %v3929_v23 }
  0x94   : > { %v1790_v9 = vmul.f32 %v6335_v18, %v3938_v3  ;;  %v1875_v33 = vadd.f32 %v1867_v32, %v1855_v45  ;;  %v1809_v56 = vmul.f32 %v6336_v21, %v3943_v51  ;;  %v6337_v24 = vunpack.c.h.bf16 %v4343_v0 }
  0x95   : > { %v1876_v22 = vadd.f32 %v1868_v27, %v1856_v42  ;;  %v1797_v54 = vadd.f32 %v1789_v50, %v1769_v17  ;;  %v6338_v41 = vunpack.c.l.bf16 %v4354_v40  ;;  %v6339_v31 = vunpack.c.h.bf16 %v4354_v40 }
  0x96   : > { %v1810_v12 = vmul.f32 %v6337_v24, %v3946_v28  ;;  %v1798_v8 = vadd.f32 %v1790_v9, %v1770_v11  ;;  %v4557_v45 = vadd.f32 %v4406_v59, %v4428_v2  ;;  %v4559_v42 = vadd.f32 %v1905_v62, %v1893_v49 }
  0x97   : > { %v1829_v47 = vmul.f32 %v6338_v41, %v3950_v35  ;;  %v1830_v18 = vmul.f32 %v6339_v31, %v3953_v48  ;;  %v4561_v32 = vadd.f32 %v1906_v61, %v1894_v63  ;;  %v1907_v0 = vmul.f32 %v1903_v53, %v6266_v55 }
  0x98   : > { %6340 = vst [vmem:[#allocation39_spill] sm:$0xff] %v4557_v45  ;;  %6341 = vst [vmem:[#allocation40_spill] sm:$0xff] %v4559_v42  ;;  %v1817_v50 = vadd.f32 %v1809_v56, %v1797_v54  ;;  %v1818_v27 = vadd.f32 %v1810_v12, %v1798_v8  ;;  %v6343_v17 = vunpack.c.l.bf16 %v4370_v15  ;;  %v6344_v40 = vunpack.c.h.bf16 %v4370_v15  ;;  %v6348_v56 = vld [vmem:[#allocation28_spill] sm:$0xff] }
  0x99   : > { %6342 = vst [vmem:[#allocation41_spill] sm:$0xff] %v4561_v32  ;;  %v1895_v2 = vadd.f32 %v1887_v10, %v1875_v33  ;;  %v1896_v59 = vadd.f32 %v1888_v60, %v1876_v22  ;;  %v6345_v62 = vunpack.c.h.bf16 %v4505_v57  ;;  %v6346_v49 = vunpack.c.l.bf16 %v4387_v16 }
  0x9a   : > { %v1849_v11 = vmul.f32 %v6343_v17, %v3972_v20  ;;  %v1850_v41 = vmul.f32 %v6344_v40, %v3975_v19  ;;  %v1837_v54 = vadd.f32 %v1829_v47, %v1817_v50  ;;  %v1838_v8 = vadd.f32 %v1830_v18, %v1818_v27 }
  0x9b   : > { %v1908_v61 = vmul.f32 %v6345_v62, %v6272_v58  ;;  %v1869_v63 = vmul.f32 %v6346_v49, %v3978_v52  ;;  %v6347_v9 = vunpack.c.h.bf16 %v4387_v16  ;;  %v6349_v15 = vunpack.c.l.bf16 %v4390_v4 }
  0x9c   : > { %v6350_v10 = vunpack.c.l.bf16 %v4422_v1  ;;  %v6351_v33 = vunpack.c.h.bf16 %v4422_v1  ;;  %v6352_v12 = vunpack.c.l.bf16 %v4433_v14  ;;  %v6353_v16 = vunpack.c.h.bf16 %v4433_v14 }
  0x9d   : > { %v1870_v21 = vmul.f32 %v6347_v9, %v3981_v25  ;;  %v1889_v24 = vmul.f32 %v6349_v15, %v6348_v56  ;;  %v1857_v18 = vadd.f32 %v1849_v11, %v1837_v54  ;;  %v1858_v50 = vadd.f32 %v1850_v41, %v1838_v8 }
  0x9e   : > { %v1771_v60 = vmul.f32 %v6350_v10, %v3920_v34  ;;  %v1772_v22 = vmul.f32 %v6351_v33, %v3923_v5  ;;  %v1791_v47 = vmul.f32 %v6352_v12, %v3929_v23  ;;  %v1792_v31 = vmul.f32 %v6353_v16, %v3938_v3  ;;  %v6359_v10 = vld [vmem:[#allocation29_spill] sm:$0xff] }
  0x9f   : > { %v6354_v27 = vunpack.c.l.bf16 %v4444_v7  ;;  %v6355_v40 = vunpack.c.h.bf16 %v4444_v7  ;;  %v6356_v9 = vunpack.c.l.bf16 %v4455_v26  ;;  %v6357_v14 = vunpack.c.h.bf16 %v4455_v26 }
  0xa0   : > { %v1799_v62 = vadd.f32 %v1791_v47, %v1771_v60  ;;  %v1800_v49 = vadd.f32 %v1792_v31, %v1772_v22  ;;  %v4608_v41 = vadd.f32 %v1907_v0, %v1895_v2  ;;  %v1877_v54 = vadd.f32 %v1869_v63, %v1857_v18  ;;  %v4620_v31 = vld [vmem:[%s3656_s25 + $0x180] sm:$0xff]  ;;  %v6364_v2 = vld [vmem:[#allocation30_spill] sm:$0xff] }
  0xa1   : > { %v1811_v17 = vmul.f32 %v6354_v27, %v3943_v51  ;;  %v1812_v1 = vmul.f32 %v6355_v40, %v3946_v28  ;;  %v1831_v15 = vmul.f32 %v6356_v9, %v3950_v35  ;;  %v1832_v11 = vmul.f32 %v6357_v14, %v3953_v48 }
  0xa2   : > { %6358 = vst [vmem:[#allocation42_spill] sm:$0xff] %v4608_v41  ;;  %v1878_v8 = vadd.f32 %v1870_v21, %v1858_v50  ;;  %v6360_v33 = vunpack.c.h.bf16 %v4390_v4  ;;  %v6361_v12 = vunpack.c.l.bf16 %v4474_v6  ;;  %v6362_v16 = vunpack.c.h.bf16 %v4474_v6  ;;  %v6366_v21 = vld [vmem:[#allocation31_spill] sm:$0xff]  ;;  %v4636_v6 = vld [vmem:[%s3656_s25 + $0x190] sm:$0xff] }
  0xa3   : > { %v1819_v60 = vadd.f32 %v1811_v17, %v1799_v62  ;;  %v1820_v22 = vadd.f32 %v1812_v1, %v1800_v49  ;;  %v4622_v0 = vadd.f32 %v1908_v61, %v1896_v59  ;;  %v6365_v63 = vunpack.c.l.bf16 %v4409_v13  ;;  %v4642_v49 = vld [vmem:[%s3656_s25 + $0x1a0] sm:$0xff] }
  0xa4   : > { %v1890_v7 = vmul.f32 %v6360_v33, %v6359_v10  ;;  %v1851_v47 = vmul.f32 %v6361_v12, %v3972_v20  ;;  %v1852_v26 = vmul.f32 %v6362_v16, %v3975_v19  ;;  %v6367_v18 = vunpack.c.h.bf16 %v4409_v13 }
  0xa5   : > { %6363 = vst [vmem:[#allocation43_spill] sm:$0xff] %v4622_v0  ;;  %v1909_v4 = vmul.f32 %v6365_v63, %v6364_v2  ;;  %v6368_v27 = vunpack.c.l.bf16 %v4483_v43  ;;  %v1897_v40 = vadd.f32 %v1889_v24, %v1877_v54  ;;  %v1839_v1 = vadd.f32 %v1831_v15, %v1819_v60  ;;  %v6371_v60 = vld [vmem:[#allocation7_spill] sm:$0xff] }
  0xa6   : > { %v4630_v50 = vmul.f32 %v6367_v18, %v6366_v21  ;;  %v1840_v59 = vadd.f32 %v1832_v11, %v1820_v22  ;;  %v6369_v61 = vunpack.c.h.bf16 %v4483_v43  ;;  %v4644_v9 = vadd.f32 %v1890_v7, %v1878_v8  ;;  %v4652_v11 = vld [vmem:[%s3656_s25 + $0x1b0] sm:$0xff]  ;;  %v6372_v7 = vld [vmem:[#allocation8_spill] sm:$0xff] }
  0xa7   : > { %v1871_v17 = vmul.f32 %v6368_v27, %v3978_v52  ;;  %v6370_v13 = vunpack.c.l.bf16 %v4494_v46  ;;  %v6095_v33 = vunpack.c.l.bf16 %v4620_v31  ;;  %v6094_v12 = vunpack.c.h.bf16 %v4620_v31  ;;  %v4673_v27 = vld [vmem:[%s3656_s25 + $0x1c0] sm:$0xff] }
  0xa8   : > { %v1872_v62 = vmul.f32 %v6369_v61, %v3981_v25  ;;  %v1859_v24 = vadd.f32 %v1851_v47, %v1839_v1  ;;  %v1860_v15 = vadd.f32 %v1852_v26, %v1840_v59  ;;  %v6099_v43 = vunpack.c.l.bf16 %v4636_v6  ;;  %6374 = vst [vmem:[#allocation7_spill] sm:$0xff] %v4673_v27  ;;  %v6375_v1 = vld [vmem:[#allocation9_spill] sm:$0xff]  ;;  %v6376_v61 = vld [vmem:[#allocation10_spill] sm:$0xff] }
  0xa9   : > { %v1891_v14 = vmul.f32 %v6370_v13, %v6348_v56  ;;  %v6104_v54 = vunpack.c.h.bf16 %v4636_v6  ;;  %v2493_v8 = vmul.f32 %v6095_v33, %v6371_v60  ;;  %v2494_v22 = vmul.f32 %v6094_v12, %v6372_v7  ;;  %v6377_v12 = vld [vmem:[#allocation11_spill] sm:$0xff] }
  0xaa   : > { %v6105_v16 = vunpack.c.l.bf16 %v4642_v49  ;;  %v6106_v47 = vunpack.c.h.bf16 %v4642_v49  ;;  %v6373_v26 = vunpack.c.h.bf16 %v4494_v46  ;;  %v4670_v18 = vmul.f32 %v1903_v53, %v6364_v2 }
  0xab   : > { %v2513_v59 = vmul.f32 %v6099_v43, %v6375_v1  ;;  %v2514_v13 = vmul.f32 %v6104_v54, %v6376_v61  ;;  %v6110_v53 = vunpack.c.l.bf16 %v4652_v11  ;;  %v6109_v2 = vunpack.c.h.bf16 %v4652_v11  ;;  %v4690_v43 = vld [vmem:[%s3656_s25 + $0x1d0] sm:$0xff]  ;;  %v4693_v54 = vld [vmem:[%s3656_s25 + $0x1e0] sm:$0xff] }
  0xac   : > { %v1892_v63 = vmul.f32 %v6373_v26, %v6359_v10  ;;  %v2533_v46 = vmul.f32 %v6105_v16, %v6377_v12  ;;  %v6378_v26 = vld [vmem:[#allocation12_spill] sm:$0xff]  ;;  %v1879_v10 = vadd.f32 %v1871_v17, %v1859_v24  ;;  %v1880_v56 = vadd.f32 %v1872_v62, %v1860_v15  ;;  %6379 = vst [vmem:[#allocation8_spill] sm:$0xff] %v4690_v43 }
  0xad   : > { %v2534_v33 = vmul.f32 %v6106_v47, %v6378_v26  ;;  %v2521_v25 = vadd.f32 %v2513_v59, %v2493_v8  ;;  %v2522_v52 = vadd.f32 %v2514_v13, %v2494_v22  ;;  %6380 = vst [vmem:[#allocation9_spill] sm:$0xff] %v4693_v54  ;;  %v2553_v16 = vmul.f32 %v6110_v53, %v3747_v36  ;;  %v4711_v59 = vld [vmem:[%s3656_s25 + $0x1f0] sm:$0xff] }
  0xae   : > { %v2554_v47 = vmul.f32 %v6109_v2, %v3751_v37  ;;  %v6112_v19 = vunpack.c.l.bf16 %v4673_v27  ;;  %v6113_v17 = vunpack.c.h.bf16 %v4673_v27  ;;  %v4703_v62 = vadd.f32 %v1909_v4, %v1897_v40  ;;  %6383 = vst [vmem:[#allocation11_spill] sm:$0xff] %v4711_v59  ;;  %v6384_v2 = vld [vmem:[#allocation13_spill] sm:$0xff]  ;;  %v4733_v27 = vld [vmem:[%s3656_s25 + $0x198] sm:$0xff] }
  0xaf   : > { %v6382_v24 = vunpack.c.h.bf16 %v4505_v57  ;;  %v2541_v8 = vadd.f32 %v2533_v46, %v2521_v25  ;;  %v2542_v22 = vadd.f32 %v2534_v33, %v2522_v52  ;;  %v6117_v4 = vunpack.c.l.bf16 %v4690_v43  ;;  %v4724_v33 = vld [vmem:[%s3656_s25 + $0x188] sm:$0xff] }
  0xb0   : > { %6381 = vst [vmem:[#allocation10_spill] sm:$0xff] %v4703_v62  ;;  %v2573_v13 = vmul.f32 %v6112_v19, %v3769_v44  ;;  %v2574_v53 = vmul.f32 %v6113_v17, %v6384_v2  ;;  %v6116_v57 = vunpack.c.h.bf16 %v4690_v43  ;;  %v6118_v25 = vunpack.c.l.bf16 %v4693_v54  ;;  %6385 = vst [vmem:[#allocation12_spill] sm:$0xff] %v4724_v33  ;;  %v4738_v52 = vld [vmem:[%s3656_s25 + $0x1a8] sm:$0xff] }
  0xb1   : > { %v4708_v15 = vmul.f32 %v6382_v24, %v6366_v21  ;;  %v2561_v40 = vadd.f32 %v2553_v16, %v2541_v8  ;;  %v2562_v24 = vadd.f32 %v2554_v47, %v2542_v22  ;;  %v1899_v46 = vadd.f32 %v1891_v14, %v1879_v10  ;;  %v4785_v43 = vld [vmem:[%s3656_s25 + $0x1e8] sm:$0xff] }
  0xb2   : > { %v1900_v21 = vadd.f32 %v1892_v63, %v1880_v56  ;;  %v2593_v19 = vmul.f32 %v6117_v4, %v6262_v30  ;;  %v2594_v17 = vmul.f32 %v6116_v57, %v6263_v29  ;;  %v457_v56 = vpop.xlane.xlu0 %456  ;;  %v2613_v10 = vmul.f32 %v6118_v25, %v6264_v39 }
  0xb3   : > { %v2581_v16 = vadd.f32 %v2573_v13, %v2561_v40  ;;  %v2582_v47 = vadd.f32 %v2574_v53, %v2562_v24  ;;  %v6386_v14 = vunpack.c.h.bf16 %v4693_v54  ;;  %v6120_v57 = vunpack.c.l.bf16 %v4724_v33  ;;  %v4749_v24 = vld [vmem:[%s3656_s25 + $0x1b8] sm:$0xff] }
  0xb4   : > { %v6119_v53 = vunpack.c.h.bf16 %v4724_v33  ;;  %3387 = vrcp.f32 %v457_v56  ;;  %v6129_v4 = vunpack.c.l.bf16 %v4733_v27  ;;  %v6142_v22 = vunpack.c.h.bf16 %v4733_v27  ;;  %v4767_v56 = vld [vmem:[%s3656_s25 + $0x1c8] sm:$0xff] }
  0xb5   : > { %v2614_v63 = vmul.f32 %v6386_v14, %v6265_v38  ;;  %v2601_v13 = vadd.f32 %v2593_v19, %v2581_v16  ;;  %v2602_v40 = vadd.f32 %v2594_v17, %v2582_v47  ;;  %v2495_v25 = vmul.f32 %v6120_v57, %v6371_v60 }
  0xb6   : > { %v2496_v14 = vmul.f32 %v6119_v53, %v6372_v7  ;;  %v6141_v8 = vunpack.c.l.bf16 %v4738_v52  ;;  %v6387_v19 = vunpack.c.l.bf16 %v4711_v59  ;;  %v6388_v16 = vunpack.c.h.bf16 %v4711_v59  ;;  %v4774_v53 = vld [vmem:[%s3656_s25 + $0x1d8] sm:$0xff] }
  0xb7   : > { %v2515_v60 = vmul.f32 %v6129_v4, %v6375_v1  ;;  %v6140_v7 = vunpack.c.h.bf16 %v4738_v52  ;;  %v2516_v57 = vmul.f32 %v6142_v22, %v6376_v61  ;;  %v6132_v33 = vunpack.c.h.bf16 %v4749_v24  ;;  %v6403_v22 = vld [vmem:[#allocation16_spill] sm:$0xff] }
  0xb8   : > { %v2633_v17 = vmul.f32 %v6387_v19, %v6266_v55  ;;  %v2634_v47 = vmul.f32 %v6388_v16, %v6272_v58  ;;  %v2535_v19 = vmul.f32 %v6141_v8, %v6377_v12  ;;  %v6139_v16 = vunpack.c.l.bf16 %v4749_v24 }
  0xb9   : > { %v2621_v59 = vadd.f32 %v2613_v10, %v2601_v13  ;;  %v2622_v54 = vadd.f32 %v2614_v63, %v2602_v40  ;;  %v2523_v1 = vadd.f32 %v2515_v60, %v2495_v25  ;;  %v2536_v4 = vmul.f32 %v6140_v7, %v6378_v26  ;;  %v6402_v7 = vld [vmem:[#allocation15_spill] sm:$0xff] }
  0xba   : > { %v2524_v20 = vadd.f32 %v2516_v57, %v2496_v14  ;;  %v2555_v61 = vmul.f32 %v6139_v16, %v3747_v36  ;;  %v2556_v12 = vmul.f32 %v6132_v33, %v3751_v37  ;;  %v6138_v10 = vunpack.c.l.bf16 %v4767_v56 }
  0xbb   : > { %v2543_v63 = vadd.f32 %v2535_v19, %v2523_v1  ;;  %v6137_v13 = vunpack.c.h.bf16 %v4767_v56  ;;  %v6136_v25 = vunpack.c.l.bf16 %v4774_v53  ;;  %v6135_v40 = vunpack.c.h.bf16 %v4774_v53 }
  0xbc   : > { %v4802_v26 = vadd.f32 %v4630_v50, %v4644_v9  ;;  %v2544_v57 = vadd.f32 %v2536_v4, %v2524_v20  ;;  %v6133_v36 = vunpack.c.l.bf16 %v4785_v43  ;;  %v6134_v14 = vunpack.c.h.bf16 %v4785_v43  ;;  %v4820_v20 = vld [vmem:[%s3656_s25 + $0x1f8] sm:$0xff]  ;;  %s3521_s25 = sshll.u32 %s3583_s24, 4  ;;  %s3522_s25 = int_to_ptr.vmem [resolvable:$false] %s3521_s25 }
  0xbd   : > { %v4807_v37 = vadd.f32 %v4670_v18, %v1899_v46  ;;  %v4810_v60 = vadd.f32 %v4708_v15, %v1900_v21  ;;  %v2563_v19 = vadd.f32 %v2555_v61, %v2543_v63  ;;  %v2575_v1 = vmul.f32 %v6138_v10, %v3769_v44  ;;  %v6395_v46 = vld [vmem:[#allocation23_spill] sm:$0xff]  ;;  %v6397_v61 = vld [vmem:[#allocation33_spill] sm:$0xff]  ;;  %v6401_v10 = vld [vmem:[#allocation14_spill] sm:$0xff]  ;;  %s3523_s26 = scalar_lea.vmem %s3522_s25, 256  ;;  %p3524_p0 = scmp.lt.s32.totalorder %s5913_s16, %s3522_s25 }
  0xbe   : > { %6389 = vst [vmem:[#allocation13_spill] sm:$0xff] %v4802_v26  ;;  %v4815_v33 = vadd.f32 %v2633_v17, %v2621_v59  ;;  %v4817_v50 = vadd.f32 %v2634_v47, %v2622_v54  ;;  %v2576_v9 = vmul.f32 %v6137_v13, %v6384_v2  ;;  %v2595_v21 = vmul.f32 %v6136_v25, %v6262_v30  ;;  %v4828_v18 = vpop.eup %3387  ;;  %v6394_v2 = vld [vmem:[#allocation22_spill] sm:$0xff]  ;;  %v6396_v17 = vld [vmem:[#allocation32_spill] sm:$0xff]  ;;  %p3525_p1 = scmp.lt.s32.totalorder %s3523_s26, %s3517_s23 }
  0xbf   : > { %6390 = vst [vmem:[#allocation44_spill] sm:$0xff] %v4807_v37  ;;  %6391 = vst [vmem:[#allocation45_spill] sm:$0xff] %v4810_v60  ;;  %v2564_v15 = vadd.f32 %v2556_v12, %v2544_v57  ;;  %v2596_v44 = vmul.f32 %v6135_v40, %v6263_v29  ;;  %v2615_v54 = vmul.f32 %v6133_v36, %v6264_v39  ;;  %v6398_v12 = vld [vmem:[#allocation34_spill] sm:$0xff]  ;;  %v6399_v39 = vld [vmem:[#allocation35_spill] sm:$0xff] }
  0xc0   : > { %6392 = vst [vmem:[#allocation46_spill] sm:$0xff] %v4815_v33  ;;  %6393 = vst [vmem:[#allocation47_spill] sm:$0xff] %v4817_v50  ;;  %v2616_v59 = vmul.f32 %v6134_v14, %v6265_v38  ;;  %v461_v4 = vmul.f32 %v4828_v18, %v6394_v2  ;;  %v462_v30 = vmul.f32 %v4828_v18, %v6395_v46  ;;  %v6400_v25 = vld [vmem:[#allocation36_spill] sm:$0xff]  ;;  %v6404_v46 = vld [vmem:[#allocation17_spill] sm:$0xff]  ;;  %p3526_p2 = por %p3525_p1, %p3524_p0 }
  0xc1   : > { %v459_v47 = vmul.f32 %v4828_v18, %v6396_v17  ;;  %v460_v29 = vmul.f32 %v4828_v18, %v6397_v61  ;;  %v463_v63 = vmul.f32 %v4828_v18, %v6398_v12  ;;  %v464_v57 = vmul.f32 %v4828_v18, %v6399_v39  ;;  %v6408_v38 = vld [vmem:[#allocation37_spill] sm:$0xff] }
  0xc2   : > { %v2583_v36 = vadd.f32 %v2575_v1, %v2563_v19  ;;  %v470_v14 = vadd.f32 %v462_v30, %v461_v4  ;;  %v465_v13 = vmul.f32 %v4828_v18, %v6400_v25  ;;  %v466_v16 = vmul.f32 %v4828_v18, %v6401_v10  ;;  %v6406_v4 = vld [vmem:[#allocation18_spill] sm:$0xff]  ;;  %p3527_p3 = pnand %p3526_p2, %p3520_p13 }
  0xc3   : > { %v467_v40 = vadd.f32 %v460_v29, %v459_v47  ;;  %v1193_v8 = vmul.f32 %v4828_v18, %v6402_v7  ;;  %v1194_v12 = vmul.f32 %v4828_v18, %v6403_v22  ;;  %v1195_v39 = vmul.f32 %v4828_v18, %v6404_v46  ;;  %v6407_v47 = vld [vmem:[#allocation19_spill] sm:$0xff]  ;;  %v6409_v25 = vld [vmem:[#allocation38_spill] sm:$0xff] }
  0xc4   : > { %v6405_v19 = vunpack.c.l.bf16 %v4620_v31  ;;  %471 = vadd.xlane.f32.xlu1 %v470_v14  ;;  %v1196_v30 = vmul.f32 %v4828_v18, %v6406_v4  ;;  %v1197_v29 = vmul.f32 %v4828_v18, %v6407_v47  ;;  %v1198_v7 = vmul.f32 %v4828_v18, %v6408_v38 }
  0xc5   : > { %468 = vadd.xlane.f32.xlu0 %v467_v40  ;;  %v473_v10 = vadd.f32 %v464_v57, %v463_v63  ;;  %v1199_v46 = vmul.f32 %v4828_v18, %v6409_v25  ;;  %v1921_v40 = vmul.f32 %v4828_v18, %v4559_v42  ;;  %v476_v14 = vadd.f32 %v466_v16, %v465_v13 }
  0xc6   : > { %v2497_v1 = vmul.f32 %v6405_v19, %v3920_v34  ;;  %v1200_v19 = vmul.f32 %v4828_v18, %v4557_v45  ;;  %v1922_v4 = vmul.f32 %v4828_v18, %v4561_v32  ;;  %v1923_v47 = vmul.f32 %v4828_v18, %v4608_v41 }
  0xc7   : > { %v1924_v22 = vmul.f32 %v4828_v18, %v4622_v0  ;;  %v1201_v63 = vadd.f32 %v1194_v12, %v1193_v8  ;;  %v1925_v57 = vmul.f32 %v4828_v18, %v4703_v62  ;;  %v1926_v45 = vmul.f32 %v4828_v18, %v4802_v26 }
  0xc8   : > { %v6410_v42 = vunpack.c.h.bf16 %v4620_v31  ;;  %474 = vadd.xlane.f32.xlu1 %v473_v10  ;;  %v1204_v13 = vadd.f32 %v1196_v30, %v1195_v39  ;;  %v1207_v32 = vadd.f32 %v1198_v7, %v1197_v29  ;;  %v1210_v25 = vadd.f32 %v1200_v19, %v1199_v46 }
  0xc9   : > { %477 = vadd.xlane.f32.xlu0 %v476_v14  ;;  %v1929_v41 = vadd.f32 %v1922_v4, %v1921_v40  ;;  %v1932_v38 = vadd.f32 %v1924_v22, %v1923_v47  ;;  %v1927_v8 = vmul.f32 %v4828_v18, %v4807_v37  ;;  %v2584_v12 = vadd.f32 %v2576_v9, %v2564_v15 }
  0xca   : > { %v2498_v16 = vmul.f32 %v6410_v42, %v3923_v5  ;;  %v1935_v0 = vadd.f32 %v1926_v45, %v1925_v57  ;;  %v1928_v62 = vmul.f32 %v4828_v18, %v4810_v60  ;;  %v2603_v26 = vadd.f32 %v2595_v21, %v2583_v36 }
  0xcb   : > { %v6411_v31 = vunpack.c.l.bf16 %v4820_v20  ;;  %v2604_v10 = vadd.f32 %v2596_v44, %v2584_v12  ;;  %v6412_v7 = vunpack.c.h.bf16 %v4820_v20  ;;  %v6413_v22 = vunpack.c.l.bf16 %v4636_v6 }
  0xcc   : > { %v6414_v45 = vunpack.c.h.bf16 %v4636_v6  ;;  %1202 = vadd.xlane.f32.xlu1 %v1201_v63  ;;  %v2623_v36 = vadd.f32 %v2615_v54, %v2603_v26  ;;  %v6415_v21 = vunpack.c.l.bf16 %v4642_v49  ;;  %v6416_v15 = vunpack.c.h.bf16 %v4642_v49 }
  0xcd   : > { %v2635_v42 = vmul.f32 %v6411_v31, %v6266_v55  ;;  %v2636_v46 = vmul.f32 %v6412_v7, %v6272_v58  ;;  %v2517_v39 = vmul.f32 %v6413_v22, %v3929_v23  ;;  %1205 = vadd.xlane.f32.xlu0 %v1204_v13  ;;  %v2624_v58 = vadd.f32 %v2616_v59, %v2604_v10  ;;  %v6419_v59 = vld [vmem:[#allocation24_spill] sm:$0xff]  ;;  %v6426_v31 = vld [vmem:[#allocation26_spill] sm:$0xff] }
  0xce   : > { %v2518_v9 = vmul.f32 %v6414_v45, %v3938_v3  ;;  %v2537_v55 = vmul.f32 %v6415_v21, %v3943_v51  ;;  %v2538_v44 = vmul.f32 %v6416_v15, %v3946_v28  ;;  %v6417_v47 = vunpack.c.l.bf16 %v4652_v11  ;;  %v6427_v10 = vld [vmem:[#allocation8_spill] sm:$0xff]  ;;  %v6429_v45 = vld [vmem:[#allocation27_spill] sm:$0xff]  ;;  %v6432_v15 = vld [vmem:[#allocation9_spill] sm:$0xff] }
  0xcf   : > { %v2525_v4 = vadd.f32 %v2517_v39, %v2497_v1  ;;  %v1938_v6 = vadd.f32 %v1928_v62, %v1927_v8  ;;  %v2649_v19 = vmul.f32 %v4828_v18, %v4815_v33  ;;  %v2650_v26 = vmul.f32 %v4828_v18, %v4817_v50  ;;  %v6420_v1 = vld [vmem:[#allocation7_spill] sm:$0xff] }
  0xd0   : > { %v2526_v30 = vadd.f32 %v2518_v9, %v2498_v16  ;;  %v2557_v29 = vmul.f32 %v6417_v47, %v3950_v35  ;;  %v6418_v54 = vunpack.c.h.bf16 %v4652_v11  ;;  %v6421_v63 = vunpack.c.l.bf16 %v6420_v1  ;;  %v6422_v16 = vld [vmem:[#allocation25_spill] sm:$0xff]  ;;  %1208 = vadd.xlane.f32.xlu1 %v1207_v32  ;;  %v6439_v47 = vld [vmem:[#allocation12_spill] sm:$0xff] }
  0xd1   : > { %v2545_v49 = vadd.f32 %v2537_v55, %v2525_v4  ;;  %v6423_v13 = vunpack.c.h.bf16 %v6420_v1  ;;  %1211 = vadd.xlane.f32.xlu0 %v1210_v25  ;;  %v4929_v8 = vadd.f32 %v2635_v42, %v2623_v36  ;;  %v4931_v12 = vadd.f32 %v2636_v46, %v2624_v58  ;;  %v6431_v55 = vld [vmem:[#allocation28_spill] sm:$0xff]  ;;  %v6434_v32 = vld [vmem:[#allocation29_spill] sm:$0xff]  ;;  %v6436_v46 = vld [vmem:[#allocation30_spill] sm:$0xff] }
  0xd2   : > { %v2558_v40 = vmul.f32 %v6418_v54, %v3953_v48  ;;  %v2546_v14 = vadd.f32 %v2538_v44, %v2526_v30  ;;  %v2577_v57 = vmul.f32 %v6421_v63, %v6419_v59  ;;  %v6428_v11 = vunpack.c.l.bf16 %v6427_v10  ;;  %v6437_v36 = vld [vmem:[#allocation11_spill] sm:$0xff] }
  0xd3   : > { %v2578_v62 = vmul.f32 %v6423_v13, %v6422_v16  ;;  %6424 = vst [vmem:[#allocation22_spill] sm:$0xff] %v4929_v8  ;;  %6425 = vst [vmem:[#allocation32_spill] sm:$0xff] %v4931_v12  ;;  %v2565_v22 = vadd.f32 %v2557_v29, %v2545_v49  ;;  %v6430_v9 = vunpack.c.h.bf16 %v6427_v10  ;;  %v6433_v44 = vunpack.c.l.bf16 %v6432_v15  ;;  %v6442_v63 = vld [vmem:[#allocation31_spill] sm:$0xff] }
  0xd4   : > { %v2597_v7 = vmul.f32 %v6428_v11, %v6426_v31  ;;  %v2566_v39 = vadd.f32 %v2558_v40, %v2546_v14  ;;  %v6435_v25 = vunpack.c.h.bf16 %v6432_v15  ;;  %v6438_v58 = vunpack.c.l.bf16 %v6437_v36  ;;  %1930 = vadd.xlane.f32.xlu1 %v1929_v41 }
  0xd5   : > { %v2598_v21 = vmul.f32 %v6430_v9, %v6429_v45  ;;  %v2617_v4 = vmul.f32 %v6433_v44, %v6431_v55  ;;  %v6440_v29 = vunpack.c.l.bf16 %v6439_v47  ;;  %v6441_v40 = vunpack.c.h.bf16 %v6439_v47  ;;  %1933 = vadd.xlane.f32.xlu0 %v1932_v38 }
  0xd6   : > { %v2618_v42 = vmul.f32 %v6435_v25, %v6434_v32  ;;  %v2637_v30 = vmul.f32 %v6438_v58, %v6436_v46  ;;  %v2585_v14 = vadd.f32 %v2577_v57, %v2565_v22  ;;  %v2586_v1 = vadd.f32 %v2578_v62, %v2566_v39 }
  0xd7   : > { %v2499_v54 = vmul.f32 %v6440_v29, %v3920_v34  ;;  %v2500_v49 = vmul.f32 %v6441_v40, %v3923_v5  ;;  %v6443_v13 = vunpack.c.h.bf16 %v6437_v36  ;;  %v6444_v11 = vunpack.c.l.bf16 %v4733_v27 }
  0xd8   : > { %v6445_v15 = vunpack.c.h.bf16 %v4733_v27  ;;  %v6446_v44 = vunpack.c.l.bf16 %v4738_v52  ;;  %v6447_v57 = vunpack.c.h.bf16 %v4738_v52  ;;  %v2605_v22 = vadd.f32 %v2597_v7, %v2585_v14  ;;  %1936 = vadd.xlane.f32.xlu1 %v1935_v0 }
  0xd9   : > { %v2638_v10 = vmul.f32 %v6443_v13, %v6442_v63  ;;  %v2519_v9 = vmul.f32 %v6444_v11, %v3929_v23  ;;  %v2606_v39 = vadd.f32 %v2598_v21, %v2586_v1  ;;  %v6448_v23 = vunpack.c.l.bf16 %v4749_v24  ;;  %1939 = vadd.xlane.f32.xlu0 %v1938_v6 }
  0xda   : > { %v2520_v34 = vmul.f32 %v6445_v15, %v3938_v3  ;;  %v2539_v5 = vmul.f32 %v6446_v44, %v3943_v51  ;;  %v2540_v62 = vmul.f32 %v6447_v57, %v3946_v28  ;;  %v2651_v38 = vmul.f32 %v4828_v18, %v4929_v8 }
  0xdb   : > { %v2527_v25 = vadd.f32 %v2519_v9, %v2499_v54  ;;  %v2559_v41 = vmul.f32 %v6448_v23, %v3950_v35  ;;  %v2652_v3 = vmul.f32 %v4828_v18, %v4931_v12  ;;  %v6449_v51 = vunpack.c.h.bf16 %v4749_v24 }
  0xdc   : > { %v2528_v27 = vadd.f32 %v2520_v34, %v2500_v49  ;;  %v2625_v52 = vadd.f32 %v2617_v4, %v2605_v22  ;;  %v2626_v28 = vadd.f32 %v2618_v42, %v2606_v39  ;;  %v6450_v21 = vunpack.c.l.bf16 %v4767_v56 }
  0xdd   : > { %v2560_v36 = vmul.f32 %v6449_v51, %v3953_v48  ;;  %v2547_v7 = vadd.f32 %v2539_v5, %v2527_v25  ;;  %v6451_v47 = vunpack.c.h.bf16 %v4767_v56  ;;  %v6454_v48 = vunpack.c.l.bf16 %v4774_v53  ;;  %v6462_v25 = vld [vmem:[#allocation21_spill] sm:$0xff] }
  0xde   : > { %v2579_v58 = vmul.f32 %v6450_v21, %v6419_v59  ;;  %v2548_v35 = vadd.f32 %v2540_v62, %v2528_v27  ;;  %v4985_v54 = vadd.f32 %v2637_v30, %v2625_v52  ;;  %v4987_v40 = vadd.f32 %v2638_v10, %v2626_v28 }
  0xdf   : > { %v2580_v29 = vmul.f32 %v6451_v47, %v6422_v16  ;;  %v2567_v24 = vadd.f32 %v2559_v41, %v2547_v7  ;;  %v2599_v4 = vmul.f32 %v6454_v48, %v6426_v31  ;;  %v2657_v42 = vadd.f32 %v2650_v26, %v2649_v19  ;;  %v6463_v41 = vld [vmem:[#allocation20_spill] sm:$0xff] }
  0xe0   : > { %6452 = vst [vmem:[#allocation33_spill] sm:$0xff] %v4985_v54  ;;  %6453 = vst [vmem:[#allocation24_spill] sm:$0xff] %v4987_v40  ;;  %v2660_v49 = vadd.f32 %v2652_v3, %v2651_v38  ;;  %v2568_v14 = vadd.f32 %v2560_v36, %v2548_v35  ;;  %v6455_v0 = vunpack.c.h.bf16 %v4774_v53  ;;  %v2653_v56 = vmul.f32 %v4828_v18, %v4985_v54 }
  0xe1   : > { %v2654_v59 = vmul.f32 %v4828_v18, %v4987_v40  ;;  %v2587_v16 = vadd.f32 %v2579_v58, %v2567_v24  ;;  %v6456_v30 = vunpack.c.l.bf16 %v4785_v43  ;;  %2658 = vadd.xlane.f32.xlu1 %v2657_v42  ;;  %v6457_v26 = vunpack.c.h.bf16 %v4785_v43 }
  0xe2   : > { %v2600_v6 = vmul.f32 %v6455_v0, %v6429_v45  ;;  %2661 = vadd.xlane.f32.xlu0 %v2660_v49  ;;  %v2588_v19 = vadd.f32 %v2580_v29, %v2568_v14  ;;  %v6458_v45 = vunpack.c.l.bf16 %v4820_v20  ;;  %v6459_v9 = vunpack.c.h.bf16 %v4820_v20 }
  0xe3   : > { %v2619_v1 = vmul.f32 %v6456_v30, %v6431_v55  ;;  %v2620_v31 = vmul.f32 %v6457_v26, %v6434_v32  ;;  %v2607_v53 = vadd.f32 %v2599_v4, %v2587_v16  ;;  %v2663_v10 = vadd.f32 %v2654_v59, %v2653_v56 }
  0xe4   : > { %v2639_v13 = vmul.f32 %v6458_v45, %v6436_v46  ;;  %v2608_v11 = vadd.f32 %v2600_v6, %v2588_v19  ;;  %v2640_v15 = vmul.f32 %v6459_v9, %v6442_v63 }
  0xe5   : > { %v2627_v34 = vadd.f32 %v2619_v1, %v2607_v53  ;;  %2664 = vadd.xlane.f32.xlu1 %v2663_v10 }
  0xe6   : > { %v2628_v55 = vadd.f32 %v2620_v31, %v2608_v11 }
  0xe7   : > { %v5011_v44 = vadd.f32 %v2639_v13, %v2627_v34 }
  0xe8   : > { %v5013_v5 = vadd.f32 %v2640_v15, %v2628_v55 }
  0xe9   : > { %6460 = vst [vmem:[#allocation7_spill] sm:$0xff] %v5011_v44  ;;  %v2655_v43 = vmul.f32 %v4828_v18, %v5011_v44 }
  0xea   : > { %6461 = vst [vmem:[#allocation25_spill] sm:$0xff] %v5013_v5  ;;  %v2656_v32 = vmul.f32 %v4828_v18, %v5013_v5 }
  0xec   : > { %v2666_v46 = vadd.f32 %v2656_v32, %v2655_v43 }
  0xee   : > { %2667 = vadd.xlane.f32.xlu0 %v2666_v46 }
 0x151   : > { %v5019_v57 = vpop.xlane.xlu1 %471 }
 0x152   : > { %v5021_v62 = vpop.xlane.xlu0 %468  ;;  %v480_v20 = vmul.f32 %v5019_v57, %v5019_v57 }
 0x153   : > { %v479_v63 = vmul.f32 %v5021_v62, %v5021_v62 }
 0x154   : > { %v497_v23 = vrot.slane %v480_v20, %v6462_v25 }
 0x155   : > { %v5027_v22 = vpop.xlane.xlu1 %474  ;;  %v492_v18 = vrot.slane %v479_v63, %v6463_v41 }
 0x156   : > { %v5029_v39 = vpop.xlane.xlu0 %477  ;;  %v481_v38 = vmul.f32 %v5027_v22, %v5027_v22 }
 0x157   : > { %v482_v3 = vmul.f32 %v5029_v39, %v5029_v39  ;;  %v499_v21 = vsel %vm498_vm0, %v497_v23, %v492_v18 }
 0x158   : > { %v503_v27 = vrot.slane %v481_v38, %v6463_v41 }
 0x159   : > { %v507_v51 = vrot.slane %v482_v3, %v6462_v25  ;;  %v5039_v36 = vpop.xlane.xlu1 %1202 }
 0x15a   : > { %v5041_v52 = vpop.xlane.xlu0 %1205  ;;  %v1213_v28 = vmul.f32 %v5039_v36, %v5039_v36 }
 0x15b   : > { %v1214_v7 = vmul.f32 %v5041_v52, %v5041_v52  ;;  %v508_v58 = vsel %vm498_vm0, %v507_v51, %v503_v27 }
 0x15c   : > { %v510_v35 = vsel %vm509_vm1, %v508_v58, %v499_v21  ;;  %v1224_v48 = vrot.slane %v1213_v28, %v6463_v41 }
 0x15d   : > { %v513_v47 = vsel %vm512_vm2, %v510_v35, 0.0  ;;  %v5051_v29 = vpop.xlane.xlu1 %1208  ;;  %v1228_v4 = vrot.slane %v1214_v7, %v6462_v25 }
 0x15e   : > { %514 = vadd.xlane.f32.xlu1 %v513_v47  ;;  %v5053_v24 = vpop.xlane.xlu0 %1211  ;;  %v1215_v42 = vmul.f32 %v5051_v29, %v5051_v29 }
 0x15f   : > { %v1216_v49 = vmul.f32 %v5053_v24, %v5053_v24  ;;  %v1229_v30 = vsel %vm498_vm0, %v1228_v4, %v1224_v48  ;;  %v3582_v4 = vmov 0  }
 0x160   : > { %v1233_v14 = vrot.slane %v1215_v42, %v6463_v41  ;;  %3386 = vset.pattern.permute.xlu0 %v3582_v4  ;;  %3385 = vset.pattern.permute.xlu1 %v3582_v4 }
 0x161   : > { %v1237_v0 = vrot.slane %v1216_v49, %v6462_v25  ;;  %v5063_v6 = vpop.xlane.xlu1 %1930 }
 0x162   : > { %v5065_v56 = vpop.xlane.xlu0 %1933  ;;  %v1941_v59 = vmul.f32 %v5063_v6, %v5063_v6 }
 0x163   : > { %v1942_v16 = vmul.f32 %v5065_v56, %v5065_v56  ;;  %v1238_v1 = vsel %vm498_vm0, %v1237_v0, %v1233_v14 }
 0x164   : > { %v1239_v19 = vsel %vm509_vm1, %v1238_v1, %v1229_v30  ;;  %v1952_v45 = vrot.slane %v1941_v59, %v6463_v41  ;;  %v6464_v1 = vld [vmem:[#allocation5_spill] sm:$0xff] }
 0x165   : > { %v1241_v26 = vsel %vm512_vm2, %v1239_v19, 0.0  ;;  %v5075_v31 = vpop.xlane.xlu1 %1936  ;;  %v1956_v13 = vrot.slane %v1942_v16, %v6462_v25 }
 0x166   : > { %1242 = vadd.xlane.f32.xlu0 %v1241_v26  ;;  %v5077_v53 = vpop.xlane.xlu0 %1939  ;;  %v1943_v10 = vmul.f32 %v5075_v31, %v5075_v31  ;;  %v6465_v26 = vld [vmem:[#allocation6_spill] sm:$0xff] }
 0x167   : > { %v1944_v11 = vmul.f32 %v5077_v53, %v5077_v53  ;;  %v1957_v55 = vsel %vm498_vm0, %v1956_v13, %v1952_v45 }
 0x168   : > { %v1961_v9 = vrot.slane %v1943_v10, %v6463_v41 }
 0x169   : > { %v1965_v15 = vrot.slane %v1944_v11, %v6462_v25 }
 0x16b   : > { %v1966_v43 = vsel %vm498_vm0, %v1965_v15, %v1961_v9 }
 0x16c   : > { %v1967_v32 = vsel %vm509_vm1, %v1966_v43, %v1957_v55 }
 0x16d   : > { %v1969_v46 = vsel %vm512_vm2, %v1967_v32, 0.0 }
 0x16e   : > { %v5087_v34 = vpop.xlane.xlu1 %2658  ;;  %1970 = vadd.xlane.f32.xlu1 %v1969_v46 }
 0x16f   : > { %v5093_v20 = vpop.xlane.xlu0 %2661  ;;  %v2669_v23 = vmul.f32 %v5087_v34, %v5087_v34 }
 0x170   : > { %v2670_v18 = vmul.f32 %v5093_v20, %v5093_v20 }
 0x171   : > { %v2680_v27 = vrot.slane %v2669_v23, %v6463_v41 }
 0x172   : > { %v5095_v63 = vpop.xlane.xlu1 %2664  ;;  %v2684_v51 = vrot.slane %v2670_v18, %v6462_v25 }
 0x173   : > { %v2671_v38 = vmul.f32 %v5095_v63, %v5095_v63 }
 0x174   : > { %v2685_v58 = vsel %vm498_vm0, %v2684_v51, %v2680_v27 }
 0x175   : > { %v2689_v28 = vrot.slane %v2671_v38, %v6463_v41 }
 0x17b   : > { %v5103_v3 = vpop.xlane.xlu0 %2667 }
 0x17c   : > { %v2672_v7 = vmul.f32 %v5103_v3, %v5103_v3 }
 0x17e   : > { %v2693_v21 = vrot.slane %v2672_v7, %v6462_v25 }
 0x180   : > { %v2694_v35 = vsel %vm498_vm0, %v2693_v21, %v2689_v28 }
 0x181   : > { %v2695_v47 = vsel %vm509_vm1, %v2694_v35, %v2685_v58 }
 0x182   : > { %v2697_v48 = vsel %vm512_vm2, %v2695_v47, 0.0 }
 0x183   : > { %2698 = vadd.xlane.f32.xlu0 %v2697_v48 }
 0x1eb   : > { %v515_v42 = vpop.xlane.xlu1 %514 }
 0x1ec   : > { %v516_v49 = vadd.f32 1.0, %v515_v42 }
 0x1ee   : > { %3389 = vrcp.f32 %v516_v49 }
 0x1ef   : > { %3391 = vrsqrt.f32 %v515_v42 }
 0x1f3   : > { %v1243_v14 = vpop.xlane.xlu0 %1242 }
 0x1f4   : > { %v1244_v0 = vadd.f32 1.0, %v1243_v14 }
 0x1f6   : > { %3393 = vrcp.f32 %v1244_v0 }
 0x1f7   : > { %3395 = vrsqrt.f32 %v1243_v14 }
 0x1f8   : > { %v3390_v59 = vpop.eup %3389 }
 0x1f9   : > { %v518_v16 = vmul.f32 %v3390_v59, %v515_v42  ;;  %v3392_v30 = vpop.eup %3391 }
 0x1fa   : > { %v539_v9 = vrot.slane %v3392_v30, %v6464_v1  ;;  %v543_v18 = vrot.slane %v3392_v30, %v6465_v26 }
 0x1fb   : > { %v523_v19 = vrot.slane %v518_v16, %v6464_v1  ;;  %v527_v45 = vrot.slane %v518_v16, %v6465_v26  ;;  %v1971_v13 = vpop.xlane.xlu1 %1970 }
 0x1fc   : > { %v1972_v10 = vadd.f32 1.0, %v1971_v13 }
 0x1fd   : > { %v530_v11 = vmul.f32 %v523_v19, %v5021_v62  ;;  %v531_v15 = vmul.f32 %v523_v19, %v5019_v57  ;;  %v532_v32 = vmul.f32 %v527_v45, %v5027_v22  ;;  %v533_v62 = vmul.f32 %v527_v45, %v5029_v39 }
 0x1fe   : > { %3397 = vrcp.f32 %v1972_v10 }
 0x1ff   : > { %v546_v55 = vmul.f32 %v539_v9, %v530_v11  ;;  %v547_v43 = vmul.f32 %v539_v9, %v531_v15  ;;  %3399 = vrsqrt.f32 %v1971_v13  ;;  %v548_v27 = vmul.f32 %v543_v18, %v532_v32 }
 0x200   : > { %v3394_v46 = vpop.eup %3393  ;;  %v549_v57 = vmul.f32 %v543_v18, %v533_v62 }
 0x201   : > { %v1246_v23 = vmul.f32 %v3394_v46, %v1243_v14  ;;  %552 = vperm.xlu1 %3385, %v546_v55   ;;  %557 = vperm.xlu0 %3386, %v547_v43   ;;  %v3396_v51 = vpop.eup %3395 }
 0x202   : > { %v1267_v22 = vrot.slane %v3396_v51, %v6464_v1  ;;  %v1271_v16 = vrot.slane %v3396_v51, %v6465_v26 }
 0x203   : > { %v1251_v38 = vrot.slane %v1246_v23, %v6464_v1  ;;  %v1255_v35 = vrot.slane %v1246_v23, %v6465_v26 }
 0x205   : > { %562 = vperm.xlu1 %3385, %v548_v27   ;;  %v1258_v28 = vmul.f32 %v1251_v38, %v5039_v36  ;;  %v1259_v42 = vmul.f32 %v1251_v38, %v5041_v52  ;;  %v1260_v59 = vmul.f32 %v1255_v35, %v5051_v29  ;;  %v1261_v52 = vmul.f32 %v1255_v35, %v5053_v24 }
 0x207   : > { %v1274_v4 = vmul.f32 %v1267_v22, %v1258_v28  ;;  %v1275_v0 = vmul.f32 %v1267_v22, %v1259_v42  ;;  %v1276_v19 = vmul.f32 %v1271_v16, %v1260_v59  ;;  %v1277_v45 = vmul.f32 %v1271_v16, %v1261_v52  ;;  %v6466_v22 = vld [vmem:[#allocation23_spill] sm:$0xff]  ;;  %v6469_v59 = vld [vmem:[#allocation36_spill] sm:$0xff] }
 0x208   : > { %v3398_v7 = vpop.eup %3397 }
 0x209   : > { %v1974_v21 = vmul.f32 %v3398_v7, %v1971_v13  ;;  %567 = vperm.xlu1 %3385, %v549_v57   ;;  %v3400_v58 = vpop.eup %3399 }
 0x20a   : > { %v1999_v36 = vrot.slane %v3400_v58, %v6465_v26  ;;  %v1995_v11 = vrot.slane %v3400_v58, %v6464_v1 }
 0x20b   : > { %v1983_v47 = vrot.slane %v1974_v21, %v6465_v26  ;;  %v1979_v30 = vrot.slane %v1974_v21, %v6464_v1 }
 0x20d   : > { %1280 = vperm.xlu1 %3385, %v1274_v4   ;;  %v1988_v49 = vmul.f32 %v1983_v47, %v5075_v31  ;;  %v1986_v31 = vmul.f32 %v1979_v30, %v5063_v6  ;;  %v1987_v43 = vmul.f32 %v1979_v30, %v5065_v56  ;;  %v1989_v18 = vmul.f32 %v1983_v47, %v5077_v53  ;;  %v6470_v30 = vld [vmem:[#allocation14_spill] sm:$0xff] }
 0x20f   : > { %v2004_v14 = vmul.f32 %v1999_v36, %v1988_v49  ;;  %v2002_v55 = vmul.f32 %v1995_v11, %v1986_v31  ;;  %v2003_v23 = vmul.f32 %v1995_v11, %v1987_v43  ;;  %v2005_v62 = vmul.f32 %v1999_v36, %v1989_v18  ;;  %v6467_v49 = vld [vmem:[#allocation34_spill] sm:$0xff] }
 0x210   : > { %v2699_v48 = vpop.xlane.xlu0 %2698 }
 0x211   : > { %v2700_v39 = vadd.f32 1.0, %v2699_v48  ;;  %2018 = vperm.xlu0 %3386, %v2004_v14   ;;  %1285 = vperm.xlu1 %3385, %v1275_v0   ;;  %v6468_v14 = vld [vmem:[#allocation35_spill] sm:$0xff] }
 0x213   : > { %3401 = vrcp.f32 %v2700_v39 }
 0x214   : > { %3403 = vrsqrt.f32 %v2699_v48 }
 0x215   : > { %1290 = vperm.xlu1 %3385, %v1276_v19  }
 0x219   : > { %1295 = vperm.xlu1 %3385, %v1277_v45  }
 0x21d   : > { %v3402_v13 = vpop.eup %3401  ;;  %2008 = vperm.xlu1 %3385, %v2002_v55  }
 0x21e   : > { %v2702_v10 = vmul.f32 %v3402_v13, %v2699_v48  ;;  %v3404_v29 = vpop.eup %3403 }
 0x21f   : > { %v2723_v24 = vrot.slane %v3404_v29, %v6464_v1  ;;  %v2727_v38 = vrot.slane %v3404_v29, %v6465_v26 }
 0x220   : > { %v2707_v9 = vrot.slane %v2702_v10, %v6464_v1  ;;  %v2711_v15 = vrot.slane %v2702_v10, %v6465_v26 }
 0x221   : > { %2013 = vperm.xlu1 %3385, %v2003_v23  }
 0x222   : > { %v2714_v32 = vmul.f32 %v2707_v9, %v5087_v34  ;;  %v2716_v6 = vmul.f32 %v2711_v15, %v5095_v63  ;;  %v2715_v51 = vmul.f32 %v2707_v9, %v5093_v20  ;;  %v2717_v34 = vmul.f32 %v2711_v15, %v5103_v3 }
 0x224   : > { %v2730_v46 = vmul.f32 %v2723_v24, %v2714_v32  ;;  %v2732_v27 = vmul.f32 %v2727_v38, %v2716_v6  ;;  %v2731_v56 = vmul.f32 %v2723_v24, %v2715_v51  ;;  %v2733_v57 = vmul.f32 %v2727_v38, %v2717_v34  ;;  %v6471_v32 = vld [vmem:[#allocation15_spill] sm:$0xff]  ;;  %v6474_v51 = vld [vmem:[#allocation18_spill] sm:$0xff] }
 0x225   : > { %2023 = vperm.xlu1 %3385, %v2005_v62  }
 0x226   : > { %2736 = vperm.xlu0 %3386, %v2730_v46   ;;  %v6472_v46 = vld [vmem:[#allocation16_spill] sm:$0xff] }
 0x229   : > { %2741 = vperm.xlu1 %3385, %v2731_v56  }
 0x22a   : > { %2746 = vperm.xlu0 %3386, %v2732_v27   ;;  %v6473_v27 = vld [vmem:[#allocation17_spill] sm:$0xff] }
 0x22d   : > { %2751 = vperm.xlu1 %3385, %v2733_v57  }
 0x280   : > { %v553_v63 = vpop.permute.xlu1 %552  ;;  %v558_v28 = vpop.permute.xlu0 %557 }
 0x281   : > { %v570_v53 = vmul.f32 %v553_v63, %v6396_v17  ;;  %v571_v7 = vmul.f32 %v553_v63, %v6397_v61  ;;  %v572_v21 = vmul.f32 %v558_v28, %v6394_v2  ;;  %v573_v58 = vmul.f32 %v558_v28, %v6466_v22 }
 0x283   : > { %v578_v35 = vadd.f32 %v572_v21, %v570_v53  ;;  %v585_v20 = vadd.f32 %v573_v58, %v571_v7 }
 0x284   : > { %v563_v47 = vpop.permute.xlu1 %562 }
 0x285   : > { %v579_v48 = vrot.slane %v578_v35, 4  ;;  %v586_v4 = vrot.slane %v585_v20, 4  ;;  %v574_v36 = vmul.f32 %v563_v47, %v6467_v49  ;;  %v575_v0 = vmul.f32 %v563_v47, %v6468_v14 }
 0x287   : > { %v580_v42 = vadd.f32 %v579_v48, %v578_v35  ;;  %v587_v3 = vadd.f32 %v586_v4, %v585_v20 }
 0x288   : > { %v568_v39 = vpop.permute.xlu1 %567 }
 0x289   : > { %v576_v16 = vmul.f32 %v568_v39, %v6469_v59  ;;  %v577_v19 = vmul.f32 %v568_v39, %v6470_v30  ;;  %v581_v52 = vrot.slane %v580_v42, 2  ;;  %v588_v45 = vrot.slane %v587_v3, 2  ;;  %v6475_v39 = vld [vmem:[#allocation19_spill] sm:$0xff] }
 0x28b   : > { %v592_v31 = vadd.f32 %v576_v16, %v574_v36  ;;  %v599_v13 = vadd.f32 %v577_v19, %v575_v0  ;;  %v582_v9 = vadd.f32 %v581_v52, %v580_v42  ;;  %v589_v15 = vadd.f32 %v588_v45, %v587_v3  ;;  %v6476_v0 = vld [vmem:[#allocation37_spill] sm:$0xff] }
 0x28c   : > { %v1281_v10 = vpop.permute.xlu1 %1280 }
 0x28d   : > { %v593_v11 = vrot.slane %v592_v31, 4  ;;  %v600_v29 = vrot.slane %v599_v13, 4  ;;  %v1298_v24 = vmul.f32 %v1281_v10, %v6471_v32  ;;  %v1299_v6 = vmul.f32 %v1281_v10, %v6472_v46  ;;  %v6479_v10 = vld [vmem:[#allocation38_spill] sm:$0xff] }
 0x28e   : > { %v583_v34 = vrot.slane %v582_v9, 1  ;;  %v590_v57 = vrot.slane %v589_v15, 1 }
 0x28f   : > { %v594_v55 = vadd.f32 %v593_v11, %v592_v31  ;;  %v601_v43 = vadd.f32 %v600_v29, %v599_v13  ;;  %v6480_v29 = vld [vmem:[#allocation39_spill] sm:$0xff] }
 0x290   : > { %v1286_v23 = vpop.permute.xlu1 %1285  ;;  %v5159_v42 = vadd.f32 %v583_v34, %v582_v9  ;;  %v5161_v3 = vadd.f32 %v590_v57, %v589_v15 }
 0x291   : > { %v595_v18 = vrot.slane %v594_v55, 2  ;;  %v602_v38 = vrot.slane %v601_v43, 2  ;;  %v1300_v62 = vmul.f32 %v1286_v23, %v6473_v27  ;;  %v1301_v56 = vmul.f32 %v1286_v23, %v6474_v51 }
 0x293   : > { %v596_v63 = vadd.f32 %v595_v18, %v594_v55  ;;  %v603_v28 = vadd.f32 %v602_v38, %v601_v43  ;;  %v1306_v53 = vadd.f32 %v1300_v62, %v1298_v24  ;;  %v1313_v7 = vadd.f32 %v1301_v56, %v1299_v6  ;;  %v2019_v18 = vpop.permute.xlu0 %2018 }
 0x294   : > { %v1291_v21 = vpop.permute.xlu1 %1290 }
 0x295   : > { %v1307_v58 = vrot.slane %v1306_v53, 4  ;;  %v1314_v35 = vrot.slane %v1313_v7, 4  ;;  %v597_v20 = vrot.slane %v596_v63, 1  ;;  %v604_v47 = vrot.slane %v603_v28, 1 }
 0x296   : > { %v1302_v36 = vmul.f32 %v1291_v21, %v6475_v39  ;;  %v1303_v16 = vmul.f32 %v1291_v21, %v6476_v0 }
 0x297   : > { %v1308_v48 = vadd.f32 %v1307_v58, %v1306_v53  ;;  %v1315_v4 = vadd.f32 %v1314_v35, %v1313_v7  ;;  %v5165_v52 = vadd.f32 %v597_v20, %v596_v63  ;;  %v5167_v45 = vadd.f32 %v604_v47, %v603_v28 }
 0x298   : > { %v1296_v19 = vpop.permute.xlu1 %1295 }
 0x299   : > { %6477 = vst [vmem:[#allocation26_spill] sm:$0xff] %v5165_v52  ;;  %6478 = vst [vmem:[#allocation8_spill] sm:$0xff] %v5167_v45  ;;  %v1309_v31 = vrot.slane %v1308_v48, 2  ;;  %v1316_v13 = vrot.slane %v1315_v4, 2  ;;  %v1304_v11 = vmul.f32 %v1296_v19, %v6479_v10  ;;  %v1305_v55 = vmul.f32 %v1296_v19, %v6480_v29  ;;  %v6483_v19 = vld [vmem:[#allocation42_spill] sm:$0xff] }
 0x29a   : > { %v614_v9 = vsel %vm509_vm1, %v5165_v52, %v5159_v42  ;;  %v615_v15 = vsel %vm509_vm1, %v5167_v45, %v5161_v3 }
 0x29b   : > { %v1320_v43 = vadd.f32 %v1304_v11, %v1302_v36  ;;  %v1327_v24 = vadd.f32 %v1305_v55, %v1303_v16  ;;  %v1310_v6 = vadd.f32 %v1309_v31, %v1308_v48  ;;  %v1317_v23 = vadd.f32 %v1316_v13, %v1315_v4  ;;  %v6481_v48 = vld [vmem:[#allocation40_spill] sm:$0xff]  ;;  %v6482_v36 = vld [vmem:[#allocation41_spill] sm:$0xff]  ;;  %v6484_v13 = vld [vmem:[#allocation43_spill] sm:$0xff] }
 0x29c   : > { %v2009_v38 = vpop.permute.xlu1 %2008  ;;  %v619_v62 = vsel %vm618_vm3, %v614_v9, -inf  ;;  %v620_v56 = vsel %vm618_vm3, %v615_v15, -inf  ;;  %v6485_v55 = vld [vmem:[#allocation10_spill] sm:$0xff]  ;;  %v6486_v15 = vld [vmem:[#allocation13_spill] sm:$0xff] }
 0x29d   : > { %v1321_v34 = vrot.slane %v1320_v43, 4  ;;  %v1328_v57 = vrot.slane %v1327_v24, 4  ;;  %v621_v63 = vmax.f32 %v619_v62, %v620_v56  ;;  %v1311_v58 = vrot.slane %v1310_v6, 1 }
 0x29e   : > { %v1318_v35 = vrot.slane %v1317_v23, 1  ;;  %v2026_v4 = vmul.f32 %v2009_v38, %v6481_v48  ;;  %v2027_v16 = vmul.f32 %v2009_v38, %v6482_v36  ;;  %v2030_v9 = vmul.f32 %v2019_v18, %v6485_v55 }
 0x29f   : > { %v1322_v28 = vadd.f32 %v1321_v34, %v1320_v43  ;;  %v1329_v53 = vadd.f32 %v1328_v57, %v1327_v24  ;;  %622 = vmax.xlane.f32.xlu0 %v621_v63  ;;  %v2031_v43 = vmul.f32 %v2019_v18, %v6486_v15  ;;  %v5185_v26 = vadd.f32 %v1311_v58, %v1310_v6 }
 0x2a0   : > { %v2014_v21 = vpop.permute.xlu1 %2013  ;;  %v5187_v25 = vadd.f32 %v1318_v35, %v1317_v23 }
 0x2a1   : > { %v1323_v20 = vrot.slane %v1322_v28, 2  ;;  %v1330_v47 = vrot.slane %v1329_v53, 2  ;;  %v2028_v31 = vmul.f32 %v2014_v21, %v6483_v19  ;;  %v2029_v11 = vmul.f32 %v2014_v21, %v6484_v13  ;;  %6487 = vst [vmem:[#allocation27_spill] sm:$0xff] %v5185_v26 }
 0x2a2   : > { %6488 = vst [vmem:[#allocation28_spill] sm:$0xff] %v5187_v25 }
 0x2a3   : > { %v1324_v24 = vadd.f32 %v1323_v20, %v1322_v28  ;;  %v1331_v62 = vadd.f32 %v1330_v47, %v1329_v53  ;;  %v2034_v34 = vadd.f32 %v2028_v31, %v2026_v4  ;;  %v2041_v57 = vadd.f32 %v2029_v11, %v2027_v16 }
 0x2a4   : > { %v2024_v63 = vpop.permute.xlu1 %2023 }
 0x2a5   : > { %v2737_v7 = vpop.permute.xlu0 %2736  ;;  %v2032_v21 = vmul.f32 %v2024_v63, %v4807_v37  ;;  %v2033_v55 = vmul.f32 %v2024_v63, %v4810_v60  ;;  %v2035_v0 = vrot.slane %v2034_v34, 4  ;;  %v2042_v18 = vrot.slane %v2041_v57, 4 }
 0x2a6   : > { %v2754_v38 = vmul.f32 %v2737_v7, %v4815_v33  ;;  %v2755_v41 = vmul.f32 %v2737_v7, %v4817_v50  ;;  %v1325_v28 = vrot.slane %v1324_v24, 1  ;;  %v1332_v53 = vrot.slane %v1331_v62, 1 }
 0x2a7   : > { %v2048_v6 = vadd.f32 %v2032_v21, %v2030_v9  ;;  %v2055_v58 = vadd.f32 %v2033_v55, %v2031_v43  ;;  %v2036_v23 = vadd.f32 %v2035_v0, %v2034_v34  ;;  %v2043_v35 = vadd.f32 %v2042_v18, %v2041_v57 }
 0x2a8   : > { %v2742_v4 = vpop.permute.xlu1 %2741  ;;  %v5195_v16 = vadd.f32 %v1325_v28, %v1324_v24  ;;  %v5197_v7 = vadd.f32 %v1332_v53, %v1331_v62 }
 0x2a9   : > { %v2747_v56 = vpop.permute.xlu0 %2746  ;;  %v2049_v31 = vrot.slane %v2048_v6, 4  ;;  %v2056_v11 = vrot.slane %v2055_v58, 4  ;;  %v2756_v63 = vmul.f32 %v2742_v4, %v4929_v8  ;;  %v2757_v15 = vmul.f32 %v2742_v4, %v4931_v12 }
 0x2aa   : > { %v2758_v20 = vmul.f32 %v2747_v56, %v4985_v54  ;;  %v2759_v47 = vmul.f32 %v2747_v56, %v4987_v40  ;;  %6489 = vst [vmem:[#allocation9_spill] sm:$0xff] %v5195_v16  ;;  %6490 = vst [vmem:[#allocation29_spill] sm:$0xff] %v5197_v7  ;;  %v2037_v60 = vrot.slane %v2036_v23, 2  ;;  %v2044_v37 = vrot.slane %v2043_v35, 2 }
 0x2ab   : > { %v1342_v9 = vsel %vm509_vm1, %v5195_v16, %v5185_v26  ;;  %v1343_v0 = vsel %vm509_vm1, %v5197_v7, %v5187_v25  ;;  %v2050_v55 = vadd.f32 %v2049_v31, %v2048_v6  ;;  %v2057_v43 = vadd.f32 %v2056_v11, %v2055_v58 }
 0x2ac   : > { %v2762_v24 = vadd.f32 %v2756_v63, %v2754_v38  ;;  %v2769_v62 = vadd.f32 %v2757_v15, %v2755_v41  ;;  %v2038_v56 = vadd.f32 %v2037_v60, %v2036_v23  ;;  %v2045_v34 = vadd.f32 %v2044_v37, %v2043_v35  ;;  %v2752_v57 = vpop.permute.xlu1 %2751 }
 0x2ad   : > { %v1346_v21 = vsel %vm618_vm3, %v1342_v9, -inf  ;;  %v1347_v18 = vsel %vm618_vm3, %v1343_v0, -inf  ;;  %v2051_v28 = vrot.slane %v2050_v55, 2  ;;  %v2058_v53 = vrot.slane %v2057_v43, 2 }
 0x2ae   : > { %v2763_v4 = vrot.slane %v2762_v24, 4  ;;  %v2770_v40 = vrot.slane %v2769_v62, 4  ;;  %v2760_v54 = vmul.f32 %v2752_v57, %v5011_v44  ;;  %v2761_v39 = vmul.f32 %v2752_v57, %v5013_v5 }
 0x2af   : > { %v1348_v29 = vmax.f32 %v1346_v21, %v1347_v18  ;;  %v2039_v6 = vrot.slane %v2038_v56, 1  ;;  %v2052_v58 = vadd.f32 %v2051_v28, %v2050_v55  ;;  %v2059_v38 = vadd.f32 %v2058_v53, %v2057_v43 }
 0x2b0   : > { %v2764_v41 = vadd.f32 %v2763_v4, %v2762_v24  ;;  %v2771_v60 = vadd.f32 %v2770_v40, %v2769_v62  ;;  %v2776_v37 = vadd.f32 %v2760_v54, %v2758_v20  ;;  %v2783_v15 = vadd.f32 %v2761_v39, %v2759_v47 }
 0x2b1   : > { %1349 = vmax.xlane.f32.xlu1 %v1348_v29  ;;  %v2046_v23 = vrot.slane %v2045_v34, 1  ;;  %v2053_v35 = vrot.slane %v2052_v58, 1  ;;  %v2060_v31 = vrot.slane %v2059_v38, 1  ;;  %v5211_v10 = vadd.f32 %v2039_v6, %v2038_v56 }
 0x2b2   : > { %v2765_v11 = vrot.slane %v2764_v41, 2  ;;  %v2772_v63 = vrot.slane %v2771_v60, 2  ;;  %v2777_v9 = vrot.slane %v2776_v37, 4  ;;  %v2784_v0 = vrot.slane %v2783_v15, 4 }
 0x2b3   : > { %6491 = vst [vmem:[#allocation30_spill] sm:$0xff] %v5211_v10  ;;  %v5213_v44 = vadd.f32 %v2046_v23, %v2045_v34  ;;  %v5215_v57 = vadd.f32 %v2053_v35, %v2052_v58  ;;  %v5217_v55 = vadd.f32 %v2060_v31, %v2059_v38 }
 0x2b4   : > { %v2766_v43 = vadd.f32 %v2765_v11, %v2764_v41  ;;  %v2773_v40 = vadd.f32 %v2772_v63, %v2771_v60  ;;  %v2778_v54 = vadd.f32 %v2777_v9, %v2776_v37  ;;  %v2785_v39 = vadd.f32 %v2784_v0, %v2783_v15 }
 0x2b5   : > { %6492 = vst [vmem:[#allocation11_spill] sm:$0xff] %v5213_v44  ;;  %6493 = vst [vmem:[#allocation12_spill] sm:$0xff] %v5215_v57  ;;  %v2070_v29 = vsel %vm509_vm1, %v5215_v57, %v5211_v10  ;;  %v2071_v20 = vsel %vm509_vm1, %v5217_v55, %v5213_v44 }
 0x2b6   : > { %6494 = vst [vmem:[#allocation31_spill] sm:$0xff] %v5217_v55  ;;  %v2779_v47 = vrot.slane %v2778_v54, 2  ;;  %v2786_v24 = vrot.slane %v2785_v39, 2  ;;  %v2074_v62 = vsel %vm618_vm3, %v2070_v29, -inf  ;;  %v2075_v56 = vsel %vm618_vm3, %v2071_v20, -inf }
 0x2b7   : > { %v2076_v34 = vmax.f32 %v2074_v62, %v2075_v56  ;;  %v2767_v21 = vrot.slane %v2766_v43, 1  ;;  %v2774_v18 = vrot.slane %v2773_v40, 1 }
 0x2b8   : > { %v2780_v28 = vadd.f32 %v2779_v47, %v2778_v54  ;;  %v2787_v53 = vadd.f32 %v2786_v24, %v2785_v39 }
 0x2b9   : > { %2077 = vmax.xlane.f32.xlu0 %v2076_v34  ;;  %v5227_v58 = vadd.f32 %v2767_v21, %v2766_v43  ;;  %v5229_v38 = vadd.f32 %v2774_v18, %v2773_v40 }
 0x2ba   : > { %v2781_v4 = vrot.slane %v2780_v28, 1  ;;  %v2788_v6 = vrot.slane %v2787_v53, 1 }
 0x2bb   : > { %6495 = vst [vmem:[#allocation5_spill] sm:$0xff] %v5227_v58  ;;  %6496 = vst [vmem:[#allocation23_spill] sm:$0xff] %v5229_v38 }
 0x2bc   : > { %v5231_v41 = vadd.f32 %v2781_v4, %v2780_v28  ;;  %v5233_v60 = vadd.f32 %v2788_v6, %v2787_v53 }
 0x2be   : > { %6497 = vst [vmem:[#allocation34_spill] sm:$0xff] %v5231_v41  ;;  %6498 = vst [vmem:[#allocation35_spill] sm:$0xff] %v5233_v60  ;;  %v2798_v37 = vsel %vm509_vm1, %v5231_v41, %v5227_v58  ;;  %v2799_v15 = vsel %vm509_vm1, %v5233_v60, %v5229_v38 }
 0x2bf   : > { %v2802_v23 = vsel %vm618_vm3, %v2798_v37, -inf  ;;  %v2803_v35 = vsel %vm618_vm3, %v2799_v15, -inf }
 0x2c0   : > { %v2804_v31 = vmax.f32 %v2802_v23, %v2803_v35 }
 0x2c2   : > { %2805 = vmax.xlane.f32.xlu0 %v2804_v31 }
 0x32c   : > { %v623_v11 = vpop.xlane.xlu0 %622 }
 0x32d   : > { %v625_v63 = vrot.slane %v623_v11, 1  ;;  %v628_v9 = vsub.f32 %v5159_v42, %v623_v11  ;;  %v629_v0 = vsub.f32 %v5161_v3, %v623_v11 }
 0x32f   : > { %v630_v43 = vsub.f32 %v5165_v52, %v625_v63  ;;  %v631_v40 = vsub.f32 %v5167_v45, %v625_v63  ;;  %v632_v54 = vmul.f32 1.442695, %v628_v9  ;;  %v634_v20 = vmul.f32 1.442695, %v629_v0 }
 0x331   : > { %v636_v39 = vmul.f32 1.442695, %v630_v43  ;;  %v638_v29 = vmul.f32 1.442695, %v631_v40 }
 0x333   : > { %3405 = vpow2.f32 %v636_v39 }
 0x334   : > { %3407 = vpow2.f32 %v638_v29 }
 0x335   : > { %3409 = vpow2.f32 %v632_v54 }
 0x336   : > { %3411 = vpow2.f32 %v634_v20 }
 0x33d   : > { %v5247_v24 = vpop.eup %3405 }
 0x33e   : > { %v1350_v47 = vpop.xlane.xlu1 %1349  ;;  %v5250_v34 = vpop.eup %3407  ;;  %v644_v21 = vrot.slane %v5247_v24, 7 }
 0x33f   : > { %v1352_v62 = vrot.slane %v1350_v47, 1  ;;  %v1355_v56 = vsub.f32 %v5185_v26, %v1350_v47  ;;  %v5253_v18 = vpop.eup %3409  ;;  %v1356_v28 = vsub.f32 %v5187_v25, %v1350_v47  ;;  %v646_v15 = vrot.slane %v5250_v34, 7 }
 0x340   : > { %v645_v37 = vsel %vm509_vm1, %v644_v21, %v5253_v18  ;;  %v5261_v23 = vpop.eup %3411 }
 0x341   : > { %v1357_v53 = vsub.f32 %v5195_v16, %v1352_v62  ;;  %v1358_v4 = vsub.f32 %v5197_v7, %v1352_v62  ;;  %v1359_v6 = vmul.f32 1.442695, %v1355_v56  ;;  %v650_v11 = vsel %vm618_vm3, %v645_v37, 0.0 }
 0x342   : > { %v647_v63 = vsel %vm509_vm1, %v646_v15, %v5261_v23  ;;  %v1361_v9 = vmul.f32 1.442695, %v1356_v28 }
 0x343   : > { %v1363_v35 = vmul.f32 1.442695, %v1357_v53  ;;  %v1365_v31 = vmul.f32 1.442695, %v1358_v4  ;;  %v651_v0 = vsel %vm618_vm3, %v647_v63, 0.0 }
 0x344   : > { %v652_v43 = vadd.f32 %v651_v0, %v650_v11 }
 0x345   : > { %3413 = vpow2.f32 %v1363_v35 }
 0x346   : > { %3415 = vpow2.f32 %v1365_v31  ;;  %v2078_v40 = vpop.xlane.xlu0 %2077  ;;  %653 = vadd.xlane.f32.xlu1 %v652_v43 }
 0x347   : > { %3417 = vpow2.f32 %v1359_v6  ;;  %v2080_v54 = vrot.slane %v2078_v40, 1  ;;  %v2083_v39 = vsub.f32 %v5211_v10, %v2078_v40  ;;  %v2084_v29 = vsub.f32 %v5213_v44, %v2078_v40 }
 0x348   : > { %3419 = vpow2.f32 %v1361_v9 }
 0x349   : > { %v2085_v20 = vsub.f32 %v5215_v57, %v2080_v54  ;;  %v2086_v47 = vsub.f32 %v5217_v55, %v2080_v54  ;;  %v2087_v62 = vmul.f32 1.442695, %v2083_v39  ;;  %v2089_v28 = vmul.f32 1.442695, %v2084_v29 }
 0x34b   : > { %v2091_v56 = vmul.f32 1.442695, %v2085_v20  ;;  %v2093_v21 = vmul.f32 1.442695, %v2086_v47 }
 0x34d   : > { %3421 = vpow2.f32 %v2091_v56 }
 0x34e   : > { %3423 = vpow2.f32 %v2093_v21 }
 0x34f   : > { %v5271_v53 = vpop.eup %3413  ;;  %3425 = vpow2.f32 %v2087_v62  ;;  %v2806_v6 = vpop.xlane.xlu0 %2805 }
 0x350   : > { %v5273_v4 = vpop.eup %3415  ;;  %v1371_v37 = vrot.slane %v5271_v53, 7  ;;  %3427 = vpow2.f32 %v2089_v28  ;;  %v2808_v35 = vrot.slane %v2806_v6, 1  ;;  %v2811_v31 = vsub.f32 %v5227_v58, %v2806_v6 }
 0x351   : > { %v5276_v15 = vpop.eup %3417  ;;  %v1373_v11 = vrot.slane %v5273_v4, 7  ;;  %v2812_v63 = vsub.f32 %v5229_v38, %v2806_v6 }
 0x352   : > { %v1372_v9 = vsel %vm509_vm1, %v1371_v37, %v5276_v15  ;;  %v3420_v0 = vpop.eup %3419  ;;  %v2813_v43 = vsub.f32 %v5231_v41, %v2808_v35  ;;  %v2814_v40 = vsub.f32 %v5233_v60, %v2808_v35  ;;  %v2815_v54 = vmul.f32 1.442695, %v2811_v31 }
 0x353   : > { %v1374_v39 = vsel %vm509_vm1, %v1373_v11, %v3420_v0  ;;  %v1377_v29 = vsel %vm618_vm3, %v1372_v9, 0.0  ;;  %v2817_v56 = vmul.f32 1.442695, %v2812_v63 }
 0x354   : > { %v2819_v20 = vmul.f32 1.442695, %v2813_v43  ;;  %v2821_v47 = vmul.f32 1.442695, %v2814_v40  ;;  %v1378_v62 = vsel %vm618_vm3, %v1374_v39, 0.0 }
 0x355   : > { %v1379_v21 = vadd.f32 %v1378_v62, %v1377_v29 }
 0x356   : > { %3429 = vpow2.f32 %v2819_v20 }
 0x357   : > { %v5288_v28 = vpop.eup %3421  ;;  %3431 = vpow2.f32 %v2821_v47  ;;  %1380 = vadd.xlane.f32.xlu0 %v1379_v21 }
 0x358   : > { %v5290_v6 = vpop.eup %3423  ;;  %3433 = vpow2.f32 %v2815_v54  ;;  %v2099_v37 = vrot.slane %v5288_v28, 7 }
 0x359   : > { %v3426_v35 = vpop.eup %3425  ;;  %3435 = vpow2.f32 %v2817_v56  ;;  %v2101_v31 = vrot.slane %v5290_v6, 7 }
 0x35a   : > { %v3428_v11 = vpop.eup %3427  ;;  %v2100_v9 = vsel %vm509_vm1, %v2099_v37, %v3426_v35 }
 0x35b   : > { %v2102_v63 = vsel %vm509_vm1, %v2101_v31, %v3428_v11  ;;  %v2105_v43 = vsel %vm618_vm3, %v2100_v9, 0.0 }
 0x35c   : > { %v2106_v40 = vsel %vm618_vm3, %v2102_v63, 0.0 }
 0x35d   : > { %v2107_v39 = vadd.f32 %v2106_v40, %v2105_v43 }
 0x35f   : > { %2108 = vadd.xlane.f32.xlu1 %v2107_v39 }
 0x360   : > { %v5298_v29 = vpop.eup %3429 }
 0x361   : > { %v5300_v54 = vpop.eup %3431  ;;  %v2827_v20 = vrot.slane %v5298_v29, 7 }
 0x362   : > { %v5303_v47 = vpop.eup %3433  ;;  %v2829_v62 = vrot.slane %v5300_v54, 7 }
 0x363   : > { %v3436_v56 = vpop.eup %3435  ;;  %v2828_v21 = vsel %vm509_vm1, %v2827_v20, %v5303_v47 }
 0x364   : > { %v2830_v37 = vsel %vm509_vm1, %v2829_v62, %v3436_v56  ;;  %v2833_v31 = vsel %vm618_vm3, %v2828_v21, 0.0 }
 0x365   : > { %v2834_v9 = vsel %vm618_vm3, %v2830_v37, 0.0 }
 0x366   : > { %v2835_v63 = vadd.f32 %v2834_v9, %v2833_v31 }
 0x368   : > { %2836 = vadd.xlane.f32.xlu0 %v2835_v63 }
 0x3d3   : > { %v654_v43 = vpop.xlane.xlu1 %653 }
 0x3d4   : > { %3437 = vrcp.f32 %v654_v43 }
 0x3de   : > { %v3438_v40 = vpop.eup %3437 }
 0x3df   : > { %v660_v39 = vmul.f32 %v3438_v40, %v5253_v18  ;;  %v661_v60 = vmul.f32 %v3438_v40, %v5261_v23 }
 0x3e1   : > { %v667_v38 = vrot.slane %v660_v39, %v6464_v1  ;;  %v671_v41 = vrot.slane %v661_v60, %v6464_v1 }
 0x3e3   : > { %v680_v62 = vmul.f32 %v667_v38, %v6396_v17  ;;  %v681_v21 = vmul.f32 %v671_v41, %v6397_v61  ;;  %v682_v37 = vmul.f32 %v667_v38, %v6394_v2  ;;  %v683_v31 = vmul.f32 %v671_v41, %v6466_v22 }
 0x3e4   : > { %v1381_v20 = vpop.xlane.xlu0 %1380 }
 0x3e5   : > { %3439 = vrcp.f32 %v1381_v20  ;;  %v688_v9 = vadd.f32 %v681_v21, %v680_v62  ;;  %v691_v63 = vadd.f32 %v683_v31, %v682_v37 }
 0x3e7   : > { %689 = vadd.xlane.f32.xlu1 %v688_v9  ;;  %692 = vadd.xlane.f32.xlu0 %v691_v63  ;;  %v657_v9 = vrot.slane %v3438_v40, 1 }
 0x3ec   : > { %v2109_v18 = vpop.xlane.xlu1 %2108 }
 0x3ed   : > { %3441 = vrcp.f32 %v2109_v18 }
 0x3ef   : > { %v3440_v23 = vpop.eup %3439 }
 0x3f0   : > { %v1387_v43 = vmul.f32 %v3440_v23, %v5276_v15  ;;  %v1388_v60 = vmul.f32 %v3440_v23, %v3420_v0 }
 0x3f2   : > { %v1394_v39 = vrot.slane %v1387_v43, %v6464_v1  ;;  %v1398_v58 = vrot.slane %v1388_v60, %v6464_v1  ;;  %v662_v43 = vmul.f32 %v5247_v24, %v657_v9  ;;  %v663_v60 = vmul.f32 %v5250_v34, %v657_v9 }
 0x3f4   : > { %v1409_v55 = vmul.f32 %v1394_v39, %v6473_v27  ;;  %v1410_v38 = vmul.f32 %v1398_v58, %v6474_v51  ;;  %v1407_v41 = vmul.f32 %v1394_v39, %v6471_v32  ;;  %v1408_v20 = vmul.f32 %v1398_v58, %v6472_v46 }
 0x3f5   : > { %v2837_v62 = vpop.xlane.xlu0 %2836  ;;  %v679_v24 = vrot.slane %v663_v60, %v6464_v1 }
 0x3f6   : > { %v1418_v21 = vadd.f32 %v1410_v38, %v1409_v55  ;;  %v1415_v37 = vadd.f32 %v1408_v20, %v1407_v41  ;;  %3443 = vrcp.f32 %v2837_v62  ;;  %v675_v20 = vrot.slane %v662_v43, %v6464_v1 }
 0x3f7   : > { %v3442_v31 = vpop.eup %3441  ;;  %v685_v43 = vmul.f32 %v679_v24, %v6468_v14 }
 0x3f8   : > { %1419 = vadd.xlane.f32.xlu0 %v1418_v21  ;;  %1416 = vadd.xlane.f32.xlu1 %v1415_v37  ;;  %v2115_v15 = vmul.f32 %v3442_v31, %v3426_v35  ;;  %v2116_v0 = vmul.f32 %v3442_v31, %v3428_v11  ;;  %v1384_v35 = vrot.slane %v3440_v23, 1  ;;  %v2112_v9 = vrot.slane %v3442_v31, 1 }
 0x3f9   : > { %v686_v23 = vmul.f32 %v675_v20, %v6469_v59 }
 0x3fa   : > { %v2122_v63 = vrot.slane %v2115_v15, %v6464_v1  ;;  %v2126_v18 = vrot.slane %v2116_v0, %v6464_v1  ;;  %v1389_v21 = vmul.f32 %v5271_v53, %v1384_v35  ;;  %v1390_v37 = vmul.f32 %v5273_v4, %v1384_v35 }
 0x3fc   : > { %v2137_v58 = vmul.f32 %v2122_v63, %v6483_v19  ;;  %v2138_v55 = vmul.f32 %v2126_v18, %v6484_v13  ;;  %v2135_v39 = vmul.f32 %v2122_v63, %v6481_v48  ;;  %v2136_v40 = vmul.f32 %v2126_v18, %v6482_v36 }
 0x3fd   : > { %v687_v63 = vmul.f32 %v679_v24, %v6470_v30  ;;  %v684_v18 = vmul.f32 %v675_v20, %v6467_v49  ;;  %v1402_v31 = vrot.slane %v1389_v21, %v6464_v1  ;;  %v1406_v60 = vrot.slane %v1390_v37, %v6464_v1  ;;  %v6499_v20 = vld [vmem:[#allocation38_spill] sm:$0xff]  ;;  %v6501_v37 = vld [vmem:[#allocation19_spill] sm:$0xff] }
 0x3fe   : > { %v2146_v38 = vadd.f32 %v2138_v55, %v2137_v58  ;;  %v2143_v41 = vadd.f32 %v2136_v40, %v2135_v39  ;;  %v2117_v58 = vmul.f32 %v5288_v28, %v2112_v9  ;;  %v2118_v55 = vmul.f32 %v5290_v6, %v2112_v9  ;;  %v6502_v28 = vld [vmem:[#allocation37_spill] sm:$0xff]  ;;  %v6503_v9 = vld [vmem:[#allocation44_spill] sm:$0xff] }
 0x3ff   : > { %v694_v35 = vadd.f32 %v685_v43, %v684_v18  ;;  %v1413_v24 = vmul.f32 %v1402_v31, %v6499_v20  ;;  %v1412_v44 = vmul.f32 %v1406_v60, %v6502_v28  ;;  %v6505_v43 = vld [vmem:[#allocation10_spill] sm:$0xff] }
 0x400   : > { %v3444_v11 = vpop.eup %3443  ;;  %2147 = vadd.xlane.f32.xlu0 %v2146_v38  ;;  %2144 = vadd.xlane.f32.xlu1 %v2143_v41  ;;  %v697_v41 = vadd.f32 %v687_v63, %v686_v23  ;;  %v2134_v21 = vrot.slane %v2118_v55, %v6464_v1  ;;  %v6504_v63 = vld [vmem:[#allocation45_spill] sm:$0xff]  ;;  %v6507_v55 = vld [vmem:[#allocation7_spill] sm:$0xff] }
 0x401   : > { %v2843_v34 = vmul.f32 %v3444_v11, %v5303_v47  ;;  %v2844_v62 = vmul.f32 %v3444_v11, %v3436_v56  ;;  %v2840_v38 = vrot.slane %v3444_v11, 1 }
 0x402   : > { %v2142_v18 = vmul.f32 %v2134_v21, %v6504_v63 }
 0x403   : > { %v2850_v15 = vrot.slane %v2843_v34, %v6464_v1  ;;  %v2854_v0 = vrot.slane %v2844_v62, %v6464_v1  ;;  %v6500_v34 = vld [vmem:[#allocation39_spill] sm:$0xff]  ;;  %v2845_v6 = vmul.f32 %v5298_v29, %v2840_v38  ;;  %v2846_v11 = vmul.f32 %v5300_v54, %v2840_v38  ;;  %v6508_v38 = vld [vmem:[#allocation33_spill] sm:$0xff] }
 0x404   : > { %v1414_v62 = vmul.f32 %v1406_v60, %v6500_v34 }
 0x405   : > { %v2865_v47 = vmul.f32 %v2850_v15, %v4929_v8  ;;  %v2866_v56 = vmul.f32 %v2854_v0, %v4931_v12  ;;  %v2863_v53 = vmul.f32 %v2850_v15, %v4815_v33  ;;  %v2864_v4 = vmul.f32 %v2854_v0, %v4817_v50 }
 0x406   : > { %v2130_v15 = vrot.slane %v2117_v58, %v6464_v1  ;;  %v1411_v0 = vmul.f32 %v1402_v31, %v6501_v37  ;;  %v2858_v31 = vrot.slane %v2845_v6, %v6464_v1  ;;  %v2862_v60 = vrot.slane %v2846_v11, %v6464_v1 }
 0x407   : > { %v2874_v39 = vadd.f32 %v2866_v56, %v2865_v47  ;;  %v2871_v40 = vadd.f32 %v2864_v4, %v2863_v53  ;;  %v6506_v56 = vld [vmem:[#allocation13_spill] sm:$0xff]  ;;  %v1424_v4 = vadd.f32 %v1414_v62, %v1413_v24 }
 0x408   : > { %v2141_v23 = vmul.f32 %v2130_v15, %v6503_v9  ;;  %v2139_v47 = vmul.f32 %v2130_v15, %v6505_v43  ;;  %v2140_v53 = vmul.f32 %v2134_v21, %v6506_v56  ;;  %v1421_v58 = vadd.f32 %v1412_v44, %v1411_v0 }
 0x409   : > { %2875 = vadd.xlane.f32.xlu0 %v2874_v39  ;;  %2872 = vadd.xlane.f32.xlu1 %v2871_v40  ;;  %v2869_v39 = vmul.f32 %v2858_v31, %v6507_v55  ;;  %v2870_v40 = vmul.f32 %v2862_v60, %v5013_v5 }
 0x40a   : > { %v2152_v29 = vadd.f32 %v2142_v18, %v2141_v23  ;;  %v2149_v54 = vadd.f32 %v2140_v53, %v2139_v47 }
 0x40b   : > { %v2880_v24 = vadd.f32 %v2870_v40, %v2869_v39  ;;  %v6511_v40 = vld [vmem:[#allocation21_spill] sm:$0xff] }
 0x40d   : > { %698 = vadd.xlane.f32.xlu0 %v697_v41  ;;  %695 = vadd.xlane.f32.xlu1 %v694_v35  ;;  %v2867_v41 = vmul.f32 %v2858_v31, %v6508_v38  ;;  %v6509_v35 = vld [vmem:[#allocation24_spill] sm:$0xff] }
 0x40e   : > { %v2868_v15 = vmul.f32 %v2862_v60, %v6509_v35 }
 0x410   : > { %v2877_v44 = vadd.f32 %v2868_v15, %v2867_v41 }
 0x411   : > { %1425 = vadd.xlane.f32.xlu0 %v1424_v4  ;;  %1422 = vadd.xlane.f32.xlu1 %v1421_v58 }
 0x415   : > { %2153 = vadd.xlane.f32.xlu0 %v2152_v29  ;;  %2150 = vadd.xlane.f32.xlu1 %v2149_v54  ;;  %v6510_v54 = vld [vmem:[#allocation20_spill] sm:$0xff] }
 0x419   : > { %2881 = vadd.xlane.f32.xlu0 %v2880_v24  ;;  %2878 = vadd.xlane.f32.xlu1 %v2877_v44 }
 0x474   : > { %v5371_v62 = vpop.xlane.xlu1 %689  ;;  %v5373_v21 = vpop.xlane.xlu0 %692 }
 0x475   : > { %v700_v53 = vmul.f32 %v5371_v62, %v5371_v62  ;;  %v701_v4 = vmul.f32 %v5373_v21, %v5373_v21 }
 0x477   : > { %v711_v39 = vrot.slane %v700_v53, %v6510_v54  ;;  %v715_v41 = vrot.slane %v701_v4, %v6511_v40 }
 0x485   : > { %v5375_v0 = vpop.xlane.xlu1 %1416  ;;  %v5377_v6 = vpop.xlane.xlu0 %1419 }
 0x486   : > { %v1427_v58 = vmul.f32 %v5375_v0, %v5375_v0  ;;  %v1428_v31 = vmul.f32 %v5377_v6, %v5377_v6 }
 0x488   : > { %v1438_v10 = vrot.slane %v1427_v58, %v6510_v54  ;;  %v1442_v7 = vrot.slane %v1428_v31, %v6511_v40  ;;  %v716_v58 = vsel %vm498_vm0, %v715_v41, %v711_v39 }
 0x48d   : > { %v5379_v11 = vpop.xlane.xlu1 %2144  ;;  %v5381_v23 = vpop.xlane.xlu0 %2147 }
 0x48e   : > { %v2155_v25 = vmul.f32 %v5379_v11, %v5379_v11  ;;  %v2156_v53 = vmul.f32 %v5381_v23, %v5381_v23 }
 0x490   : > { %v2166_v52 = vrot.slane %v2155_v25, %v6510_v54  ;;  %v2170_v12 = vrot.slane %v2156_v53, %v6511_v40 }
 0x496   : > { %v5383_v18 = vpop.xlane.xlu1 %2872  ;;  %v5385_v47 = vpop.xlane.xlu0 %2875 }
 0x497   : > { %v2883_v8 = vmul.f32 %v5383_v18, %v5383_v18 }
 0x49a   : > { %v5395_v60 = vpop.xlane.xlu1 %695  ;;  %v5397_v29 = vpop.xlane.xlu0 %698 }
 0x49b   : > { %v702_v15 = vmul.f32 %v5395_v60, %v5395_v60  ;;  %v703_v24 = vmul.f32 %v5397_v29, %v5397_v29 }
 0x49d   : > { %v720_v44 = vrot.slane %v702_v15, %v6510_v54  ;;  %v724_v57 = vrot.slane %v703_v24, %v6511_v40 }
 0x49e   : > { %v5413_v4 = vpop.xlane.xlu1 %1422  ;;  %v5415_v16 = vpop.xlane.xlu0 %1425 }
 0x49f   : > { %v1429_v26 = vmul.f32 %v5413_v4, %v5413_v4  ;;  %v1430_v15 = vmul.f32 %v5415_v16, %v5415_v16  ;;  %v725_v31 = vsel %vm498_vm0, %v724_v57, %v720_v44  ;;  %v1443_v57 = vsel %vm498_vm0, %v1442_v7, %v1438_v10 }
 0x4a0   : > { %v726_v24 = vsel %vm509_vm1, %v725_v31, %v716_v58  ;;  %v2894_v10 = vrot.slane %v2883_v8, %v6510_v54 }
 0x4a1   : > { %v1447_v5 = vrot.slane %v1429_v26, %v6510_v54  ;;  %v1451_v55 = vrot.slane %v1430_v15, %v6511_v40  ;;  %v728_v45 = vsel %vm512_vm2, %v726_v24, 0.0  ;;  %v2884_v26 = vmul.f32 %v5385_v47, %v5385_v47 }
 0x4a2   : > { %v5431_v35 = vpop.xlane.xlu1 %2150  ;;  %729 = vadd.xlane.f32.xlu1 %v728_v45  ;;  %v5433_v39 = vpop.xlane.xlu0 %2153  ;;  %v2171_v24 = vsel %vm498_vm0, %v2170_v12, %v2166_v52 }
 0x4a3   : > { %v2157_v41 = vmul.f32 %v5431_v35, %v5431_v35  ;;  %v2158_v25 = vmul.f32 %v5433_v39, %v5433_v39  ;;  %v1452_v44 = vsel %vm498_vm0, %v1451_v55, %v1447_v5  ;;  %v2898_v38 = vrot.slane %v2884_v26, %v6511_v40 }
 0x4a4   : > { %v1453_v53 = vsel %vm509_vm1, %v1452_v44, %v1443_v57 }
 0x4a5   : > { %v2175_v15 = vrot.slane %v2157_v41, %v6510_v54  ;;  %v2179_v45 = vrot.slane %v2158_v25, %v6511_v40  ;;  %v1455_v58 = vsel %vm512_vm2, %v1453_v53, 0.0  ;;  %v2899_v12 = vsel %vm498_vm0, %v2898_v38, %v2894_v10 }
 0x4a6   : > { %v5448_v7 = vpop.xlane.xlu1 %2878  ;;  %1456 = vadd.xlane.f32.xlu0 %v1455_v58  ;;  %v5450_v31 = vpop.xlane.xlu0 %2881 }
 0x4a7   : > { %v2885_v5 = vmul.f32 %v5448_v7, %v5448_v7  ;;  %v2886_v55 = vmul.f32 %v5450_v31, %v5450_v31  ;;  %v2180_v57 = vsel %vm498_vm0, %v2179_v45, %v2175_v15 }
 0x4a8   : > { %v2181_v41 = vsel %vm509_vm1, %v2180_v57, %v2171_v24 }
 0x4a9   : > { %v2903_v8 = vrot.slane %v2885_v5, %v6510_v54  ;;  %v2907_v25 = vrot.slane %v2886_v55, %v6511_v40  ;;  %v2183_v44 = vsel %vm512_vm2, %v2181_v41, 0.0 }
 0x4aa   : > { %2184 = vadd.xlane.f32.xlu1 %v2183_v44  ;;  %v6512_v44 = vld [vmem:[#allocation6_spill] sm:$0xff] }
 0x4ab   : > { %v2908_v52 = vsel %vm498_vm0, %v2907_v25, %v2903_v8 }
 0x4ac   : > { %v2909_v26 = vsel %vm509_vm1, %v2908_v52, %v2899_v12 }
 0x4ad   : > { %v2911_v53 = vsel %vm512_vm2, %v2909_v26, 0.0 }
 0x4ae   : > { %2912 = vadd.xlane.f32.xlu0 %v2911_v53 }
 0x52f   : > { %v730_v58 = vpop.xlane.xlu1 %729 }
 0x530   : > { %v731_v15 = vadd.f32 1.0, %v730_v58 }
 0x532   : > { %3445 = vrcp.f32 %v731_v15 }
 0x533   : > { %v1457_v45 = vpop.xlane.xlu0 %1456  ;;  %3447 = vrsqrt.f32 %v730_v58 }
 0x534   : > { %v1458_v24 = vadd.f32 1.0, %v1457_v45 }
 0x536   : > { %3449 = vrcp.f32 %v1458_v24 }
 0x537   : > { %v2185_v5 = vpop.xlane.xlu1 %2184  ;;  %3451 = vrsqrt.f32 %v1457_v45 }
 0x538   : > { %v2186_v55 = vadd.f32 1.0, %v2185_v5 }
 0x53a   : > { %3453 = vrcp.f32 %v2186_v55 }
 0x53b   : > { %v2913_v57 = vpop.xlane.xlu0 %2912 }
 0x53c   : > { %v3446_v38 = vpop.eup %3445  ;;  %v2914_v10 = vadd.f32 1.0, %v2913_v57 }
 0x53d   : > { %v733_v41 = vmul.f32 %v3446_v38, %v730_v58  ;;  %v3448_v8 = vpop.eup %3447 }
 0x53e   : > { %3455 = vrcp.f32 %v2914_v10  ;;  %v754_v15 = vrot.slane %v3448_v8, %v6464_v1 }
 0x53f   : > { %v738_v25 = vrot.slane %v733_v41, %v6464_v1  ;;  %v742_v12 = vrot.slane %v733_v41, %v6512_v44  ;;  %3457 = vrsqrt.f32 %v2185_v5  ;;  %v758_v41 = vrot.slane %v3448_v8, %v6512_v44 }
 0x540   : > { %v3450_v52 = vpop.eup %3449  ;;  %3459 = vrsqrt.f32 %v2913_v57 }
 0x541   : > { %v1460_v26 = vmul.f32 %v3450_v52, %v1457_v45  ;;  %v745_v53 = vmul.f32 %v738_v25, %v5371_v62  ;;  %v746_v24 = vmul.f32 %v738_v25, %v5373_v21  ;;  %v3452_v55 = vpop.eup %3451  ;;  %v747_v54 = vmul.f32 %v742_v12, %v5395_v60 }
 0x542   : > { %v1481_v45 = vrot.slane %v3452_v55, %v6464_v1  ;;  %v748_v21 = vmul.f32 %v742_v12, %v5397_v29 }
 0x543   : > { %v1465_v58 = vrot.slane %v1460_v26, %v6464_v1  ;;  %v1469_v38 = vrot.slane %v1460_v26, %v6512_v44  ;;  %v761_v10 = vmul.f32 %v754_v15, %v745_v53  ;;  %v762_v40 = vmul.f32 %v754_v15, %v746_v24 }
 0x544   : > { %v3454_v50 = vpop.eup %3453  ;;  %v763_v25 = vmul.f32 %v758_v41, %v747_v54 }
 0x545   : > { %v2188_v33 = vmul.f32 %v3454_v50, %v2185_v5  ;;  %767 = vperm.xlu1 %3385, %v761_v10   ;;  %772 = vperm.xlu0 %3386, %v762_v40   ;;  %v1472_v62 = vmul.f32 %v1465_v58, %v5375_v0  ;;  %v1474_v26 = vmul.f32 %v1469_v38, %v5413_v4 }
 0x546   : > { %v1485_v50 = vrot.slane %v3452_v55, %v6512_v44  ;;  %v764_v40 = vmul.f32 %v758_v41, %v748_v21  ;;  %v1473_v0 = vmul.f32 %v1465_v58, %v5377_v6  ;;  %v1475_v4 = vmul.f32 %v1469_v38, %v5415_v16 }
 0x547   : > { %v2193_v60 = vrot.slane %v2188_v33, %v6464_v1  ;;  %v1488_v52 = vmul.f32 %v1481_v45, %v1472_v62  ;;  %v2197_v8 = vrot.slane %v2188_v33, %v6512_v44 }
 0x548   : > { %v3456_v53 = vpop.eup %3455  ;;  %v1490_v29 = vmul.f32 %v1485_v50, %v1474_v26  ;;  %v1489_v10 = vmul.f32 %v1481_v45, %v1473_v0 }
 0x549   : > { %777 = vperm.xlu1 %3385, %v763_v25   ;;  %1494 = vperm.xlu0 %3386, %v1488_v52   ;;  %v3458_v5 = vpop.eup %3457  ;;  %v2916_v15 = vmul.f32 %v3456_v53, %v2913_v57  ;;  %v2200_v12 = vmul.f32 %v2193_v60, %v5379_v11  ;;  %v2202_v41 = vmul.f32 %v2197_v8, %v5431_v35 }
 0x54a   : > { %v2209_v54 = vrot.slane %v3458_v5, %v6464_v1  ;;  %v2213_v33 = vrot.slane %v3458_v5, %v6512_v44  ;;  %v3460_v6 = vpop.eup %3459  ;;  %v1491_v57 = vmul.f32 %v1485_v50, %v1475_v4  ;;  %v2201_v62 = vmul.f32 %v2193_v60, %v5381_v23 }
 0x54b   : > { %v2921_v24 = vrot.slane %v2916_v15, %v6464_v1  ;;  %v2925_v11 = vrot.slane %v2916_v15, %v6512_v44  ;;  %v2937_v16 = vrot.slane %v3460_v6, %v6464_v1  ;;  %v2203_v35 = vmul.f32 %v2197_v8, %v5433_v39 }
 0x54c   : > { %v2216_v55 = vmul.f32 %v2209_v54, %v2200_v12  ;;  %v2218_v58 = vmul.f32 %v2213_v33, %v2202_v41  ;;  %v2217_v38 = vmul.f32 %v2209_v54, %v2201_v62  ;;  %v2941_v52 = vrot.slane %v3460_v6, %v6512_v44 }
 0x54d   : > { %782 = vperm.xlu1 %3385, %v764_v40   ;;  %1504 = vperm.xlu0 %3386, %v1490_v29   ;;  %v2928_v21 = vmul.f32 %v2921_v24, %v5383_v18  ;;  %v2930_v25 = vmul.f32 %v2925_v11, %v5448_v7  ;;  %v2219_v26 = vmul.f32 %v2213_v33, %v2203_v35 }
 0x54e   : > { %v2929_v23 = vmul.f32 %v2921_v24, %v5385_v47  ;;  %v2931_v60 = vmul.f32 %v2925_v11, %v5450_v31 }
 0x54f   : > { %v2944_v45 = vmul.f32 %v2937_v16, %v2928_v21  ;;  %v2946_v53 = vmul.f32 %v2941_v52, %v2930_v25 }
 0x550   : > { %v2945_v18 = vmul.f32 %v2937_v16, %v2929_v23  ;;  %v2947_v50 = vmul.f32 %v2941_v52, %v2931_v60 }
 0x551   : > { %1499 = vperm.xlu1 %3385, %v1489_v10   ;;  %2222 = vperm.xlu0 %3386, %v2216_v55  }
 0x555   : > { %1509 = vperm.xlu1 %3385, %v1491_v57   ;;  %2232 = vperm.xlu0 %3386, %v2218_v58  }
 0x559   : > { %2227 = vperm.xlu1 %3385, %v2217_v38   ;;  %2950 = vperm.xlu0 %3386, %v2944_v45  }
 0x55d   : > { %2237 = vperm.xlu1 %3385, %v2219_v26   ;;  %2960 = vperm.xlu0 %3386, %v2946_v53  }
 0x561   : > { %2955 = vperm.xlu1 %3385, %v2945_v18  }
 0x565   : > { %2965 = vperm.xlu1 %3385, %v2947_v50  }
 0x5c4   : > { %v768_v5 = vpop.permute.xlu1 %767  ;;  %v773_v39 = vpop.permute.xlu0 %772 }
 0x5c5   : > { %v785_v7 = vmul.f32 %v768_v5, %v6396_v17  ;;  %v786_v40 = vmul.f32 %v768_v5, %v6397_v61  ;;  %v787_v0 = vmul.f32 %v773_v39, %v6394_v2  ;;  %v788_v8 = vmul.f32 %v773_v39, %v6466_v22 }
 0x5c7   : > { %v793_v15 = vadd.f32 %v787_v0, %v785_v7  ;;  %v800_v47 = vadd.f32 %v788_v8, %v786_v40 }
 0x5c8   : > { %v778_v29 = vpop.permute.xlu1 %777  ;;  %v1495_v12 = vpop.permute.xlu0 %1494 }
 0x5c9   : > { %v794_v54 = vrot.slane %v793_v15, 4  ;;  %v801_v4 = vrot.slane %v800_v47, 4  ;;  %v789_v10 = vmul.f32 %v778_v29, %v6467_v49  ;;  %v790_v55 = vmul.f32 %v778_v29, %v6468_v14 }
 0x5ca   : > { %v1512_v25 = vmul.f32 %v1495_v12, %v6471_v32  ;;  %v1513_v52 = vmul.f32 %v1495_v12, %v6472_v46 }
 0x5cb   : > { %v795_v31 = vadd.f32 %v794_v54, %v793_v15  ;;  %v802_v24 = vadd.f32 %v801_v4, %v800_v47 }
 0x5cc   : > { %v783_v41 = vpop.permute.xlu1 %782  ;;  %v1505_v33 = vpop.permute.xlu0 %1504 }
 0x5cd   : > { %v796_v6 = vrot.slane %v795_v31, 2  ;;  %v803_v57 = vrot.slane %v802_v24, 2  ;;  %v791_v11 = vmul.f32 %v783_v41, %v6469_v59  ;;  %v792_v58 = vmul.f32 %v783_v41, %v6470_v30 }
 0x5ce   : > { %v1516_v7 = vmul.f32 %v1505_v33, %v6501_v37  ;;  %v1517_v40 = vmul.f32 %v1505_v33, %v6502_v28 }
 0x5cf   : > { %v797_v62 = vadd.f32 %v796_v6, %v795_v31  ;;  %v804_v21 = vadd.f32 %v803_v57, %v802_v24  ;;  %v807_v16 = vadd.f32 %v791_v11, %v789_v10  ;;  %v814_v38 = vadd.f32 %v792_v58, %v790_v55 }
 0x5d0   : > { %v1500_v45 = vpop.permute.xlu1 %1499  ;;  %v2223_v35 = vpop.permute.xlu0 %2222 }
 0x5d1   : > { %v808_v26 = vrot.slane %v807_v16, 4  ;;  %v815_v53 = vrot.slane %v814_v38, 4  ;;  %v798_v23 = vrot.slane %v797_v62, 1  ;;  %v805_v18 = vrot.slane %v804_v21, 1 }
 0x5d2   : > { %v1514_v60 = vmul.f32 %v1500_v45, %v6473_v27  ;;  %v1515_v50 = vmul.f32 %v1500_v45, %v6474_v51  ;;  %v2240_v15 = vmul.f32 %v2223_v35, %v6481_v48  ;;  %v2241_v47 = vmul.f32 %v2223_v35, %v6482_v36 }
 0x5d3   : > { %v809_v5 = vadd.f32 %v808_v26, %v807_v16  ;;  %v816_v39 = vadd.f32 %v815_v53, %v814_v38  ;;  %v799_v10 = vadd.f32 %v798_v23, %v797_v62  ;;  %v806_v55 = vadd.f32 %v805_v18, %v804_v21 }
 0x5d4   : > { %v1520_v0 = vadd.f32 %v1514_v60, %v1512_v25  ;;  %v1527_v8 = vadd.f32 %v1515_v50, %v1513_v52  ;;  %v1510_v29 = vpop.permute.xlu1 %1509  ;;  %v2233_v12 = vpop.permute.xlu0 %2232 }
 0x5d5   : > { %v810_v54 = vrot.slane %v809_v5, 2  ;;  %v817_v4 = vrot.slane %v816_v39, 2  ;;  %v1518_v31 = vmul.f32 %v1510_v29, %v6499_v20  ;;  %v1519_v24 = vmul.f32 %v1510_v29, %v6500_v34 }
 0x5d6   : > { %v1521_v41 = vrot.slane %v1520_v0, 4  ;;  %v1528_v6 = vrot.slane %v1527_v8, 4  ;;  %v2244_v45 = vmul.f32 %v2233_v12, %v6505_v43  ;;  %v2245_v35 = vmul.f32 %v2233_v12, %v6506_v56  ;;  %v6517_v56 = vld [vmem:[#allocation22_spill] sm:$0xff]  ;;  %v6518_v43 = vld [vmem:[#allocation32_spill] sm:$0xff] }
 0x5d7   : > { %v811_v57 = vadd.f32 %v810_v54, %v809_v5  ;;  %v818_v33 = vadd.f32 %v817_v4, %v816_v39  ;;  %v1534_v11 = vadd.f32 %v1518_v31, %v1516_v7  ;;  %v1541_v58 = vadd.f32 %v1519_v24, %v1517_v40 }
 0x5d8   : > { %v1522_v16 = vadd.f32 %v1521_v41, %v1520_v0  ;;  %v1529_v38 = vadd.f32 %v1528_v6, %v1527_v8  ;;  %v2228_v25 = vpop.permute.xlu1 %2227  ;;  %v2951_v18 = vpop.permute.xlu0 %2950  ;;  %v5522_v7 = vadd.f32 %v799_v10, %v5159_v42  ;;  %v5525_v40 = vadd.f32 %v806_v55, %v5161_v3 }
 0x5d9   : > { %v812_v52 = vrot.slane %v811_v57, 1  ;;  %v819_v26 = vrot.slane %v818_v33, 1  ;;  %v1535_v53 = vrot.slane %v1534_v11, 4  ;;  %v1542_v60 = vrot.slane %v1541_v58, 4 }
 0x5da   : > { %v1523_v50 = vrot.slane %v1522_v16, 2  ;;  %v1530_v62 = vrot.slane %v1529_v38, 2  ;;  %v2242_v21 = vmul.f32 %v2228_v25, %v6483_v19  ;;  %v2243_v23 = vmul.f32 %v2228_v25, %v6484_v13 }
 0x5db   : > { %v1536_v5 = vadd.f32 %v1535_v53, %v1534_v11  ;;  %v1543_v39 = vadd.f32 %v1542_v60, %v1541_v58  ;;  %v813_v4 = vadd.f32 %v812_v52, %v811_v57  ;;  %v820_v31 = vadd.f32 %v819_v26, %v818_v33 }
 0x5dc   : > { %v1524_v0 = vadd.f32 %v1523_v50, %v1522_v16  ;;  %v1531_v8 = vadd.f32 %v1530_v62, %v1529_v38  ;;  %v2248_v29 = vadd.f32 %v2242_v21, %v2240_v15  ;;  %v2255_v12 = vadd.f32 %v2243_v23, %v2241_v47  ;;  %v2238_v54 = vpop.permute.xlu1 %2237  ;;  %v6513_v16 = vld [vmem:[#allocation46_spill] sm:$0xff]  ;;  %v6514_v47 = vld [vmem:[#allocation47_spill] sm:$0xff]  ;;  %v2961_v57 = vpop.permute.xlu0 %2960 }
 0x5dd   : > { %v1537_v24 = vrot.slane %v1536_v5, 2  ;;  %v1544_v41 = vrot.slane %v1543_v39, 2  ;;  %v2246_v42 = vmul.f32 %v2238_v54, %v6503_v9  ;;  %v2247_v3 = vmul.f32 %v2238_v54, %v6504_v63 }
 0x5de   : > { %v1525_v6 = vrot.slane %v1524_v0, 1  ;;  %v1532_v25 = vrot.slane %v1531_v8, 1  ;;  %v2249_v44 = vrot.slane %v2248_v29, 4  ;;  %v2256_v11 = vrot.slane %v2255_v12, 4 }
 0x5df   : > { %v1538_v58 = vadd.f32 %v1537_v24, %v1536_v5  ;;  %v1545_v53 = vadd.f32 %v1544_v41, %v1543_v39  ;;  %v2968_v15 = vmul.f32 %v2951_v18, %v6513_v16  ;;  %v2969_v38 = vmul.f32 %v2951_v18, %v6514_v47  ;;  %v6515_v41 = vld [vmem:[#allocation33_spill] sm:$0xff] }
 0x5e0   : > { %v2250_v10 = vadd.f32 %v2249_v44, %v2248_v29  ;;  %v2257_v55 = vadd.f32 %v2256_v11, %v2255_v12  ;;  %v1526_v33 = vadd.f32 %v1525_v6, %v1524_v0  ;;  %v1533_v52 = vadd.f32 %v1532_v25, %v1531_v8  ;;  %v2956_v50 = vpop.permute.xlu1 %2955  ;;  %v6516_v44 = vld [vmem:[#allocation24_spill] sm:$0xff] }
 0x5e1   : > { %v2262_v26 = vadd.f32 %v2246_v42, %v2244_v45  ;;  %v2269_v60 = vadd.f32 %v2247_v3, %v2245_v35  ;;  %v1539_v62 = vrot.slane %v1538_v58, 1  ;;  %v1546_v21 = vrot.slane %v1545_v53, 1  ;;  %v6519_v35 = vld [vmem:[#allocation26_spill] sm:$0xff]  ;;  %v6520_v25 = vld [vmem:[#allocation8_spill] sm:$0xff] }
 0x5e2   : > { %v2251_v23 = vrot.slane %v2250_v10, 2  ;;  %v2258_v5 = vrot.slane %v2257_v55, 2  ;;  %v2972_v54 = vmul.f32 %v2961_v57, %v6515_v41  ;;  %v2973_v29 = vmul.f32 %v2961_v57, %v6516_v44  ;;  %v6522_v44 = vld [vmem:[#allocation25_spill] sm:$0xff] }
 0x5e3   : > { %v2263_v39 = vrot.slane %v2262_v26, 4  ;;  %v2270_v24 = vrot.slane %v2269_v60, 4  ;;  %v2970_v18 = vmul.f32 %v2956_v50, %v6517_v56  ;;  %v2971_v0 = vmul.f32 %v2956_v50, %v6518_v43 }
 0x5e4   : > { %v2252_v12 = vadd.f32 %v2251_v23, %v2250_v10  ;;  %v2259_v11 = vadd.f32 %v2258_v5, %v2257_v55  ;;  %v5536_v6 = vadd.f32 %v813_v4, %v6519_v35  ;;  %v5539_v42 = vadd.f32 %v820_v31, %v6520_v25 }
 0x5e5   : > { %v2264_v8 = vadd.f32 %v2263_v39, %v2262_v26  ;;  %v2271_v45 = vadd.f32 %v2270_v24, %v2269_v60  ;;  %v1540_v3 = vadd.f32 %v1539_v62, %v1538_v58  ;;  %v2976_v20 = vadd.f32 %v2970_v18, %v2968_v15  ;;  %v2966_v26 = vpop.permute.xlu1 %2965  ;;  %v6521_v24 = vld [vmem:[#allocation7_spill] sm:$0xff] }
 0x5e6   : > { %v2253_v34 = vrot.slane %v2252_v12, 1  ;;  %v2983_v41 = vadd.f32 %v2971_v0, %v2969_v38  ;;  %v829_v10 = vsel %vm509_vm1, %v5536_v6, %v5522_v7  ;;  %v830_v55 = vsel %vm509_vm1, %v5539_v42, %v5525_v40 }
 0x5e7   : > { %v2265_v30 = vrot.slane %v2264_v8, 2  ;;  %v2272_v57 = vrot.slane %v2271_v45, 2  ;;  %v1547_v4 = vadd.f32 %v1546_v21, %v1545_v53  ;;  %v2260_v60 = vrot.slane %v2259_v11, 1 }
 0x5e8   : > { %v2977_v50 = vrot.slane %v2976_v20, 4  ;;  %v2984_v31 = vrot.slane %v2983_v41, 4  ;;  %v833_v15 = vsel %vm618_vm3, %v829_v10, -inf  ;;  %v834_v38 = vsel %vm618_vm3, %v830_v55, -inf }
 0x5e9   : > { %v2266_v23 = vadd.f32 %v2265_v30, %v2264_v8  ;;  %v2273_v58 = vadd.f32 %v2272_v57, %v2271_v45  ;;  %v835_v39 = vmax.f32 %v833_v15, %v834_v38  ;;  %v2974_v18 = vmul.f32 %v2966_v26, %v6521_v24  ;;  %v6523_v57 = vld [vmem:[#allocation27_spill] sm:$0xff] }
 0x5ea   : > { %v2978_v62 = vadd.f32 %v2977_v50, %v2976_v20  ;;  %v2985_v5 = vadd.f32 %v2984_v31, %v2983_v41  ;;  %v2254_v0 = vadd.f32 %v2253_v34, %v2252_v12  ;;  %v2975_v59 = vmul.f32 %v2966_v26, %v6522_v44  ;;  %v6524_v20 = vld [vmem:[#allocation9_spill] sm:$0xff]  ;;  %v6525_v34 = vld [vmem:[#allocation28_spill] sm:$0xff] }
 0x5eb   : > { %v2267_v35 = vrot.slane %v2266_v23, 1  ;;  %v2274_v25 = vrot.slane %v2273_v58, 1  ;;  %v2261_v53 = vadd.f32 %v2260_v60, %v2259_v11  ;;  %836 = vmax.xlane.f32.xlu0 %v835_v39  ;;  %v2990_v30 = vadd.f32 %v2974_v18, %v2972_v54  ;;  %v6526_v31 = vld [vmem:[#allocation29_spill] sm:$0xff]  ;;  %v6529_v39 = vld [vmem:[#allocation11_spill] sm:$0xff] }
 0x5ec   : > { %v2979_v21 = vrot.slane %v2978_v62, 2  ;;  %v2986_v43 = vrot.slane %v2985_v5, 2  ;;  %v2997_v45 = vadd.f32 %v2975_v59, %v2973_v29  ;;  %v5552_v10 = vadd.f32 %v1526_v33, %v6523_v57  ;;  %v6527_v29 = vld [vmem:[#allocation30_spill] sm:$0xff] }
 0x5ed   : > { %v2268_v8 = vadd.f32 %v2267_v35, %v2266_v23  ;;  %v5555_v41 = vadd.f32 %v1540_v3, %v6524_v20  ;;  %v2991_v50 = vrot.slane %v2990_v30, 4  ;;  %v5558_v12 = vadd.f32 %v1533_v52, %v6525_v34 }
 0x5ee   : > { %v2980_v55 = vadd.f32 %v2979_v21, %v2978_v62  ;;  %v5561_v26 = vadd.f32 %v1547_v4, %v6526_v31  ;;  %v2275_v11 = vadd.f32 %v2274_v25, %v2273_v58  ;;  %v2987_v60 = vadd.f32 %v2986_v43, %v2985_v5  ;;  %v6528_v58 = vld [vmem:[#allocation12_spill] sm:$0xff]  ;;  %v6530_v21 = vld [vmem:[#allocation31_spill] sm:$0xff] }
 0x5ef   : > { %v2998_v15 = vrot.slane %v2997_v45, 4  ;;  %v1556_v59 = vsel %vm509_vm1, %v5555_v41, %v5552_v10  ;;  %v2992_v33 = vadd.f32 %v2991_v50, %v2990_v30  ;;  %v5570_v3 = vadd.f32 %v2254_v0, %v6527_v29  ;;  %v6531_v29 = vld [vmem:[#allocation5_spill] sm:$0xff] }
 0x5f0   : > { %v1557_v54 = vsel %vm509_vm1, %v5561_v26, %v5558_v12  ;;  %v1560_v23 = vsel %vm618_vm3, %v1556_v59, -inf  ;;  %v5575_v43 = vadd.f32 %v2268_v8, %v6528_v58  ;;  %v2981_v38 = vrot.slane %v2980_v55, 1 }
 0x5f1   : > { %v2999_v52 = vadd.f32 %v2998_v15, %v2997_v45  ;;  %v1561_v4 = vsel %vm618_vm3, %v1557_v54, -inf  ;;  %v2993_v62 = vrot.slane %v2992_v33, 2  ;;  %v5578_v18 = vadd.f32 %v2261_v53, %v6529_v39 }
 0x5f2   : > { %v1562_v5 = vmax.f32 %v1560_v23, %v1561_v4  ;;  %v2988_v35 = vrot.slane %v2987_v60, 1  ;;  %v2279_v30 = vadd.f32 %v2275_v11, %v6530_v21  ;;  %v2284_v0 = vsel %vm509_vm1, %v5575_v43, %v5570_v3 }
 0x5f3   : > { %v3000_v25 = vrot.slane %v2999_v52, 2  ;;  %v2994_v45 = vadd.f32 %v2993_v62, %v2992_v33  ;;  %v2288_v57 = vsel %vm618_vm3, %v2284_v0, -inf  ;;  %v2982_v50 = vadd.f32 %v2981_v38, %v2980_v55  ;;  %v6532_v33 = vld [vmem:[#allocation34_spill] sm:$0xff]  ;;  %v6534_v62 = vld [vmem:[#allocation35_spill] sm:$0xff] }
 0x5f4   : > { %1563 = vmax.xlane.f32.xlu1 %v1562_v5  ;;  %v2285_v20 = vsel %vm509_vm1, %v2279_v30, %v5578_v18  ;;  %v2989_v31 = vadd.f32 %v2988_v35, %v2987_v60 }
 0x5f5   : > { %v3001_v8 = vadd.f32 %v3000_v25, %v2999_v52  ;;  %v2995_v34 = vrot.slane %v2994_v45, 1  ;;  %v2289_v53 = vsel %vm618_vm3, %v2285_v20, -inf  ;;  %v5589_v23 = vadd.f32 %v2982_v50, %v6531_v29  ;;  %v6533_v52 = vld [vmem:[#allocation23_spill] sm:$0xff] }
 0x5f6   : > { %v2290_v59 = vmax.f32 %v2288_v57, %v2289_v53  ;;  %v5595_v58 = vadd.f32 %v2989_v31, %v6533_v52 }
 0x5f7   : > { %v3002_v15 = vrot.slane %v3001_v8, 1  ;;  %v2996_v11 = vadd.f32 %v2995_v34, %v2994_v45 }
 0x5f8   : > { %2291 = vmax.xlane.f32.xlu0 %v2290_v59 }
 0x5f9   : > { %v3003_v54 = vadd.f32 %v3002_v15, %v3001_v8  ;;  %v5592_v4 = vadd.f32 %v2996_v11, %v6532_v33 }
 0x5fb   : > { %v5598_v55 = vadd.f32 %v3003_v54, %v6534_v62  ;;  %v3012_v60 = vsel %vm509_vm1, %v5592_v4, %v5589_v23 }
 0x5fc   : > { %v3016_v5 = vsel %vm618_vm3, %v3012_v60, -inf }
 0x5fd   : > { %v3013_v38 = vsel %vm509_vm1, %v5598_v55, %v5595_v58 }
 0x5fe   : > { %v3017_v39 = vsel %vm618_vm3, %v3013_v38, -inf }
 0x5ff   : > { %v3018_v35 = vmax.f32 %v3016_v5, %v3017_v39 }
 0x601   : > { %3019 = vmax.xlane.f32.xlu0 %v3018_v35 }
 0x678   : > { %v837_v25 = vpop.xlane.xlu0 %836 }
 0x679   : > { %v839_v21 = vrot.slane %v837_v25, 1  ;;  %v842_v0 = vsub.f32 %v5522_v7, %v837_v25  ;;  %v843_v45 = vsub.f32 %v5525_v40, %v837_v25 }
 0x67b   : > { %v844_v57 = vsub.f32 %v5536_v6, %v839_v21  ;;  %v845_v8 = vsub.f32 %v5539_v42, %v839_v21  ;;  %v846_v20 = vmul.f32 1.442695, %v842_v0  ;;  %v848_v53 = vmul.f32 1.442695, %v843_v45 }
 0x67d   : > { %v850_v50 = vmul.f32 1.442695, %v844_v57  ;;  %v852_v34 = vmul.f32 1.442695, %v845_v8 }
 0x67f   : > { %3461 = vpow2.f32 %v850_v50 }
 0x680   : > { %3463 = vpow2.f32 %v852_v34 }
 0x681   : > { %v1564_v31 = vpop.xlane.xlu1 %1563  ;;  %3465 = vpow2.f32 %v846_v20 }
 0x682   : > { %v1566_v15 = vrot.slane %v1564_v31, 1  ;;  %v1569_v59 = vsub.f32 %v5552_v10, %v1564_v31  ;;  %3467 = vpow2.f32 %v848_v53  ;;  %v1570_v7 = vsub.f32 %v5558_v12, %v1564_v31 }
 0x684   : > { %v1571_v40 = vsub.f32 %v5555_v41, %v1566_v15  ;;  %v1572_v6 = vsub.f32 %v5561_v26, %v1566_v15  ;;  %v1573_v11 = vmul.f32 1.442695, %v1569_v59  ;;  %v1575_v33 = vmul.f32 1.442695, %v1570_v7 }
 0x685   : > { %v2292_v29 = vpop.xlane.xlu0 %2291 }
 0x686   : > { %v1577_v42 = vmul.f32 1.442695, %v1571_v40  ;;  %v1579_v54 = vmul.f32 1.442695, %v1572_v6  ;;  %v2294_v52 = vrot.slane %v2292_v29, 1  ;;  %v2297_v62 = vsub.f32 %v5570_v3, %v2292_v29 }
 0x687   : > { %v2298_v60 = vsub.f32 %v5578_v18, %v2292_v29 }
 0x688   : > { %3469 = vpow2.f32 %v1577_v42  ;;  %v2299_v10 = vsub.f32 %v5575_v43, %v2294_v52  ;;  %v2300_v38 = vsub.f32 %v2279_v30, %v2294_v52  ;;  %v2301_v41 = vmul.f32 1.442695, %v2297_v62 }
 0x689   : > { %3471 = vpow2.f32 %v1579_v54  ;;  %v5619_v12 = vpop.eup %3461  ;;  %v2303_v3 = vmul.f32 1.442695, %v2298_v60 }
 0x68a   : > { %3473 = vpow2.f32 %v1573_v11  ;;  %v5621_v26 = vpop.eup %3463  ;;  %v2305_v5 = vmul.f32 1.442695, %v2299_v10  ;;  %v2307_v39 = vmul.f32 1.442695, %v2300_v38  ;;  %v858_v35 = vrot.slane %v5619_v12, 7 }
 0x68b   : > { %3475 = vpow2.f32 %v1575_v33  ;;  %v5624_v25 = vpop.eup %3465  ;;  %v860_v18 = vrot.slane %v5621_v26, 7 }
 0x68c   : > { %v5627_v21 = vpop.eup %3467  ;;  %3477 = vpow2.f32 %v2305_v5  ;;  %v859_v43 = vsel %vm509_vm1, %v858_v35, %v5624_v25 }
 0x68d   : > { %3479 = vpow2.f32 %v2307_v39  ;;  %v861_v30 = vsel %vm509_vm1, %v860_v18, %v5627_v21  ;;  %v864_v0 = vsel %vm618_vm3, %v859_v43, 0.0 }
 0x68e   : > { %v3020_v45 = vpop.xlane.xlu0 %3019  ;;  %3481 = vpow2.f32 %v2301_v41  ;;  %v865_v57 = vsel %vm618_vm3, %v861_v30, 0.0 }
 0x68f   : > { %v3022_v8 = vrot.slane %v3020_v45, 1  ;;  %v3025_v20 = vsub.f32 %v5589_v23, %v3020_v45  ;;  %3483 = vpow2.f32 %v2303_v3  ;;  %v866_v50 = vadd.f32 %v865_v57, %v864_v0 }
 0x690   : > { %v3026_v34 = vsub.f32 %v5595_v58, %v3020_v45 }
 0x691   : > { %v3027_v53 = vsub.f32 %v5592_v4, %v3022_v8  ;;  %v3028_v31 = vsub.f32 %v5598_v55, %v3022_v8  ;;  %867 = vadd.xlane.f32.xlu1 %v866_v50  ;;  %v3029_v59 = vmul.f32 1.442695, %v3025_v20 }
 0x692   : > { %v5639_v15 = vpop.eup %3469  ;;  %v3031_v23 = vmul.f32 1.442695, %v3026_v34 }
 0x693   : > { %v5641_v7 = vpop.eup %3471  ;;  %v3033_v40 = vmul.f32 1.442695, %v3027_v53  ;;  %v3035_v6 = vmul.f32 1.442695, %v3028_v31  ;;  %v1585_v11 = vrot.slane %v5639_v15, 7 }
 0x694   : > { %v3474_v42 = vpop.eup %3473  ;;  %v1587_v54 = vrot.slane %v5641_v7, 7 }
 0x695   : > { %v3476_v29 = vpop.eup %3475  ;;  %3485 = vpow2.f32 %v3033_v40  ;;  %v1586_v4 = vsel %vm509_vm1, %v1585_v11, %v3474_v42 }
 0x696   : > { %3487 = vpow2.f32 %v3035_v6  ;;  %v1588_v58 = vsel %vm509_vm1, %v1587_v54, %v3476_v29  ;;  %v1591_v55 = vsel %vm618_vm3, %v1586_v4, 0.0  ;;  %v5648_v33 = vpop.eup %3477 }
 0x697   : > { %3489 = vpow2.f32 %v3029_v59  ;;  %v1592_v52 = vsel %vm618_vm3, %v1588_v58, 0.0  ;;  %v5651_v62 = vpop.eup %3479  ;;  %v2313_v10 = vrot.slane %v5648_v33, 7 }
 0x698   : > { %3491 = vpow2.f32 %v3031_v23  ;;  %v1593_v60 = vadd.f32 %v1592_v52, %v1591_v55  ;;  %v3482_v38 = vpop.eup %3481  ;;  %v2315_v41 = vrot.slane %v5651_v62, 7 }
 0x699   : > { %v3484_v5 = vpop.eup %3483  ;;  %v2314_v39 = vsel %vm509_vm1, %v2313_v10, %v3482_v38 }
 0x69a   : > { %1594 = vadd.xlane.f32.xlu0 %v1593_v60  ;;  %v2316_v35 = vsel %vm509_vm1, %v2315_v41, %v3484_v5  ;;  %v2319_v3 = vsel %vm618_vm3, %v2314_v39, 0.0 }
 0x69b   : > { %v2320_v18 = vsel %vm618_vm3, %v2316_v35, 0.0 }
 0x69c   : > { %v2321_v43 = vadd.f32 %v2320_v18, %v2319_v3 }
 0x69e   : > { %2322 = vadd.xlane.f32.xlu0 %v2321_v43 }
 0x69f   : > { %v5659_v30 = vpop.eup %3485 }
 0x6a0   : > { %v5661_v0 = vpop.eup %3487  ;;  %v3041_v45 = vrot.slane %v5659_v30, 7 }
 0x6a1   : > { %v5664_v57 = vpop.eup %3489  ;;  %v3043_v8 = vrot.slane %v5661_v0, 7 }
 0x6a2   : > { %v5667_v20 = vpop.eup %3491  ;;  %v3042_v50 = vsel %vm509_vm1, %v3041_v45, %v5664_v57 }
 0x6a3   : > { %v3044_v34 = vsel %vm509_vm1, %v3043_v8, %v5667_v20  ;;  %v3047_v53 = vsel %vm618_vm3, %v3042_v50, 0.0 }
 0x6a4   : > { %v3048_v31 = vsel %vm618_vm3, %v3044_v34, 0.0 }
 0x6a5   : > { %v3049_v59 = vadd.f32 %v3048_v31, %v3047_v53 }
 0x6a7   : > { %3050 = vadd.xlane.f32.xlu0 %v3049_v59 }
 0x71e   : > { %v868_v40 = vpop.xlane.xlu1 %867 }
 0x71f   : > { %3493 = vrcp.f32 %v868_v40 }
 0x727   : > { %v1595_v6 = vpop.xlane.xlu0 %1594 }
 0x728   : > { %3495 = vrcp.f32 %v1595_v6 }
 0x729   : > { %v3494_v11 = vpop.eup %3493 }
 0x72a   : > { %v874_v23 = vmul.f32 %v3494_v11, %v5624_v25  ;;  %v875_v54 = vmul.f32 %v3494_v11, %v5627_v21  ;;  %v871_v52 = vrot.slane %v3494_v11, 1 }
 0x72b   : > { %v2323_v4 = vpop.xlane.xlu0 %2322 }
 0x72c   : > { %3497 = vrcp.f32 %v2323_v4  ;;  %v881_v58 = vrot.slane %v874_v23, %v6464_v1  ;;  %v885_v55 = vrot.slane %v875_v54, %v6464_v1  ;;  %v876_v21 = vmul.f32 %v5619_v12, %v871_v52 }
 0x72d   : > { %v877_v8 = vmul.f32 %v5621_v26, %v871_v52 }
 0x72e   : > { %v896_v60 = vmul.f32 %v881_v58, %v6394_v2  ;;  %v897_v10 = vmul.f32 %v885_v55, %v6466_v22  ;;  %v894_v41 = vmul.f32 %v881_v58, %v6396_v17  ;;  %v895_v39 = vmul.f32 %v885_v55, %v6397_v61 }
 0x72f   : > { %v5688_v61 = vrot.slane %v876_v21, %v6464_v1  ;;  %v893_v31 = vrot.slane %v877_v8, %v6464_v1 }
 0x730   : > { %v905_v35 = vadd.f32 %v897_v10, %v896_v60  ;;  %v902_v3 = vadd.f32 %v895_v39, %v894_v41 }
 0x732   : > { %v3496_v25 = vpop.eup %3495  ;;  %906 = vadd.xlane.f32.xlu1 %v905_v35  ;;  %903 = vadd.xlane.f32.xlu0 %v902_v3 }
 0x733   : > { %v1601_v18 = vmul.f32 %v3496_v25, %v3474_v42  ;;  %v1602_v43 = vmul.f32 %v3496_v25, %v3476_v29  ;;  %v1598_v50 = vrot.slane %v3496_v25, 1 }
 0x734   : > { %v3051_v45 = vpop.xlane.xlu0 %3050 }
 0x735   : > { %3499 = vrcp.f32 %v3051_v45  ;;  %v1608_v2 = vrot.slane %v1601_v18, %v6464_v1  ;;  %v1612_v17 = vrot.slane %v1602_v43, %v6464_v1  ;;  %v1603_v59 = vmul.f32 %v5639_v15, %v1598_v50 }
 0x736   : > { %v3498_v22 = vpop.eup %3497  ;;  %v1604_v11 = vmul.f32 %v5641_v7, %v1598_v50  ;;  %v899_v7 = vmul.f32 %v893_v31, %v6468_v14 }
 0x737   : > { %v1623_v34 = vmul.f32 %v1608_v2, %v6473_v27  ;;  %v1624_v12 = vmul.f32 %v1612_v17, %v6474_v51  ;;  %v1621_v42 = vmul.f32 %v1608_v2, %v6471_v32  ;;  %v1622_v29 = vmul.f32 %v1612_v17, %v6472_v46  ;;  %v6536_v2 = vld [vmem:[#allocation36_spill] sm:$0xff] }
 0x738   : > { %v2329_v53 = vmul.f32 %v3498_v22, %v3482_v38  ;;  %v2330_v26 = vmul.f32 %v3498_v22, %v3484_v5  ;;  %v2326_v23 = vrot.slane %v3498_v22, 1  ;;  %v898_v32 = vmul.f32 %v5688_v61, %v6467_v49  ;;  %v6537_v22 = vld [vmem:[#allocation14_spill] sm:$0xff] }
 0x739   : > { %v1632_v40 = vadd.f32 %v1624_v12, %v1623_v34  ;;  %v1629_v6 = vadd.f32 %v1622_v29, %v1621_v42  ;;  %v1616_v5 = vrot.slane %v1603_v59, %v6464_v1  ;;  %v1620_v4 = vrot.slane %v1604_v11, %v6464_v1  ;;  %v6539_v42 = vld [vmem:[#allocation39_spill] sm:$0xff]  ;;  %v6540_v29 = vld [vmem:[#allocation10_spill] sm:$0xff] }
 0x73a   : > { %v2336_v54 = vrot.slane %v2329_v53, %v6464_v1  ;;  %v2340_v27 = vrot.slane %v2330_v26, %v6464_v1  ;;  %v2331_v58 = vmul.f32 %v5648_v33, %v2326_v23  ;;  %v2332_v49 = vmul.f32 %v5651_v62, %v2326_v23  ;;  %v6541_v26 = vld [vmem:[#allocation13_spill] sm:$0xff] }
 0x73b   : > { %1633 = vadd.xlane.f32.xlu0 %v1632_v40  ;;  %1630 = vadd.xlane.f32.xlu1 %v1629_v6  ;;  %v1625_v14 = vmul.f32 %v1616_v5, %v6501_v37  ;;  %v1626_v10 = vmul.f32 %v1620_v4, %v6502_v28  ;;  %v900_v17 = vmul.f32 %v5688_v61, %v6536_v2  ;;  %v6542_v6 = vld [vmem:[#allocation33_spill] sm:$0xff]  ;;  %v6543_v61 = vld [vmem:[#allocation24_spill] sm:$0xff] }
 0x73c   : > { %v2351_v46 = vmul.f32 %v2336_v54, %v6483_v19  ;;  %v2352_v51 = vmul.f32 %v2340_v27, %v6484_v13  ;;  %v2349_v15 = vmul.f32 %v2336_v54, %v6481_v48  ;;  %v2350_v38 = vmul.f32 %v2340_v27, %v6482_v36 }
 0x73d   : > { %v908_v13 = vadd.f32 %v899_v7, %v898_v32  ;;  %v2344_v41 = vrot.slane %v2331_v58, %v6464_v1  ;;  %v2348_v62 = vrot.slane %v2332_v49, %v6464_v1  ;;  %v1635_v37 = vadd.f32 %v1626_v10, %v1625_v14  ;;  %v6544_v49 = vld [vmem:[#allocation21_spill] sm:$0xff] }
 0x73e   : > { %v2360_v55 = vadd.f32 %v2352_v51, %v2351_v46  ;;  %v2357_v52 = vadd.f32 %v2350_v38, %v2349_v15  ;;  %v901_v34 = vmul.f32 %v893_v31, %v6537_v22 }
 0x73f   : > { %v3500_v60 = vpop.eup %3499  ;;  %v2355_v28 = vmul.f32 %v2344_v41, %v6503_v9  ;;  %v2356_v43 = vmul.f32 %v2348_v62, %v6504_v63  ;;  %v2353_v53 = vmul.f32 %v2344_v41, %v6540_v29  ;;  %v2354_v59 = vmul.f32 %v2348_v62, %v6541_v26 }
 0x740   : > { %2361 = vadd.xlane.f32.xlu0 %v2360_v55  ;;  %2358 = vadd.xlane.f32.xlu1 %v2357_v52  ;;  %v3057_v19 = vmul.f32 %v3500_v60, %v5664_v57  ;;  %v3058_v48 = vmul.f32 %v3500_v60, %v5667_v20  ;;  %v3054_v36 = vrot.slane %v3500_v60, 1  ;;  %v911_v63 = vadd.f32 %v901_v34, %v900_v17 }
 0x741   : > { %v2366_v9 = vadd.f32 %v2356_v43, %v2355_v28  ;;  %v2363_v40 = vadd.f32 %v2354_v59, %v2353_v53 }
 0x742   : > { %v3064_v33 = vrot.slane %v3057_v19, %v6464_v1  ;;  %v3068_v39 = vrot.slane %v3058_v48, %v6464_v1  ;;  %v3059_v35 = vmul.f32 %v5659_v30, %v3054_v36  ;;  %v3060_v57 = vmul.f32 %v5661_v0, %v3054_v36  ;;  %v6535_v30 = vld [vmem:[#allocation32_spill] sm:$0xff] }
 0x743   : > { %v6545_v19 = vld [vmem:[#allocation20_spill] sm:$0xff] }
 0x744   : > { %909 = vadd.xlane.f32.xlu0 %v908_v13  ;;  %v3077_v20 = vmul.f32 %v3064_v33, %v6513_v16  ;;  %v3078_v3 = vmul.f32 %v3068_v39, %v6514_v47  ;;  %v3072_v25 = vrot.slane %v3059_v35, %v6464_v1  ;;  %v3076_v21 = vrot.slane %v3060_v57, %v6464_v1 }
 0x745   : > { %v3079_v45 = vmul.f32 %v3064_v33, %v6517_v56  ;;  %v3080_v8 = vmul.f32 %v3068_v39, %v6535_v30  ;;  %v6538_v56 = vld [vmem:[#allocation38_spill] sm:$0xff] }
 0x746   : > { %v3085_v18 = vadd.f32 %v3078_v3, %v3077_v20  ;;  %v3083_v0 = vmul.f32 %v3072_v25, %v6521_v24  ;;  %v3084_v16 = vmul.f32 %v3076_v21, %v6522_v44  ;;  %v1627_v12 = vmul.f32 %v1616_v5, %v6538_v56 }
 0x747   : > { %v3088_v50 = vadd.f32 %v3080_v8, %v3079_v45  ;;  %v1628_v24 = vmul.f32 %v1620_v4, %v6539_v42  ;;  %v3081_v11 = vmul.f32 %v3072_v25, %v6542_v6  ;;  %v3082_v23 = vmul.f32 %v3076_v21, %v6543_v61 }
 0x748   : > { %1636 = vadd.xlane.f32.xlu0 %v1635_v37  ;;  %3086 = vadd.xlane.f32.xlu1 %v3085_v18  ;;  %v5730_v47 = vadd.f32 %v3084_v16, %v3083_v0 }
 0x749   : > { %v1638_v44 = vadd.f32 %v1628_v24, %v1627_v12  ;;  %v3091_v31 = vadd.f32 %v3082_v23, %v3081_v11 }
 0x74c   : > { %2367 = vadd.xlane.f32.xlu0 %v2366_v9  ;;  %3089 = vadd.xlane.f32.xlu1 %v3088_v50 }
 0x750   : > { %912 = vadd.xlane.f32.xlu1 %v911_v63 }
 0x754   : > { %1639 = vadd.xlane.f32.xlu1 %v1638_v44 }
 0x758   : > { %2364 = vadd.xlane.f32.xlu1 %v2363_v40 }
 0x75c   : > { %3092 = vadd.xlane.f32.xlu1 %v3091_v31 }
 0x7bf   : > { %v5741_v54 = vpop.xlane.xlu0 %903  ;;  %v5743_v27 = vpop.xlane.xlu1 %906 }
 0x7c0   : > { %v915_v5 = vmul.f32 %v5743_v27, %v5743_v27  ;;  %v914_v4 = vmul.f32 %v5741_v54, %v5741_v54 }
 0x7c2   : > { %v929_v60 = vrot.slane %v915_v5, %v6544_v49  ;;  %v925_v48 = vrot.slane %v914_v4, %v6545_v19 }
 0x7c4   : > { %v930_v3 = vsel %vm498_vm0, %v929_v60, %v925_v48 }
 0x7c8   : > { %v5745_v32 = vpop.xlane.xlu0 %1633  ;;  %v5747_v46 = vpop.xlane.xlu1 %1630 }
 0x7c9   : > { %v1641_v36 = vmul.f32 %v5747_v46, %v5747_v46  ;;  %v1642_v13 = vmul.f32 %v5745_v32, %v5745_v32 }
 0x7cb   : > { %v1652_v62 = vrot.slane %v1641_v36, %v6545_v19  ;;  %v1656_v35 = vrot.slane %v1642_v13, %v6544_v49 }
 0x7cd   : > { %v5749_v51 = vpop.xlane.xlu0 %2361  ;;  %v5751_v15 = vpop.xlane.xlu1 %2358  ;;  %v1657_v16 = vsel %vm498_vm0, %v1656_v35, %v1652_v62 }
 0x7ce   : > { %v2369_v37 = vmul.f32 %v5751_v15, %v5751_v15  ;;  %v2370_v28 = vmul.f32 %v5749_v51, %v5749_v51 }
 0x7d0   : > { %v2380_v9 = vrot.slane %v2369_v37, %v6545_v19  ;;  %v2384_v50 = vrot.slane %v2370_v28, %v6544_v49 }
 0x7d1   : > { %v5753_v38 = vpop.xlane.xlu0 %909 }
 0x7d2   : > { %v916_v52 = vmul.f32 %v5753_v38, %v5753_v38  ;;  %v2385_v12 = vsel %vm498_vm0, %v2384_v50, %v2380_v9 }
 0x7d4   : > { %v934_v41 = vrot.slane %v916_v52, %v6545_v19 }
 0x7d5   : > { %v5755_v7 = vpop.xlane.xlu1 %3086  ;;  %v5763_v55 = vpop.xlane.xlu0 %1636 }
 0x7d6   : > { %v1643_v33 = vmul.f32 %v5763_v55, %v5763_v55 }
 0x7d8   : > { %v1661_v43 = vrot.slane %v1643_v33, %v6545_v19 }
 0x7d9   : > { %v5761_v58 = vpop.xlane.xlu1 %3089  ;;  %v5783_v57 = vpop.xlane.xlu0 %2367 }
 0x7da   : > { %v2372_v45 = vmul.f32 %v5783_v57, %v5783_v57 }
 0x7dc   : > { %v2393_v34 = vrot.slane %v2372_v45, %v6544_v49 }
 0x7dd   : > { %v5773_v14 = vpop.xlane.xlu1 %912 }
 0x7de   : > { %v917_v10 = vmul.f32 %v5773_v14, %v5773_v14 }
 0x7e0   : > { %v938_v39 = vrot.slane %v917_v10, %v6544_v49 }
 0x7e1   : > { %v5785_v20 = vpop.xlane.xlu1 %1639 }
 0x7e2   : > { %v1644_v25 = vmul.f32 %v5785_v20, %v5785_v20  ;;  %v939_v21 = vsel %vm498_vm0, %v938_v39, %v934_v41 }
 0x7e3   : > { %v940_v18 = vsel %vm509_vm1, %v939_v21, %v930_v3 }
 0x7e4   : > { %v1665_v30 = vrot.slane %v1644_v25, %v6544_v49  ;;  %v942_v8 = vsel %vm512_vm2, %v940_v18, 0.0 }
 0x7e5   : > { %v5801_v0 = vpop.xlane.xlu1 %2364  ;;  %943 = vadd.xlane.f32.xlu0 %v942_v8 }
 0x7e6   : > { %v2371_v2 = vmul.f32 %v5801_v0, %v5801_v0  ;;  %v1666_v17 = vsel %vm498_vm0, %v1665_v30, %v1661_v43 }
 0x7e7   : > { %v1667_v22 = vsel %vm509_vm1, %v1666_v17, %v1657_v16 }
 0x7e8   : > { %v2389_v63 = vrot.slane %v2371_v2, %v6545_v19  ;;  %v1669_v56 = vsel %vm512_vm2, %v1667_v22, 0.0 }
 0x7e9   : > { %1670 = vadd.xlane.f32.xlu0 %v1669_v56  ;;  %v5818_v26 = vpop.xlane.xlu1 %3092 }
 0x7ea   : > { %v2394_v42 = vsel %vm498_vm0, %v2393_v34, %v2389_v63 }
 0x7eb   : > { %v2395_v24 = vsel %vm509_vm1, %v2394_v42, %v2385_v12 }
 0x7ec   : > { %v2397_v44 = vsel %vm512_vm2, %v2395_v24, 0.0  ;;  %v3098_v24 = vmul.f32 %v5761_v58, %v5761_v58 }
 0x7ed   : > { %2398 = vadd.xlane.f32.xlu1 %v2397_v44  ;;  %v3097_v44 = vmul.f32 %v5755_v7, %v5755_v7 }
 0x7f1   : > { %3095 = vadd.xlane.f32.xlu1 %v5730_v47  ;;  %v6546_v47 = vld [vmem:[#allocation6_spill] sm:$0xff] }
 0x872   : > { %v944_v29 = vpop.xlane.xlu0 %943 }
 0x873   : > { %v945_v53 = vadd.f32 1.0, %v944_v29 }
 0x875   : > { %3501 = vrcp.f32 %v945_v53 }
 0x876   : > { %v1671_v59 = vpop.xlane.xlu0 %1670  ;;  %3503 = vrsqrt.f32 %v944_v29 }
 0x877   : > { %v1672_v40 = vadd.f32 1.0, %v1671_v59 }
 0x879   : > { %3505 = vrcp.f32 %v1672_v40 }
 0x87a   : > { %v2399_v6 = vpop.xlane.xlu1 %2398  ;;  %3507 = vrsqrt.f32 %v1671_v59 }
 0x87b   : > { %v2400_v11 = vadd.f32 1.0, %v2399_v6 }
 0x87d   : > { %3509 = vrcp.f32 %v2400_v11 }
 0x87e   : > { %3511 = vrsqrt.f32 %v2399_v6 }
 0x87f   : > { %v3502_v61 = vpop.eup %3501 }
 0x880   : > { %v947_v23 = vmul.f32 %v3502_v61, %v944_v29  ;;  %v3504_v31 = vpop.eup %3503  ;;  %v3112_v29 = vrot.slane %v3098_v24, %v6544_v49 }
 0x881   : > { %v968_v36 = vrot.slane %v3504_v31, %v6464_v1  ;;  %v972_v37 = vrot.slane %v3504_v31, %v6546_v47 }
 0x882   : > { %v952_v5 = vrot.slane %v947_v23, %v6464_v1  ;;  %v956_v4 = vrot.slane %v947_v23, %v6546_v47 }
 0x883   : > { %v3506_v52 = vpop.eup %3505 }
 0x884   : > { %v959_v60 = vmul.f32 %v952_v5, %v5741_v54  ;;  %v960_v48 = vmul.f32 %v952_v5, %v5743_v27  ;;  %v1674_v13 = vmul.f32 %v3506_v52, %v1671_v59  ;;  %v3508_v10 = vpop.eup %3507  ;;  %v961_v41 = vmul.f32 %v956_v4, %v5753_v38 }
 0x885   : > { %v1695_v27 = vrot.slane %v3508_v10, %v6464_v1  ;;  %v962_v25 = vmul.f32 %v956_v4, %v5773_v14  ;;  %v1699_v34 = vrot.slane %v3508_v10, %v6546_v47  ;;  %v3108_v59 = vrot.slane %v3097_v44, %v6545_v19 }
 0x886   : > { %v976_v33 = vmul.f32 %v968_v36, %v960_v48  ;;  %v975_v39 = vmul.f32 %v968_v36, %v959_v60  ;;  %v1679_v35 = vrot.slane %v1674_v13, %v6464_v1  ;;  %v977_v38 = vmul.f32 %v972_v37, %v961_v41 }
 0x887   : > { %v3510_v62 = vpop.eup %3509  ;;  %v1683_v8 = vrot.slane %v1674_v13, %v6546_v47  ;;  %v978_v16 = vmul.f32 %v972_v37, %v962_v25 }
 0x888   : > { %v2402_v3 = vmul.f32 %v3510_v62, %v2399_v6  ;;  %987 = vperm.xlu0 %3386, %v976_v33   ;;  %984 = vperm.xlu1 %3385, %v975_v39   ;;  %v3512_v28 = vpop.eup %3511  ;;  %v1687_v54 = vmul.f32 %v1679_v35, %v5745_v32  ;;  %v1686_v32 = vmul.f32 %v1679_v35, %v5747_v46 }
 0x889   : > { %v2423_v30 = vrot.slane %v3512_v28, %v6464_v1  ;;  %v2427_v50 = vrot.slane %v3512_v28, %v6546_v47  ;;  %v1688_v2 = vmul.f32 %v1683_v8, %v5763_v55  ;;  %v1689_v46 = vmul.f32 %v1683_v8, %v5785_v20  ;;  %v5844_v55 = vpop.xlane.xlu1 %3095 }
 0x88a   : > { %v2407_v21 = vrot.slane %v2402_v3, %v6464_v1  ;;  %v2411_v18 = vrot.slane %v2402_v3, %v6546_v47  ;;  %v1703_v43 = vmul.f32 %v1695_v27, %v1687_v54  ;;  %v1702_v17 = vmul.f32 %v1695_v27, %v1686_v32 }
 0x88b   : > { %v1704_v63 = vmul.f32 %v1699_v34, %v1688_v2  ;;  %v1705_v12 = vmul.f32 %v1699_v34, %v1689_v46  ;;  %v3099_v20 = vmul.f32 %v5818_v26, %v5818_v26  ;;  %v3113_v6 = vsel %vm498_vm0, %v3112_v29, %v3108_v59 }
 0x88c   : > { %v2414_v45 = vmul.f32 %v2407_v21, %v5751_v15  ;;  %990 = vperm.xlu1 %3385, %v977_v38   ;;  %1714 = vperm.xlu0 %3386, %v1703_v43   ;;  %v2416_v14 = vmul.f32 %v2411_v18, %v5801_v0  ;;  %v2417_v15 = vmul.f32 %v2411_v18, %v5783_v57 }
 0x88d   : > { %v2415_v0 = vmul.f32 %v2407_v21, %v5749_v51  ;;  %v3100_v57 = vmul.f32 %v5844_v55, %v5844_v55  ;;  %v3117_v53 = vrot.slane %v3099_v20, %v6545_v19 }
 0x88e   : > { %v2430_v9 = vmul.f32 %v2423_v30, %v2414_v45  ;;  %v2432_v22 = vmul.f32 %v2427_v50, %v2416_v14  ;;  %v2433_v56 = vmul.f32 %v2427_v50, %v2417_v15 }
 0x88f   : > { %v2431_v42 = vmul.f32 %v2423_v30, %v2415_v0  ;;  %v3121_v51 = vrot.slane %v3100_v57, %v6544_v49 }
 0x890   : > { %993 = vperm.xlu1 %3385, %v978_v16   ;;  %2439 = vperm.xlu0 %3386, %v2430_v9  }
 0x891   : > { %v3122_v40 = vsel %vm498_vm0, %v3121_v51, %v3117_v53 }
 0x892   : > { %v3123_v11 = vsel %vm509_vm1, %v3122_v40, %v3113_v6 }
 0x893   : > { %v3125_v61 = vsel %vm512_vm2, %v3123_v11, 0.0 }
 0x894   : > { %1711 = vperm.xlu1 %3385, %v1702_v17   ;;  %2445 = vperm.xlu0 %3386, %v2432_v22  }
 0x898   : > { %1717 = vperm.xlu1 %3385, %v1704_v63   ;;  %2448 = vperm.xlu0 %3386, %v2433_v56  }
 0x89c   : > { %1720 = vperm.xlu1 %3385, %v1705_v12  }
 0x8a0   : > { %2442 = vperm.xlu1 %3385, %v2431_v42  }
 0x8b7   : > { %3126 = vadd.xlane.f32.xlu0 %v3125_v61 }
 0x907   : > { %v985_v23 = vpop.permute.xlu1 %984  ;;  %v988_v31 = vpop.permute.xlu0 %987 }
 0x908   : > { %v998_v52 = vrot.slane %v985_v23, %v6545_v19  ;;  %v1002_v60 = vrot.slane %v988_v31, %v6544_v49 }
 0x90a   : > { %v1003_v41 = vsel %vm498_vm0, %v1002_v60, %v998_v52 }
 0x90b   : > { %v991_v5 = vpop.permute.xlu1 %990  ;;  %v1715_v4 = vpop.permute.xlu0 %1714 }
 0x90c   : > { %v1007_v36 = vrot.slane %v991_v5, %v6545_v19  ;;  %v1729_v27 = vrot.slane %v1715_v4, %v6544_v49 }
 0x90f   : > { %v994_v48 = vpop.permute.xlu1 %993  ;;  %v2440_v10 = vpop.permute.xlu0 %2439 }
 0x910   : > { %v1011_v13 = vrot.slane %v994_v48, %v6544_v49  ;;  %v2453_v8 = vrot.slane %v2440_v10, %v6545_v19 }
 0x912   : > { %v1012_v33 = vsel %vm498_vm0, %v1011_v13, %v1007_v36 }
 0x913   : > { %v1013_v39 = vsel %vm509_vm1, %v1012_v33, %v1003_v41  ;;  %v1712_v62 = vpop.permute.xlu1 %1711  ;;  %v2446_v35 = vpop.permute.xlu0 %2445 }
 0x914   : > { %1015 = vst.msk [vmem:[%s5872_s8] sm:$0x3] %vm512_vm2, %v1013_v39  ;;  %v1725_v37 = vrot.slane %v1712_v62, %v6545_v19  ;;  %v2462_v32 = vrot.slane %v2446_v35, %v6545_v19 }
 0x916   : > { %v1730_v38 = vsel %vm498_vm0, %v1729_v27, %v1725_v37 }
 0x917   : > { %v1718_v3 = vpop.permute.xlu1 %1717  ;;  %v2449_v28 = vpop.permute.xlu0 %2448 }
 0x918   : > { %v1734_v25 = vrot.slane %v1718_v3, %v6545_v19  ;;  %v2466_v18 = vrot.slane %v2449_v28, %v6544_v49 }
 0x91a   : > { %v2467_v9 = vsel %vm498_vm0, %v2466_v18, %v2462_v32 }
 0x91b   : > { %v1721_v54 = vpop.permute.xlu1 %1720 }
 0x91c   : > { %v1738_v21 = vrot.slane %v1721_v54, %v6544_v49 }
 0x91e   : > { %v1739_v43 = vsel %vm498_vm0, %v1738_v21, %v1734_v25 }
 0x91f   : > { %v1740_v45 = vsel %vm509_vm1, %v1739_v43, %v1730_v38  ;;  %v2443_v30 = vpop.permute.xlu1 %2442 }
 0x920   : > { %3300 = vst.msk [vmem:[%s5872_s8 + $0x2] sm:$0x3] %vm512_vm2, %v1740_v45  ;;  %v2457_v16 = vrot.slane %v2443_v30, %v6544_v49 }
 0x922   : > { %v2458_v14 = vsel %vm498_vm0, %v2457_v16, %v2453_v8 }
 0x923   : > { %v2468_v50 = vsel %vm509_vm1, %v2467_v9, %v2458_v14 }
 0x924   : > { %3317 = vst.msk [vmem:[%s5872_s8 + $0x4] sm:$0x3] %vm512_vm2, %v2468_v50 }
 0x944   : > { %v3127_v2 = vpop.xlane.xlu0 %3126 }
 0x945   : > { %v3128_v17 = vadd.f32 1.0, %v3127_v2 }
 0x947   : > { %3513 = vrcp.f32 %v3128_v17 }
 0x948   : > { %3515 = vrsqrt.f32 %v3127_v2 }
 0x951   : > { %v3514_v15 = vpop.eup %3513 }
 0x952   : > { %v3130_v22 = vmul.f32 %v3514_v15, %v3127_v2  ;;  %v3516_v34 = vpop.eup %3515 }
 0x953   : > { %v3151_v56 = vrot.slane %v3516_v34, %v6464_v1  ;;  %v3155_v20 = vrot.slane %v3516_v34, %v6546_v47 }
 0x954   : > { %v3135_v46 = vrot.slane %v3130_v22, %v6464_v1  ;;  %v3139_v0 = vrot.slane %v3130_v22, %v6546_v47 }
 0x956   : > { %v3142_v63 = vmul.f32 %v3135_v46, %v5755_v7  ;;  %v3143_v12 = vmul.f32 %v3135_v46, %v5761_v58  ;;  %v3144_v57 = vmul.f32 %v3139_v0, %v5818_v26  ;;  %v3145_v44 = vmul.f32 %v3139_v0, %v5844_v55 }
 0x958   : > { %v3158_v42 = vmul.f32 %v3151_v56, %v3142_v63  ;;  %v3159_v24 = vmul.f32 %v3151_v56, %v3143_v12  ;;  %v3160_v51 = vmul.f32 %v3155_v20, %v3144_v57  ;;  %v3161_v7 = vmul.f32 %v3155_v20, %v3145_v44 }
 0x95a   : > { %3167 = vperm.xlu1 %3385, %v3158_v42  }
 0x95e   : > { %3170 = vperm.xlu1 %3385, %v3159_v24  }
 0x962   : > { %3173 = vperm.xlu1 %3385, %v3160_v51  }
 0x966   : > { %3176 = vperm.xlu1 %3385, %v3161_v7  }
 0x9d9   : > { %v3168_v1 = vpop.permute.xlu1 %3167 }
 0x9da   : > { %v3181_v59 = vrot.slane %v3168_v1, %v6545_v19 }
 0x9dd   : > { %v3171_v58 = vpop.permute.xlu1 %3170 }
 0x9de   : > { %v3185_v53 = vrot.slane %v3171_v58, %v6544_v49 }
 0x9e0   : > { %v3186_v40 = vsel %vm498_vm0, %v3185_v53, %v3181_v59 }
 0x9e1   : > { %v3174_v29 = vpop.permute.xlu1 %3173 }
 0x9e2   : > { %v3190_v47 = vrot.slane %v3174_v29, %v6545_v19 }
 0x9e5   : > { %v3177_v26 = vpop.permute.xlu1 %3176 }
 0x9e6   : > { %v3194_v55 = vrot.slane %v3177_v26, %v6544_v49 }
 0x9e8   : > { %v3195_v6 = vsel %vm498_vm0, %v3194_v55, %v3190_v47 }
 0x9e9   : > { %v3196_v11 = vsel %vm509_vm1, %v3195_v6, %v3186_v40 }
 0x9ea   : > { %3334 = vst.msk [vmem:[%s5872_s8 + $0x6] sm:$0x3] %vm512_vm2, %v3196_v11 }
 0x9eb   : > { %3530 = shalt.err (!%p3527_p3)
}
 0x9ec   : > { %s3531_s27 = scalar_lea.hbm %s5911_s22, 128  ;;  %s3535_s30 = scalar_lea.hbm %s5965_s2, 256 }
 0x9ed   : > { %p3532_p4 = scmp.ne.s32.totalorder %s5911_s22, %s3531_s27  ;;  %p3536_p9 = scmp.lt.u32.totalorder %s5911_s22, %s5965_s2 }
 0x9ee   : > { %p3537_p10 = scmp.lt.u32.totalorder %s3535_s30, %s3531_s27  ;;  %p3539_p12 = scmp.lt.u32.totalorder %s3531_s27, %s5911_s22 }
 0x9ef   : > { %p3533_p7 = pnand %p3532_p4, %p3639_p5 }
 0x9f0   : > { %p3538_p11 = por %p3537_p10, %p3536_p9 }
 0x9f1   : > { %p3534_p8 = pneg %p3533_p7 }
 0x9f2   : > { %p3540_p13 = por %p3539_p12, %p3538_p11 }
 0x9f4   : > { %p3541_p0 = pnand %p3540_p13, %p3534_p8 }
 0x9f6   : > { %3544 = shalt.err (!%p3541_p0)
}
 0x9f7   : > { %s3584_s5 = smov 32   ;;  %s3585_s6 = smov 2  }
 0x9f8   : > { %3342 = dma.vmem_to_hbm [thread:$0]  (%p3639_p5), %s5913_s16, 128, %s5911_s22, %s5922_s13, %s3584_s5, %s3584_s5, %s3585_s6  }
 0x9f9 PF: > { %p3348_p1 = scmp.ge.s32.totalorder %s3579_s12, 2  ;;  %s3229_s7 = sand.u32 1, %s3567_s9  }
 0x9fa   : > { %s3230_s8 = scalar_lea.sflag [#allocation3], %s3229_s7 }
 0x9fb   : > { %p3345_p2 = pnand %p3348_p1, %p3643_p6 }
 0x9fd   : > { %3562 = dma.done.wait (!%p3345_p2), %s3230_s8, 128  }
 0x9fe   : > { %3564 = vsyncadd (!%p3345_p2), %s3230_s8, 4294967168  ;;  %p12_p3 = scmp.ge.s32.totalorder %s3626_s15, 4   ;;  %s6547_s9 = smov %s3571_s10 }
 0x9ff   : > { %s6548_s10 = smov %s3575_s11  ;;  %s6549_s11 = smov %s3637_s18 }
 0xa00   : > { %s6550_s12 = smov %s3626_s15  ;;  %14 = sbr.rel (!%p12_p3) target bundleno = 3 (0x3), region = 69 }
 0xa07   :  { %3235 = vsyncpa [#allocation3], 1 }
 0xa08   :  { %3237 = vsyncpa [#allocation3 + $0x1], 1 }

</bundles_post_ra>
